<compile_context>
chip_gen: v7x
topology: tpu7x:2x2x1
jax: 0.10.0
libtpu: 0.0.40
codegen_flags: <defaults>
</compile_context>

<pallas_src>
import jax
import jax.numpy as jnp
from jax import lax
from jax.experimental import pallas as pl
from jax.experimental.pallas import tpu as pltpu

EPS = 1e-5
GROUPS = 32


def residual_block_pallas(x_nchw, t, p):
    B, Cin, H, W = x_nchw.shape
    Cout = p["conv1_w"].shape[0]
    HW = H * W
    N = B * HW
    assert Cin % GROUPS == 0 and Cout % GROUPS == 0
    GS1 = Cin // GROUPS
    GS2 = Cout // GROUPS
    f32 = jnp.float32
    bf16 = jnp.bfloat16

    # ---- layout plumbing / constant precompute (plain JAX glue) --------------
    # channels in sublanes, batch*spatial fused in lanes: (C, N), N = B*H*W
    x_t = jnp.transpose(x_nchw, (1, 0, 2, 3)).reshape(Cin, N).astype(f32)

    # conv weights (Cout, Cin, 3, 3) -> (Cout, 9*Cin) bf16; tap k=(dy+1)*3+(dx+1)
    w1_all = jnp.transpose(p["conv1_w"], (0, 2, 3, 1)).reshape(Cout, 9 * Cin).astype(bf16)
    w2_all = jnp.transpose(p["conv2_w"], (0, 2, 3, 1)).reshape(Cout, 9 * Cout).astype(bf16)
    wsk = p["skip_w"][:, :, 0, 0].astype(bf16)                        # (Cout, Cin)

    # time embedding hoisted (per-batch, pixel-independent), passed as (Cout, B)
    tact = t * jax.nn.sigmoid(t)
    temb_cb = (tact @ p["time_w"].T + p["time_b"]).T.astype(f32)      # (Cout, B)

    # skinny segment-reduce / broadcast matrices (O(N*B), not O(N^2))
    lane = jnp.arange(N)
    bid = lane // HW
    seg_onehot = (bid[None, :] == jnp.arange(B)[:, None]).astype(f32)  # (B, N)
    seg_mean = seg_onehot.T / float(HW)                                # (N, B)

    # group-mix matrices (only used in-kernel when group size > 1)
    def gmat(C, gs):
        g = jnp.arange(C) // gs
        return (g[:, None] == g[None, :]).astype(f32) / float(gs)

    gm1 = gmat(Cin, GS1)
    gm2 = gmat(Cout, GS2)

    # 9 precomputed boundary masks (shared by both convs; center tap never read)
    ys = (lane % HW) // W
    xs = lane % W
    mlist = []
    for dy in (-1, 0, 1):
        for dx in (-1, 0, 1):
            valid = ((ys + dy >= 0) & (ys + dy < H) &
                     (xs + dx >= 0) & (xs + dx < W))
            mlist.append(valid.astype(f32))
    masks = jnp.stack(mlist, 0).reshape(9, 1, N)

    col = lambda v: v.reshape(-1, 1).astype(f32)
    g1, be1 = col(p["gn1_g"]), col(p["gn1_b"])
    g2, be2 = col(p["gn2_g"]), col(p["gn2_b"])
    b1c, b2c = col(p["conv1_b"]), col(p["conv2_b"])
    bsk = col(p["skip_b"])

    # ---- the kernel -----------------------------------------------------------
    def kernel(x_ref, mk_ref, sm_ref, sb_ref,
               g1_ref, be1_ref, gm1_ref, w1_ref, b1_ref, te_ref,
               g2_ref, be2_ref, gm2_ref, w2_ref, b2_ref,
               ws_ref, bs_ref, o_ref, st_ref):

        seg_m = sm_ref[...]                                    # (N, B): 1/HW per-batch
        seg_b = sb_ref[...]                                    # (B, N): one-hot bcast

        def seg_stat(v, gm_ref):
            # per-(channel,batch) spatial mean, group-mixed, lane-broadcast back
            s = jnp.dot(v, seg_m, preferred_element_type=jnp.float32)     # (C, B)
            if gm_ref is not None:
                s = jnp.dot(gm_ref[...], s, preferred_element_type=jnp.float32)
            return jnp.dot(s, seg_b, preferred_element_type=jnp.float32)  # (C, N)

        def gn_silu(a, gm_ref, gam_ref, bet_ref):
            mu = seg_stat(a, gm_ref)
            d = a - mu
            var = seg_stat(d * d, gm_ref)                      # E[(a - mu)^2] form
            y = d * lax.rsqrt(var + EPS) * gam_ref[...] + bet_ref[...]
            return y * jax.nn.sigmoid(y)                       # SiLU (EUP)

        def conv3x3(a, w_ref, b_ref):
            # stack the 9 shifted+masked taps into bf16 scratch, ONE fused matmul
            C = a.shape[0]
            k = 0
            for dy in (-1, 0, 1):
                for dx in (-1, 0, 1):
                    sh = dy * W + dx
                    if sh == 0:                 # center tap: no roll, mask == 1
                        tap = a
                    else:
                        # roll wraps mod N across batch edges; every wrapped lane
                        # is spatially OOB and zeroed by the mask (see header).
                        tap = pltpu.roll(a, shift=(-sh) % N, axis=1) * mk_ref[k]
                    st_ref[C * k:C * (k + 1), :] = tap.astype(st_ref.dtype)
                    k += 1
            return jnp.dot(w_ref[...], st_ref[0:9 * C, :],
                           preferred_element_type=jnp.float32) + b_ref[...]

        x = x_ref[...]                                         # (Cin, N) f32

        # conv1 branch: GN -> SiLU -> 3x3 conv, then add broadcast time embedding
        a1 = gn_silu(x, gm1_ref if GS1 > 1 else None, g1_ref, be1_ref)
        h = (conv3x3(a1, w1_ref, b1_ref)
             + jnp.dot(te_ref[...], seg_b, preferred_element_type=jnp.float32))

        # attention: cbam=False -> Identity; dropout p=0 -> Identity
        a2 = gn_silu(h, gm2_ref if GS2 > 1 else None, g2_ref, be2_ref)
        h2 = conv3x3(a2, w2_ref, b2_ref)

        # skip connection: 1x1 conv (channel_in != channel_out), bf16 MXU operands
        skip = jnp.dot(ws_ref[...], x.astype(jnp.bfloat16),
                       preferred_element_type=jnp.float32) + bs_ref[...]

        o_ref[...] = (skip + h2).astype(o_ref.dtype)

    def full_spec(shape):
        zero = (0,) * len(shape)
        return pl.BlockSpec(shape, lambda i, _z=zero: _z)

    operands = (x_t, masks, seg_mean, seg_onehot,
                g1, be1, gm1, w1_all, b1c, temb_cb,
                g2, be2, gm2, w2_all, b2c, wsk, bsk)

    out = pl.pallas_call(
        kernel,
        out_shape=jax.ShapeDtypeStruct((Cout, N), jnp.float32),
        grid_spec=pltpu.PrefetchScalarGridSpec(
            num_scalar_prefetch=0,
            grid=(1,),
            in_specs=[full_spec(op.shape) for op in operands],
            out_specs=full_spec((Cout, N)),
            scratch_shapes=[pltpu.VMEM((9 * Cout, N), jnp.bfloat16)]),
        compiler_params=pltpu.CompilerParams(
            dimension_semantics=("arbitrary",),
            vmem_limit_bytes=64 * 1024 * 1024),
    )(*operands)

    # (Cout, B*HW) -> NCHW
    return jnp.transpose(out.reshape(Cout, B, H, W), (1, 0, 2, 3))


# ---- pure-JAX reference (correctness sanity check only) -----------------------
def reference(x, t, p):
    def silu(v):
        return v * jax.nn.sigmoid(v)

    def gn(v, g, b):
        B, C, H, W = v.shape
        vr = v.reshape(B, GROUPS, -1)
        m = vr.mean(-1, keepdims=True)
        var = vr.var(-1, keepdims=True)
        vn = ((vr - m) * lax.rsqrt(var + EPS)).reshape(B, C, H, W)
        return vn * g[None, :, None, None] + b[None, :, None, None]

    def conv(v, w, b):
        return lax.conv_general_dilated(
            v, w, (1, 1), "SAME",
            dimension_numbers=("NCHW", "OIHW", "NCHW")) + b[None, :, None, None]

    h = conv(silu(gn(x, p["gn1_g"], p["gn1_b"])), p["conv1_w"], p["conv1_b"])
    temb = silu(t) @ p["time_w"].T + p["time_b"]
    h = h + temb[:, :, None, None]
    h = conv(silu(gn(h, p["gn2_g"], p["gn2_b"])), p["conv2_w"], p["conv2_b"])
    skip = conv(x, p["skip_w"], p["skip_b"])
    return skip + h


if __name__ == "__main__":
    # GroupNorm(32, C) requires C % 32 == 0
    B, Cin, Cout, H, W, Tc = 2, 32, 64, 8, 8, 16

    key = jax.random.PRNGKey(0)
    ks = jax.random.split(key, 14)
    n = lambda k, s: (0.1 * jax.random.normal(k, s)).astype(jnp.float32)

    params = {
        "gn1_g": 1.0 + n(ks[0], (Cin,)),
        "gn1_b": n(ks[1], (Cin,)),
        "conv1_w": n(ks[2], (Cout, Cin, 3, 3)),
        "conv1_b": n(ks[3], (Cout,)),
        "time_w": n(ks[4], (Cout, Tc)),
        "time_b": n(ks[5], (Cout,)),
        "gn2_g": 1.0 + n(ks[6], (Cout,)),
        "gn2_b": n(ks[7], (Cout,)),
        "conv2_w": n(ks[8], (Cout, Cout, 3, 3)),
        "conv2_b": n(ks[9], (Cout,)),
        "skip_w": n(ks[10], (Cout, Cin, 1, 1)),
        "skip_b": n(ks[11], (Cout,)),
    }
    x = jax.random.normal(ks[12], (B, Cin, H, W), dtype=jnp.float32)
    t = jax.random.normal(ks[13], (B, Tc), dtype=jnp.float32)

    # TODO(synk): Dropout (p=0) and CBAM (cbam=False) are identities in this config.
    out = jax.block_until_ready(residual_block_pallas(x, t, params))
    ref = jax.block_until_ready(reference(x, t, params))

    # bf16 MXU operands (f32 accumulation) -> tolerance loosened vs. the all-f32
    # reference, per the review's correctness note on bf16 adoption.
    if not bool(jnp.allclose(out, ref, atol=3e-2, rtol=3e-2)):
        raise RuntimeError(
            f"mismatch: max abs err = {float(jnp.max(jnp.abs(out - ref)))}")
    print("KERNEL_OK")
</pallas_src>

<mosaic_0001>
module attributes {stable_mosaic.version = 11 : i64} {
  func.func @kernel(%arg0: i32, %arg1: memref<32x128xf32, #tpu.memory_space<vmem>>, %arg2: memref<9x1x128xf32, #tpu.memory_space<vmem>>, %arg3: memref<128x2xf32, #tpu.memory_space<vmem>>, %arg4: memref<2x128xf32, #tpu.memory_space<vmem>>, %arg5: memref<32x1xf32, #tpu.memory_space<vmem>>, %arg6: memref<32x1xf32, #tpu.memory_space<vmem>>, %arg7: memref<32x32xf32, #tpu.memory_space<vmem>>, %arg8: memref<64x288xbf16, #tpu.memory_space<vmem>>, %arg9: memref<64x1xf32, #tpu.memory_space<vmem>>, %arg10: memref<64x2xf32, #tpu.memory_space<vmem>>, %arg11: memref<64x1xf32, #tpu.memory_space<vmem>>, %arg12: memref<64x1xf32, #tpu.memory_space<vmem>>, %arg13: memref<64x64xf32, #tpu.memory_space<vmem>>, %arg14: memref<64x576xbf16, #tpu.memory_space<vmem>>, %arg15: memref<64x1xf32, #tpu.memory_space<vmem>>, %arg16: memref<64x32xbf16, #tpu.memory_space<vmem>>, %arg17: memref<64x1xf32, #tpu.memory_space<vmem>>, %arg18: memref<64x128xf32, #tpu.memory_space<vmem>>, %arg19: memref<576x128xbf16, #tpu.memory_space<vmem>>) attributes {dimension_semantics = [#tpu.dimension_semantics<arbitrary>], iteration_bounds = array<i64: 1>, scalar_prefetch = 0 : i64, scratch_operands = 1 : i64, tpu.core_type = #tpu.core_type<tc>, window_params = [{pipeline_mode = #tpu.pipeline_mode<synchronous>, transform_indices = @transform_0, window_bounds = array<i64: 32, 128>}, {pipeline_mode = #tpu.pipeline_mode<synchronous>, transform_indices = @transform_1, window_bounds = array<i64: 9, 1, 128>}, {pipeline_mode = #tpu.pipeline_mode<synchronous>, transform_indices = @transform_2, window_bounds = array<i64: 128, 2>}, {pipeline_mode = #tpu.pipeline_mode<synchronous>, transform_indices = @transform_3, window_bounds = array<i64: 2, 128>}, {pipeline_mode = #tpu.pipeline_mode<synchronous>, transform_indices = @transform_4, window_bounds = array<i64: 32, 1>}, {pipeline_mode = #tpu.pipeline_mode<synchronous>, transform_indices = @transform_5, window_bounds = array<i64: 32, 1>}, {pipeline_mode = #tpu.pipeline_mode<synchronous>, transform_indices = @transform_6, window_bounds = array<i64: 32, 32>}, {pipeline_mode = #tpu.pipeline_mode<synchronous>, transform_indices = @transform_7, window_bounds = array<i64: 64, 288>}, {pipeline_mode = #tpu.pipeline_mode<synchronous>, transform_indices = @transform_8, window_bounds = array<i64: 64, 1>}, {pipeline_mode = #tpu.pipeline_mode<synchronous>, transform_indices = @transform_9, window_bounds = array<i64: 64, 2>}, {pipeline_mode = #tpu.pipeline_mode<synchronous>, transform_indices = @transform_10, window_bounds = array<i64: 64, 1>}, {pipeline_mode = #tpu.pipeline_mode<synchronous>, transform_indices = @transform_11, window_bounds = array<i64: 64, 1>}, {pipeline_mode = #tpu.pipeline_mode<synchronous>, transform_indices = @transform_12, window_bounds = array<i64: 64, 64>}, {pipeline_mode = #tpu.pipeline_mode<synchronous>, transform_indices = @transform_13, window_bounds = array<i64: 64, 576>}, {pipeline_mode = #tpu.pipeline_mode<synchronous>, transform_indices = @transform_14, window_bounds = array<i64: 64, 1>}, {pipeline_mode = #tpu.pipeline_mode<synchronous>, transform_indices = @transform_15, window_bounds = array<i64: 64, 32>}, {pipeline_mode = #tpu.pipeline_mode<synchronous>, transform_indices = @transform_16, window_bounds = array<i64: 64, 1>}, {pipeline_mode = #tpu.pipeline_mode<synchronous>, transform_indices = @transform_17, window_bounds = array<i64: 64, 128>}]} {
    %c0 = arith.constant 0 : index
    %c0_0 = arith.constant 0 : index
    %0 = vector.load %arg3[%c0, %c0_0] : memref<128x2xf32, #tpu.memory_space<vmem>>, vector<128x2xf32>
    %c0_1 = arith.constant 0 : index
    %c0_2 = arith.constant 0 : index
    %1 = vector.load %arg4[%c0_1, %c0_2] : memref<2x128xf32, #tpu.memory_space<vmem>>, vector<2x128xf32>
    %c0_3 = arith.constant 0 : index
    %c0_4 = arith.constant 0 : index
    %2 = vector.load %arg1[%c0_3, %c0_4] : memref<32x128xf32, #tpu.memory_space<vmem>>, vector<32x128xf32>
    %cst = arith.constant dense<0.000000e+00> : vector<32x2xf32>
    %3 = tpu.matmul %2, %0, %cst {dimension_numbers = #tpu.dot_dimension_numbers<[1], [0], [0], [1], [0, 0, 1, 1], [], []>} : vector<32x128xf32>, vector<128x2xf32>, vector<32x2xf32> -> vector<32x2xf32>
    %cst_5 = arith.constant dense<0.000000e+00> : vector<32x128xf32>
    %4 = tpu.matmul %3, %1, %cst_5 {dimension_numbers = #tpu.dot_dimension_numbers<[1], [0], [0], [1], [0, 0, 1, 1], [], []>} : vector<32x2xf32>, vector<2x128xf32>, vector<32x128xf32> -> vector<32x128xf32>
    %5 = arith.subf %2, %4 : vector<32x128xf32>
    %6 = arith.mulf %5, %5 : vector<32x128xf32>
    %cst_6 = arith.constant dense<0.000000e+00> : vector<32x2xf32>
    %7 = tpu.matmul %6, %0, %cst_6 {dimension_numbers = #tpu.dot_dimension_numbers<[1], [0], [0], [1], [0, 0, 1, 1], [], []>} : vector<32x128xf32>, vector<128x2xf32>, vector<32x2xf32> -> vector<32x2xf32>
    %cst_7 = arith.constant dense<0.000000e+00> : vector<32x128xf32>
    %8 = tpu.matmul %7, %1, %cst_7 {dimension_numbers = #tpu.dot_dimension_numbers<[1], [0], [0], [1], [0, 0, 1, 1], [], []>} : vector<32x2xf32>, vector<2x128xf32>, vector<32x128xf32> -> vector<32x128xf32>
    %cst_8 = arith.constant 9.99999974E-6 : f32
    %9 = vector.broadcast %cst_8 : f32 to vector<32x128xf32>
    %10 = arith.addf %8, %9 : vector<32x128xf32>
    %11 = math.rsqrt %10 : vector<32x128xf32>
    %12 = arith.mulf %5, %11 : vector<32x128xf32>
    %c0_9 = arith.constant 0 : index
    %c0_10 = arith.constant 0 : index
    %13 = vector.load %arg5[%c0_9, %c0_10] : memref<32x1xf32, #tpu.memory_space<vmem>>, vector<32x1xf32>
    %14 = vector.broadcast %13 : vector<32x1xf32> to vector<32x128xf32>
    %15 = arith.mulf %12, %14 : vector<32x128xf32>
    %c0_11 = arith.constant 0 : index
    %c0_12 = arith.constant 0 : index
    %16 = vector.load %arg6[%c0_11, %c0_12] : memref<32x1xf32, #tpu.memory_space<vmem>>, vector<32x1xf32>
    %17 = vector.broadcast %16 : vector<32x1xf32> to vector<32x128xf32>
    %18 = arith.addf %15, %17 : vector<32x128xf32>
    %19 = arith.negf %18 : vector<32x128xf32>
    %20 = math.exp %19 : vector<32x128xf32>
    %cst_13 = arith.constant 1.000000e+00 : f32
    %21 = vector.broadcast %cst_13 : f32 to vector<32x128xf32>
    %22 = arith.addf %21, %20 : vector<32x128xf32>
    %23 = arith.divf %21, %22 : vector<32x128xf32>
    %24 = arith.mulf %18, %23 : vector<32x128xf32>
    %c9_i32 = arith.constant 9 : i32
    %25 = tpu.dynamic_rotate %24 by %c9_i32 dim 1 : vector<32x128xf32>, i32 -> vector<32x128xf32>
    %c0_14 = arith.constant 0 : index
    %c0_15 = arith.constant 0 : index
    %c0_16 = arith.constant 0 : index
    %26 = vector.load %arg2[%c0_14, %c0_15, %c0_16] : memref<9x1x128xf32, #tpu.memory_space<vmem>>, vector<1x1x128xf32>
    %27 = vector.shape_cast %26 : vector<1x1x128xf32> to vector<1x128xf32>
    %28 = vector.broadcast %27 : vector<1x128xf32> to vector<32x128xf32>
    %29 = arith.mulf %25, %28 : vector<32x128xf32>
    %30 = arith.truncf %29 : vector<32x128xf32> to vector<32x128xbf16>
    %c0_17 = arith.constant 0 : index
    %c0_18 = arith.constant 0 : index
    %31 = vector.load %arg19[%c0_17, %c0_18] : memref<576x128xbf16, #tpu.memory_space<vmem>>, vector<32x128xbf16>
    tpu.vector_store %arg19[%c0_17, %c0_18], %30 {strides = array<i32>} : memref<576x128xbf16, #tpu.memory_space<vmem>>, vector<32x128xbf16>,
    %c8_i32 = arith.constant 8 : i32
    %32 = tpu.dynamic_rotate %24 by %c8_i32 dim 1 : vector<32x128xf32>, i32 -> vector<32x128xf32>
    %c1 = arith.constant 1 : index
    %c0_19 = arith.constant 0 : index
    %c0_20 = arith.constant 0 : index
    %33 = vector.load %arg2[%c1, %c0_19, %c0_20] : memref<9x1x128xf32, #tpu.memory_space<vmem>>, vector<1x1x128xf32>
    %34 = vector.shape_cast %33 : vector<1x1x128xf32> to vector<1x128xf32>
    %35 = vector.broadcast %34 : vector<1x128xf32> to vector<32x128xf32>
    %36 = arith.mulf %32, %35 : vector<32x128xf32>
    %37 = arith.truncf %36 : vector<32x128xf32> to vector<32x128xbf16>
    %c32 = arith.constant 32 : index
    %c0_21 = arith.constant 0 : index
    %38 = vector.load %arg19[%c32, %c0_21] : memref<576x128xbf16, #tpu.memory_space<vmem>>, vector<32x128xbf16>
    tpu.vector_store %arg19[%c32, %c0_21], %37 {strides = array<i32>} : memref<576x128xbf16, #tpu.memory_space<vmem>>, vector<32x128xbf16>,
    %c7_i32 = arith.constant 7 : i32
    %39 = tpu.dynamic_rotate %24 by %c7_i32 dim 1 : vector<32x128xf32>, i32 -> vector<32x128xf32>
    %c2 = arith.constant 2 : index
    %c0_22 = arith.constant 0 : index
    %c0_23 = arith.constant 0 : index
    %40 = vector.load %arg2[%c2, %c0_22, %c0_23] : memref<9x1x128xf32, #tpu.memory_space<vmem>>, vector<1x1x128xf32>
    %41 = vector.shape_cast %40 : vector<1x1x128xf32> to vector<1x128xf32>
    %42 = vector.broadcast %41 : vector<1x128xf32> to vector<32x128xf32>
    %43 = arith.mulf %39, %42 : vector<32x128xf32>
    %44 = arith.truncf %43 : vector<32x128xf32> to vector<32x128xbf16>
    %c64 = arith.constant 64 : index
    %c0_24 = arith.constant 0 : index
    %45 = vector.load %arg19[%c64, %c0_24] : memref<576x128xbf16, #tpu.memory_space<vmem>>, vector<32x128xbf16>
    tpu.vector_store %arg19[%c64, %c0_24], %44 {strides = array<i32>} : memref<576x128xbf16, #tpu.memory_space<vmem>>, vector<32x128xbf16>,
    %c1_i32 = arith.constant 1 : i32
    %46 = tpu.dynamic_rotate %24 by %c1_i32 dim 1 : vector<32x128xf32>, i32 -> vector<32x128xf32>
    %c3 = arith.constant 3 : index
    %c0_25 = arith.constant 0 : index
    %c0_26 = arith.constant 0 : index
    %47 = vector.load %arg2[%c3, %c0_25, %c0_26] : memref<9x1x128xf32, #tpu.memory_space<vmem>>, vector<1x1x128xf32>
    %48 = vector.shape_cast %47 : vector<1x1x128xf32> to vector<1x128xf32>
    %49 = vector.broadcast %48 : vector<1x128xf32> to vector<32x128xf32>
    %50 = arith.mulf %46, %49 : vector<32x128xf32>
    %51 = arith.truncf %50 : vector<32x128xf32> to vector<32x128xbf16>
    %c96 = arith.constant 96 : index
    %c0_27 = arith.constant 0 : index
    %52 = vector.load %arg19[%c96, %c0_27] : memref<576x128xbf16, #tpu.memory_space<vmem>>, vector<32x128xbf16>
    tpu.vector_store %arg19[%c96, %c0_27], %51 {strides = array<i32>} : memref<576x128xbf16, #tpu.memory_space<vmem>>, vector<32x128xbf16>,
    %53 = arith.truncf %24 : vector<32x128xf32> to vector<32x128xbf16>
    %c128 = arith.constant 128 : index
    %c0_28 = arith.constant 0 : index
    %54 = vector.load %arg19[%c128, %c0_28] : memref<576x128xbf16, #tpu.memory_space<vmem>>, vector<32x128xbf16>
    tpu.vector_store %arg19[%c128, %c0_28], %53 {strides = array<i32>} : memref<576x128xbf16, #tpu.memory_space<vmem>>, vector<32x128xbf16>,
    %c127_i32 = arith.constant 127 : i32
    %55 = tpu.dynamic_rotate %24 by %c127_i32 dim 1 : vector<32x128xf32>, i32 -> vector<32x128xf32>
    %c5 = arith.constant 5 : index
    %c0_29 = arith.constant 0 : index
    %c0_30 = arith.constant 0 : index
    %56 = vector.load %arg2[%c5, %c0_29, %c0_30] : memref<9x1x128xf32, #tpu.memory_space<vmem>>, vector<1x1x128xf32>
    %57 = vector.shape_cast %56 : vector<1x1x128xf32> to vector<1x128xf32>
    %58 = vector.broadcast %57 : vector<1x128xf32> to vector<32x128xf32>
    %59 = arith.mulf %55, %58 : vector<32x128xf32>
    %60 = arith.truncf %59 : vector<32x128xf32> to vector<32x128xbf16>
    %c160 = arith.constant 160 : index
    %c0_31 = arith.constant 0 : index
    %61 = vector.load %arg19[%c160, %c0_31] : memref<576x128xbf16, #tpu.memory_space<vmem>>, vector<32x128xbf16>
    tpu.vector_store %arg19[%c160, %c0_31], %60 {strides = array<i32>} : memref<576x128xbf16, #tpu.memory_space<vmem>>, vector<32x128xbf16>,
    %c121_i32 = arith.constant 121 : i32
    %62 = tpu.dynamic_rotate %24 by %c121_i32 dim 1 : vector<32x128xf32>, i32 -> vector<32x128xf32>
    %c6 = arith.constant 6 : index
    %c0_32 = arith.constant 0 : index
    %c0_33 = arith.constant 0 : index
    %63 = vector.load %arg2[%c6, %c0_32, %c0_33] : memref<9x1x128xf32, #tpu.memory_space<vmem>>, vector<1x1x128xf32>
    %64 = vector.shape_cast %63 : vector<1x1x128xf32> to vector<1x128xf32>
    %65 = vector.broadcast %64 : vector<1x128xf32> to vector<32x128xf32>
    %66 = arith.mulf %62, %65 : vector<32x128xf32>
    %67 = arith.truncf %66 : vector<32x128xf32> to vector<32x128xbf16>
    %c192 = arith.constant 192 : index
    %c0_34 = arith.constant 0 : index
    %68 = vector.load %arg19[%c192, %c0_34] : memref<576x128xbf16, #tpu.memory_space<vmem>>, vector<32x128xbf16>
    tpu.vector_store %arg19[%c192, %c0_34], %67 {strides = array<i32>} : memref<576x128xbf16, #tpu.memory_space<vmem>>, vector<32x128xbf16>,
    %c120_i32 = arith.constant 120 : i32
    %69 = tpu.dynamic_rotate %24 by %c120_i32 dim 1 : vector<32x128xf32>, i32 -> vector<32x128xf32>
    %c7 = arith.constant 7 : index
    %c0_35 = arith.constant 0 : index
    %c0_36 = arith.constant 0 : index
    %70 = vector.load %arg2[%c7, %c0_35, %c0_36] : memref<9x1x128xf32, #tpu.memory_space<vmem>>, vector<1x1x128xf32>
    %71 = vector.shape_cast %70 : vector<1x1x128xf32> to vector<1x128xf32>
    %72 = vector.broadcast %71 : vector<1x128xf32> to vector<32x128xf32>
    %73 = arith.mulf %69, %72 : vector<32x128xf32>
    %74 = arith.truncf %73 : vector<32x128xf32> to vector<32x128xbf16>
    %c224 = arith.constant 224 : index
    %c0_37 = arith.constant 0 : index
    %75 = vector.load %arg19[%c224, %c0_37] : memref<576x128xbf16, #tpu.memory_space<vmem>>, vector<32x128xbf16>
    tpu.vector_store %arg19[%c224, %c0_37], %74 {strides = array<i32>} : memref<576x128xbf16, #tpu.memory_space<vmem>>, vector<32x128xbf16>,
    %c119_i32 = arith.constant 119 : i32
    %76 = tpu.dynamic_rotate %24 by %c119_i32 dim 1 : vector<32x128xf32>, i32 -> vector<32x128xf32>
    %c8 = arith.constant 8 : index
    %c0_38 = arith.constant 0 : index
    %c0_39 = arith.constant 0 : index
    %77 = vector.load %arg2[%c8, %c0_38, %c0_39] : memref<9x1x128xf32, #tpu.memory_space<vmem>>, vector<1x1x128xf32>
    %78 = vector.shape_cast %77 : vector<1x1x128xf32> to vector<1x128xf32>
    %79 = vector.broadcast %78 : vector<1x128xf32> to vector<32x128xf32>
    %80 = arith.mulf %76, %79 : vector<32x128xf32>
    %81 = arith.truncf %80 : vector<32x128xf32> to vector<32x128xbf16>
    %c256 = arith.constant 256 : index
    %c0_40 = arith.constant 0 : index
    %82 = vector.load %arg19[%c256, %c0_40] : memref<576x128xbf16, #tpu.memory_space<vmem>>, vector<32x128xbf16>
    tpu.vector_store %arg19[%c256, %c0_40], %81 {strides = array<i32>} : memref<576x128xbf16, #tpu.memory_space<vmem>>, vector<32x128xbf16>,
    %c0_41 = arith.constant 0 : index
    %c0_42 = arith.constant 0 : index
    %83 = vector.load %arg8[%c0_41, %c0_42] : memref<64x288xbf16, #tpu.memory_space<vmem>>, vector<64x288xbf16>
    %c0_43 = arith.constant 0 : index
    %c0_44 = arith.constant 0 : index
    %84 = vector.load %arg19[%c0_43, %c0_44] : memref<576x128xbf16, #tpu.memory_space<vmem>>, vector<288x128xbf16>
    %cst_45 = arith.constant dense<0.000000e+00> : vector<64x128xf32>
    %85 = tpu.matmul %83, %84, %cst_45 {dimension_numbers = #tpu.dot_dimension_numbers<[1], [0], [0], [1], [0, 0, 1, 1], [], []>} : vector<64x288xbf16>, vector<288x128xbf16>, vector<64x128xf32> -> vector<64x128xf32>
    %c0_46 = arith.constant 0 : index
    %c0_47 = arith.constant 0 : index
    %86 = vector.load %arg9[%c0_46, %c0_47] : memref<64x1xf32, #tpu.memory_space<vmem>>, vector<64x1xf32>
    %87 = vector.broadcast %86 : vector<64x1xf32> to vector<64x128xf32>
    %88 = arith.addf %85, %87 : vector<64x128xf32>
    %c0_48 = arith.constant 0 : index
    %c0_49 = arith.constant 0 : index
    %89 = vector.load %arg10[%c0_48, %c0_49] : memref<64x2xf32, #tpu.memory_space<vmem>>, vector<64x2xf32>
    %cst_50 = arith.constant dense<0.000000e+00> : vector<64x128xf32>
    %90 = tpu.matmul %89, %1, %cst_50 {dimension_numbers = #tpu.dot_dimension_numbers<[1], [0], [0], [1], [0, 0, 1, 1], [], []>} : vector<64x2xf32>, vector<2x128xf32>, vector<64x128xf32> -> vector<64x128xf32>
    %91 = arith.addf %88, %90 : vector<64x128xf32>
    %cst_51 = arith.constant dense<0.000000e+00> : vector<64x2xf32>
    %92 = tpu.matmul %91, %0, %cst_51 {dimension_numbers = #tpu.dot_dimension_numbers<[1], [0], [0], [1], [0, 0, 1, 1], [], []>} : vector<64x128xf32>, vector<128x2xf32>, vector<64x2xf32> -> vector<64x2xf32>
    %c0_52 = arith.constant 0 : index
    %c0_53 = arith.constant 0 : index
    %93 = vector.load %arg13[%c0_52, %c0_53] : memref<64x64xf32, #tpu.memory_space<vmem>>, vector<64x64xf32>
    %cst_54 = arith.constant dense<0.000000e+00> : vector<64x2xf32>
    %94 = tpu.matmul %93, %92, %cst_54 {dimension_numbers = #tpu.dot_dimension_numbers<[1], [0], [0], [1], [0, 0, 1, 1], [], []>} : vector<64x64xf32>, vector<64x2xf32>, vector<64x2xf32> -> vector<64x2xf32>
    %cst_55 = arith.constant dense<0.000000e+00> : vector<64x128xf32>
    %95 = tpu.matmul %94, %1, %cst_55 {dimension_numbers = #tpu.dot_dimension_numbers<[1], [0], [0], [1], [0, 0, 1, 1], [], []>} : vector<64x2xf32>, vector<2x128xf32>, vector<64x128xf32> -> vector<64x128xf32>
    %96 = arith.subf %91, %95 : vector<64x128xf32>
    %97 = arith.mulf %96, %96 : vector<64x128xf32>
    %cst_56 = arith.constant dense<0.000000e+00> : vector<64x2xf32>
    %98 = tpu.matmul %97, %0, %cst_56 {dimension_numbers = #tpu.dot_dimension_numbers<[1], [0], [0], [1], [0, 0, 1, 1], [], []>} : vector<64x128xf32>, vector<128x2xf32>, vector<64x2xf32> -> vector<64x2xf32>
    %c0_57 = arith.constant 0 : index
    %c0_58 = arith.constant 0 : index
    %99 = vector.load %arg13[%c0_57, %c0_58] : memref<64x64xf32, #tpu.memory_space<vmem>>, vector<64x64xf32>
    %cst_59 = arith.constant dense<0.000000e+00> : vector<64x2xf32>
    %100 = tpu.matmul %99, %98, %cst_59 {dimension_numbers = #tpu.dot_dimension_numbers<[1], [0], [0], [1], [0, 0, 1, 1], [], []>} : vector<64x64xf32>, vector<64x2xf32>, vector<64x2xf32> -> vector<64x2xf32>
    %cst_60 = arith.constant dense<0.000000e+00> : vector<64x128xf32>
    %101 = tpu.matmul %100, %1, %cst_60 {dimension_numbers = #tpu.dot_dimension_numbers<[1], [0], [0], [1], [0, 0, 1, 1], [], []>} : vector<64x2xf32>, vector<2x128xf32>, vector<64x128xf32> -> vector<64x128xf32>
    %cst_61 = arith.constant 9.99999974E-6 : f32
    %102 = vector.broadcast %cst_61 : f32 to vector<64x128xf32>
    %103 = arith.addf %101, %102 : vector<64x128xf32>
    %104 = math.rsqrt %103 : vector<64x128xf32>
    %105 = arith.mulf %96, %104 : vector<64x128xf32>
    %c0_62 = arith.constant 0 : index
    %c0_63 = arith.constant 0 : index
    %106 = vector.load %arg11[%c0_62, %c0_63] : memref<64x1xf32, #tpu.memory_space<vmem>>, vector<64x1xf32>
    %107 = vector.broadcast %106 : vector<64x1xf32> to vector<64x128xf32>
    %108 = arith.mulf %105, %107 : vector<64x128xf32>
    %c0_64 = arith.constant 0 : index
    %c0_65 = arith.constant 0 : index
    %109 = vector.load %arg12[%c0_64, %c0_65] : memref<64x1xf32, #tpu.memory_space<vmem>>, vector<64x1xf32>
    %110 = vector.broadcast %109 : vector<64x1xf32> to vector<64x128xf32>
    %111 = arith.addf %108, %110 : vector<64x128xf32>
    %112 = arith.negf %111 : vector<64x128xf32>
    %113 = math.exp %112 : vector<64x128xf32>
    %cst_66 = arith.constant 1.000000e+00 : f32
    %114 = vector.broadcast %cst_66 : f32 to vector<64x128xf32>
    %115 = arith.addf %114, %113 : vector<64x128xf32>
    %116 = arith.divf %114, %115 : vector<64x128xf32>
    %117 = arith.mulf %111, %116 : vector<64x128xf32>
    %c9_i32_67 = arith.constant 9 : i32
    %118 = tpu.dynamic_rotate %117 by %c9_i32_67 dim 1 : vector<64x128xf32>, i32 -> vector<64x128xf32>
    %c0_68 = arith.constant 0 : index
    %c0_69 = arith.constant 0 : index
    %c0_70 = arith.constant 0 : index
    %119 = vector.load %arg2[%c0_68, %c0_69, %c0_70] : memref<9x1x128xf32, #tpu.memory_space<vmem>>, vector<1x1x128xf32>
    %120 = vector.shape_cast %119 : vector<1x1x128xf32> to vector<1x128xf32>
    %121 = vector.broadcast %120 : vector<1x128xf32> to vector<64x128xf32>
    %122 = arith.mulf %118, %121 : vector<64x128xf32>
    %123 = arith.truncf %122 : vector<64x128xf32> to vector<64x128xbf16>
    %c0_71 = arith.constant 0 : index
    %c0_72 = arith.constant 0 : index
    %124 = vector.load %arg19[%c0_71, %c0_72] : memref<576x128xbf16, #tpu.memory_space<vmem>>, vector<64x128xbf16>
    tpu.vector_store %arg19[%c0_71, %c0_72], %123 {strides = array<i32>} : memref<576x128xbf16, #tpu.memory_space<vmem>>, vector<64x128xbf16>,
    %c8_i32_73 = arith.constant 8 : i32
    %125 = tpu.dynamic_rotate %117 by %c8_i32_73 dim 1 : vector<64x128xf32>, i32 -> vector<64x128xf32>
    %c1_74 = arith.constant 1 : index
    %c0_75 = arith.constant 0 : index
    %c0_76 = arith.constant 0 : index
    %126 = vector.load %arg2[%c1_74, %c0_75, %c0_76] : memref<9x1x128xf32, #tpu.memory_space<vmem>>, vector<1x1x128xf32>
    %127 = vector.shape_cast %126 : vector<1x1x128xf32> to vector<1x128xf32>
    %128 = vector.broadcast %127 : vector<1x128xf32> to vector<64x128xf32>
    %129 = arith.mulf %125, %128 : vector<64x128xf32>
    %130 = arith.truncf %129 : vector<64x128xf32> to vector<64x128xbf16>
    %c64_77 = arith.constant 64 : index
    %c0_78 = arith.constant 0 : index
    %131 = vector.load %arg19[%c64_77, %c0_78] : memref<576x128xbf16, #tpu.memory_space<vmem>>, vector<64x128xbf16>
    tpu.vector_store %arg19[%c64_77, %c0_78], %130 {strides = array<i32>} : memref<576x128xbf16, #tpu.memory_space<vmem>>, vector<64x128xbf16>,
    %c7_i32_79 = arith.constant 7 : i32
    %132 = tpu.dynamic_rotate %117 by %c7_i32_79 dim 1 : vector<64x128xf32>, i32 -> vector<64x128xf32>
    %c2_80 = arith.constant 2 : index
    %c0_81 = arith.constant 0 : index
    %c0_82 = arith.constant 0 : index
    %133 = vector.load %arg2[%c2_80, %c0_81, %c0_82] : memref<9x1x128xf32, #tpu.memory_space<vmem>>, vector<1x1x128xf32>
    %134 = vector.shape_cast %133 : vector<1x1x128xf32> to vector<1x128xf32>
    %135 = vector.broadcast %134 : vector<1x128xf32> to vector<64x128xf32>
    %136 = arith.mulf %132, %135 : vector<64x128xf32>
    %137 = arith.truncf %136 : vector<64x128xf32> to vector<64x128xbf16>
    %c128_83 = arith.constant 128 : index
    %c0_84 = arith.constant 0 : index
    %138 = vector.load %arg19[%c128_83, %c0_84] : memref<576x128xbf16, #tpu.memory_space<vmem>>, vector<64x128xbf16>
    tpu.vector_store %arg19[%c128_83, %c0_84], %137 {strides = array<i32>} : memref<576x128xbf16, #tpu.memory_space<vmem>>, vector<64x128xbf16>,
    %c1_i32_85 = arith.constant 1 : i32
    %139 = tpu.dynamic_rotate %117 by %c1_i32_85 dim 1 : vector<64x128xf32>, i32 -> vector<64x128xf32>
    %c3_86 = arith.constant 3 : index
    %c0_87 = arith.constant 0 : index
    %c0_88 = arith.constant 0 : index
    %140 = vector.load %arg2[%c3_86, %c0_87, %c0_88] : memref<9x1x128xf32, #tpu.memory_space<vmem>>, vector<1x1x128xf32>
    %141 = vector.shape_cast %140 : vector<1x1x128xf32> to vector<1x128xf32>
    %142 = vector.broadcast %141 : vector<1x128xf32> to vector<64x128xf32>
    %143 = arith.mulf %139, %142 : vector<64x128xf32>
    %144 = arith.truncf %143 : vector<64x128xf32> to vector<64x128xbf16>
    %c192_89 = arith.constant 192 : index
    %c0_90 = arith.constant 0 : index
    %145 = vector.load %arg19[%c192_89, %c0_90] : memref<576x128xbf16, #tpu.memory_space<vmem>>, vector<64x128xbf16>
    tpu.vector_store %arg19[%c192_89, %c0_90], %144 {strides = array<i32>} : memref<576x128xbf16, #tpu.memory_space<vmem>>, vector<64x128xbf16>,
    %146 = arith.truncf %117 : vector<64x128xf32> to vector<64x128xbf16>
    %c256_91 = arith.constant 256 : index
    %c0_92 = arith.constant 0 : index
    %147 = vector.load %arg19[%c256_91, %c0_92] : memref<576x128xbf16, #tpu.memory_space<vmem>>, vector<64x128xbf16>
    tpu.vector_store %arg19[%c256_91, %c0_92], %146 {strides = array<i32>} : memref<576x128xbf16, #tpu.memory_space<vmem>>, vector<64x128xbf16>,
    %c127_i32_93 = arith.constant 127 : i32
    %148 = tpu.dynamic_rotate %117 by %c127_i32_93 dim 1 : vector<64x128xf32>, i32 -> vector<64x128xf32>
    %c5_94 = arith.constant 5 : index
    %c0_95 = arith.constant 0 : index
    %c0_96 = arith.constant 0 : index
    %149 = vector.load %arg2[%c5_94, %c0_95, %c0_96] : memref<9x1x128xf32, #tpu.memory_space<vmem>>, vector<1x1x128xf32>
    %150 = vector.shape_cast %149 : vector<1x1x128xf32> to vector<1x128xf32>
    %151 = vector.broadcast %150 : vector<1x128xf32> to vector<64x128xf32>
    %152 = arith.mulf %148, %151 : vector<64x128xf32>
    %153 = arith.truncf %152 : vector<64x128xf32> to vector<64x128xbf16>
    %c320 = arith.constant 320 : index
    %c0_97 = arith.constant 0 : index
    %154 = vector.load %arg19[%c320, %c0_97] : memref<576x128xbf16, #tpu.memory_space<vmem>>, vector<64x128xbf16>
    tpu.vector_store %arg19[%c320, %c0_97], %153 {strides = array<i32>} : memref<576x128xbf16, #tpu.memory_space<vmem>>, vector<64x128xbf16>,
    %c121_i32_98 = arith.constant 121 : i32
    %155 = tpu.dynamic_rotate %117 by %c121_i32_98 dim 1 : vector<64x128xf32>, i32 -> vector<64x128xf32>
    %c6_99 = arith.constant 6 : index
    %c0_100 = arith.constant 0 : index
    %c0_101 = arith.constant 0 : index
    %156 = vector.load %arg2[%c6_99, %c0_100, %c0_101] : memref<9x1x128xf32, #tpu.memory_space<vmem>>, vector<1x1x128xf32>
    %157 = vector.shape_cast %156 : vector<1x1x128xf32> to vector<1x128xf32>
    %158 = vector.broadcast %157 : vector<1x128xf32> to vector<64x128xf32>
    %159 = arith.mulf %155, %158 : vector<64x128xf32>
    %160 = arith.truncf %159 : vector<64x128xf32> to vector<64x128xbf16>
    %c384 = arith.constant 384 : index
    %c0_102 = arith.constant 0 : index
    %161 = vector.load %arg19[%c384, %c0_102] : memref<576x128xbf16, #tpu.memory_space<vmem>>, vector<64x128xbf16>
    tpu.vector_store %arg19[%c384, %c0_102], %160 {strides = array<i32>} : memref<576x128xbf16, #tpu.memory_space<vmem>>, vector<64x128xbf16>,
    %c120_i32_103 = arith.constant 120 : i32
    %162 = tpu.dynamic_rotate %117 by %c120_i32_103 dim 1 : vector<64x128xf32>, i32 -> vector<64x128xf32>
    %c7_104 = arith.constant 7 : index
    %c0_105 = arith.constant 0 : index
    %c0_106 = arith.constant 0 : index
    %163 = vector.load %arg2[%c7_104, %c0_105, %c0_106] : memref<9x1x128xf32, #tpu.memory_space<vmem>>, vector<1x1x128xf32>
    %164 = vector.shape_cast %163 : vector<1x1x128xf32> to vector<1x128xf32>
    %165 = vector.broadcast %164 : vector<1x128xf32> to vector<64x128xf32>
    %166 = arith.mulf %162, %165 : vector<64x128xf32>
    %167 = arith.truncf %166 : vector<64x128xf32> to vector<64x128xbf16>
    %c448 = arith.constant 448 : index
    %c0_107 = arith.constant 0 : index
    %168 = vector.load %arg19[%c448, %c0_107] : memref<576x128xbf16, #tpu.memory_space<vmem>>, vector<64x128xbf16>
    tpu.vector_store %arg19[%c448, %c0_107], %167 {strides = array<i32>} : memref<576x128xbf16, #tpu.memory_space<vmem>>, vector<64x128xbf16>,
    %c119_i32_108 = arith.constant 119 : i32
    %169 = tpu.dynamic_rotate %117 by %c119_i32_108 dim 1 : vector<64x128xf32>, i32 -> vector<64x128xf32>
    %c8_109 = arith.constant 8 : index
    %c0_110 = arith.constant 0 : index
    %c0_111 = arith.constant 0 : index
    %170 = vector.load %arg2[%c8_109, %c0_110, %c0_111] : memref<9x1x128xf32, #tpu.memory_space<vmem>>, vector<1x1x128xf32>
    %171 = vector.shape_cast %170 : vector<1x1x128xf32> to vector<1x128xf32>
    %172 = vector.broadcast %171 : vector<1x128xf32> to vector<64x128xf32>
    %173 = arith.mulf %169, %172 : vector<64x128xf32>
    %174 = arith.truncf %173 : vector<64x128xf32> to vector<64x128xbf16>
    %c512 = arith.constant 512 : index
    %c0_112 = arith.constant 0 : index
    %175 = vector.load %arg19[%c512, %c0_112] : memref<576x128xbf16, #tpu.memory_space<vmem>>, vector<64x128xbf16>
    tpu.vector_store %arg19[%c512, %c0_112], %174 {strides = array<i32>} : memref<576x128xbf16, #tpu.memory_space<vmem>>, vector<64x128xbf16>,
    %c0_113 = arith.constant 0 : index
    %c0_114 = arith.constant 0 : index
    %176 = vector.load %arg14[%c0_113, %c0_114] : memref<64x576xbf16, #tpu.memory_space<vmem>>, vector<64x576xbf16>
    %c0_115 = arith.constant 0 : index
    %c0_116 = arith.constant 0 : index
    %177 = vector.load %arg19[%c0_115, %c0_116] : memref<576x128xbf16, #tpu.memory_space<vmem>>, vector<576x128xbf16>
    %cst_117 = arith.constant dense<0.000000e+00> : vector<64x128xf32>
    %178 = tpu.matmul %176, %177, %cst_117 {dimension_numbers = #tpu.dot_dimension_numbers<[1], [0], [0], [1], [0, 0, 1, 1], [], []>} : vector<64x576xbf16>, vector<576x128xbf16>, vector<64x128xf32> -> vector<64x128xf32>
    %c0_118 = arith.constant 0 : index
    %c0_119 = arith.constant 0 : index
    %179 = vector.load %arg15[%c0_118, %c0_119] : memref<64x1xf32, #tpu.memory_space<vmem>>, vector<64x1xf32>
    %180 = vector.broadcast %179 : vector<64x1xf32> to vector<64x128xf32>
    %181 = arith.addf %178, %180 : vector<64x128xf32>
    %c0_120 = arith.constant 0 : index
    %c0_121 = arith.constant 0 : index
    %182 = vector.load %arg16[%c0_120, %c0_121] : memref<64x32xbf16, #tpu.memory_space<vmem>>, vector<64x32xbf16>
    %183 = arith.truncf %2 : vector<32x128xf32> to vector<32x128xbf16>
    %cst_122 = arith.constant dense<0.000000e+00> : vector<64x128xf32>
    %184 = tpu.matmul %182, %183, %cst_122 {dimension_numbers = #tpu.dot_dimension_numbers<[1], [0], [0], [1], [0, 0, 1, 1], [], []>} : vector<64x32xbf16>, vector<32x128xbf16>, vector<64x128xf32> -> vector<64x128xf32>
    %c0_123 = arith.constant 0 : index
    %c0_124 = arith.constant 0 : index
    %185 = vector.load %arg17[%c0_123, %c0_124] : memref<64x1xf32, #tpu.memory_space<vmem>>, vector<64x1xf32>
    %186 = vector.broadcast %185 : vector<64x1xf32> to vector<64x128xf32>
    %187 = arith.addf %184, %186 : vector<64x128xf32>
    %188 = arith.addf %187, %181 : vector<64x128xf32>
    %c0_125 = arith.constant 0 : index
    %c0_126 = arith.constant 0 : index
    %189 = vector.load %arg18[%c0_125, %c0_126] : memref<64x128xf32, #tpu.memory_space<vmem>>, vector<64x128xf32>
    tpu.vector_store %arg18[%c0_125, %c0_126], %188 {strides = array<i32>} : memref<64x128xf32, #tpu.memory_space<vmem>>, vector<64x128xf32>,
    return
  }
  func.func @transform_0(%arg0: i32) -> (i32, i32) {
    %c0_i32 = arith.constant 0 : i32
    %c0_i32_0 = arith.constant 0 : i32
    %c0_i32_1 = arith.constant 0 : i32
    return %c0_i32, %c0_i32_0 : i32, i32
  }
  func.func @transform_1(%arg0: i32) -> (i32, i32, i32) {
    %c0_i32 = arith.constant 0 : i32
    %c0_i32_0 = arith.constant 0 : i32
    %c0_i32_1 = arith.constant 0 : i32
    %c0_i32_2 = arith.constant 0 : i32
    return %c0_i32, %c0_i32_0, %c0_i32_1 : i32, i32, i32
  }
  func.func @transform_2(%arg0: i32) -> (i32, i32) {
    %c0_i32 = arith.constant 0 : i32
    %c0_i32_0 = arith.constant 0 : i32
    %c0_i32_1 = arith.constant 0 : i32
    return %c0_i32, %c0_i32_0 : i32, i32
  }
  func.func @transform_3(%arg0: i32) -> (i32, i32) {
    %c0_i32 = arith.constant 0 : i32
    %c0_i32_0 = arith.constant 0 : i32
    %c0_i32_1 = arith.constant 0 : i32
    return %c0_i32, %c0_i32_0 : i32, i32
  }
  func.func @transform_4(%arg0: i32) -> (i32, i32) {
    %c0_i32 = arith.constant 0 : i32
    %c0_i32_0 = arith.constant 0 : i32
    %c0_i32_1 = arith.constant 0 : i32
    return %c0_i32, %c0_i32_0 : i32, i32
  }
  func.func @transform_5(%arg0: i32) -> (i32, i32) {
    %c0_i32 = arith.constant 0 : i32
    %c0_i32_0 = arith.constant 0 : i32
    %c0_i32_1 = arith.constant 0 : i32
    return %c0_i32, %c0_i32_0 : i32, i32
  }
  func.func @transform_6(%arg0: i32) -> (i32, i32) {
    %c0_i32 = arith.constant 0 : i32
    %c0_i32_0 = arith.constant 0 : i32
    %c0_i32_1 = arith.constant 0 : i32
    return %c0_i32, %c0_i32_0 : i32, i32
  }
  func.func @transform_7(%arg0: i32) -> (i32, i32) {
    %c0_i32 = arith.constant 0 : i32
    %c0_i32_0 = arith.constant 0 : i32
    %c0_i32_1 = arith.constant 0 : i32
    return %c0_i32, %c0_i32_0 : i32, i32
  }
  func.func @transform_8(%arg0: i32) -> (i32, i32) {
    %c0_i32 = arith.constant 0 : i32
    %c0_i32_0 = arith.constant 0 : i32
    %c0_i32_1 = arith.constant 0 : i32
    return %c0_i32, %c0_i32_0 : i32, i32
  }
  func.func @transform_9(%arg0: i32) -> (i32, i32) {
    %c0_i32 = arith.constant 0 : i32
    %c0_i32_0 = arith.constant 0 : i32
    %c0_i32_1 = arith.constant 0 : i32
    return %c0_i32, %c0_i32_0 : i32, i32
  }
  func.func @transform_10(%arg0: i32) -> (i32, i32) {
    %c0_i32 = arith.constant 0 : i32
    %c0_i32_0 = arith.constant 0 : i32
    %c0_i32_1 = arith.constant 0 : i32
    return %c0_i32, %c0_i32_0 : i32, i32
  }
  func.func @transform_11(%arg0: i32) -> (i32, i32) {
    %c0_i32 = arith.constant 0 : i32
    %c0_i32_0 = arith.constant 0 : i32
    %c0_i32_1 = arith.constant 0 : i32
    return %c0_i32, %c0_i32_0 : i32, i32
  }
  func.func @transform_12(%arg0: i32) -> (i32, i32) {
    %c0_i32 = arith.constant 0 : i32
    %c0_i32_0 = arith.constant 0 : i32
    %c0_i32_1 = arith.constant 0 : i32
    return %c0_i32, %c0_i32_0 : i32, i32
  }
  func.func @transform_13(%arg0: i32) -> (i32, i32) {
    %c0_i32 = arith.constant 0 : i32
    %c0_i32_0 = arith.constant 0 : i32
    %c0_i32_1 = arith.constant 0 : i32
    return %c0_i32, %c0_i32_0 : i32, i32
  }
  func.func @transform_14(%arg0: i32) -> (i32, i32) {
    %c0_i32 = arith.constant 0 : i32
    %c0_i32_0 = arith.constant 0 : i32
    %c0_i32_1 = arith.constant 0 : i32
    return %c0_i32, %c0_i32_0 : i32, i32
  }
  func.func @transform_15(%arg0: i32) -> (i32, i32) {
    %c0_i32 = arith.constant 0 : i32
    %c0_i32_0 = arith.constant 0 : i32
    %c0_i32_1 = arith.constant 0 : i32
    return %c0_i32, %c0_i32_0 : i32, i32
  }
  func.func @transform_16(%arg0: i32) -> (i32, i32) {
    %c0_i32 = arith.constant 0 : i32
    %c0_i32_0 = arith.constant 0 : i32
    %c0_i32_1 = arith.constant 0 : i32
    return %c0_i32, %c0_i32_0 : i32, i32
  }
  func.func @transform_17(%arg0: i32) -> (i32, i32) {
    %c0_i32 = arith.constant 0 : i32
    %c0_i32_0 = arith.constant 0 : i32
    %c0_i32_1 = arith.constant 0 : i32
    return %c0_i32, %c0_i32_0 : i32, i32
  }
}

</mosaic_0001>

<bundles_post_ra>
// kernel: tpu_custom_call.1
= control target key start
LH: loop header
LB: loop body
LE: loop exit
PB: predicated region body
PF: predicated region fallthrough
CT: control target
= control target key end

     0   :  { %s5797_s0 = inlined_call_operand.hbm [shape: f32[32,128], index: 0, kind: input, shape index: {}]   ;;  %s5798_s1 = inlined_call_operand.hbm [shape: f32[9,1,128], index: 1, kind: input, shape index: {}]   ;;  %s5799_s2 = inlined_call_operand.hbm [shape: f32[128,2], index: 2, kind: input, shape index: {}]   ;;  %s5800_s3 = inlined_call_operand.hbm [shape: f32[2,128], index: 3, kind: input, shape index: {}]   ;;  %s5801_s4 = inlined_call_operand.hbm [shape: f32[32,1], index: 4, kind: input, shape index: {}]   ;;  %s5802_s5 = inlined_call_operand.hbm [shape: f32[32,1], index: 5, kind: input, shape index: {}]   ;;  %s5803_s6 = inlined_call_operand.hbm [shape: f32[32,32], index: 6, kind: input, shape index: {}]   ;;  %s5804_s7 = inlined_call_operand.hbm [shape: bf16[64,288], index: 7, kind: input, shape index: {}]   ;;  %s5805_s8 = inlined_call_operand.hbm [shape: f32[64,1], index: 8, kind: input, shape index: {}]   ;;  %s5806_s9 = inlined_call_operand.hbm [shape: f32[64,2], index: 9, kind: input, shape index: {}]   ;;  %s5807_s10 = inlined_call_operand.hbm [shape: f32[64,1], index: 10, kind: input, shape index: {}]   ;;  %s5808_s11 = inlined_call_operand.hbm [shape: f32[64,1], index: 11, kind: input, shape index: {}]   ;;  %s5809_s12 = inlined_call_operand.hbm [shape: f32[64,64], index: 12, kind: input, shape index: {}]   ;;  %s5810_s13 = inlined_call_operand.hbm [shape: bf16[64,576], index: 13, kind: input, shape index: {}]   ;;  %s5811_s14 = inlined_call_operand.hbm [shape: f32[64,1], index: 14, kind: input, shape index: {}]   ;;  %s5812_s15 = inlined_call_operand.hbm [shape: bf16[64,32], index: 15, kind: input, shape index: {}]   ;;  %s5813_s16 = inlined_call_operand.hbm [shape: f32[64,1], index: 16, kind: input, shape index: {}]   ;;  %s5814_s17 = inlined_call_operand.hbm [shape: f32[64,128], index: 17, kind: output, shape index: {}]  }
   0x1   :  { %5820 = sst [smem:[#allocation41_spill]] %s5797_s0 }
   0x2   :  { %5821 = sst [smem:[#allocation42_spill]] %s5798_s1 }
   0x3   :  { %5822 = sst [smem:[#allocation43_spill]] %s5814_s17 }
   0x4   :  { %22 = vsyncpa [#allocation4], 0 }
   0x5   :  { %23 = vsyncpa [#allocation7], 0 }
   0x6   :  { %24 = vsyncpa [#allocation10], 0 }
   0x7   :  { %25 = vsyncpa [#allocation13], 0 }
   0x8   :  { %26 = vsyncpa [#allocation16], 0 }
   0x9   :  { %27 = vsyncpa [#allocation19], 0 }
   0xa   :  { %28 = vsyncpa [#allocation22], 0 }
   0xb   :  { %29 = vsyncpa [#allocation25], 0 }
   0xc   :  { %30 = vsyncpa [#allocation28], 0 }
   0xd   :  { %31 = vsyncpa [#allocation5], 0  ;;  %s4757_s24 = smov [#allocation6]   ;;  %s5823_s28 = sld [smem:[#allocation42_spill]] }
   0xe   :  { %s49_s25 = sshll.u32 %s4757_s24, 4  ;;  %s50_s25 = int_to_ptr.vmem [resolvable:$true] %s49_s25 }
  0x13   :  { %s4341_s29 = scalar_lea.hbm %s5823_s28, 144 }
  0x14   :  { %p4342_p0 = scmp.ne.s32.totalorder %s5823_s28, %s4341_s29  ;;  %p4345_p1 = scmp.lt.u32.totalorder %s4341_s29, %s5823_s28 }
  0x16   :  { %p4347_p2 = pnand %p4345_p1, %p4342_p0 }
  0x18   :  { %4350 = shalt.err (!%p4347_p2)
}
  0x19   :  { %s4351_s1 = scalar_lea.vmem %s50_s25, 144  ;;  %s4355_s20 = scalar_lea.vmem %s50_s25, 160 }
  0x1a   :  { %p4352_p3 = scmp.ne.s32.totalorder %s50_s25, %s4351_s1  ;;  %p4356_p4 = scmp.lt.s32.totalorder %s50_s25, %s50_s25 }
  0x1b   :  { %p4357_p5 = scmp.lt.s32.totalorder %s4355_s20, %s4351_s1 }
  0x1d   :  { %p4358_p6 = por %p4357_p5, %p4356_p4 }
  0x1f   :  { %p4359_p7 = pnand %p4358_p6, %p4352_p3 }
  0x21   :  { %4362 = shalt.err (!%p4359_p7)
}
  0x22   :  { %s4758_s21 = smov 16   ;;  %s5818_s22 = smov 1  }
  0x23   :  { %55 = dma.hbm_to_vmem [thread:$0]  %s5823_s28, 144, %s50_s25, [#allocation7], %s4758_s21, %s4758_s21, %s5818_s22  }
  0x24   :  { %s4760_s26 = smov [#allocation9]   ;;  %s4363_s30 = scalar_lea.hbm %s5800_s3, 32 }
  0x25   :  { %s74_s27 = sshll.u32 %s4760_s26, 4  ;;  %p4364_p8 = scmp.ne.s32.totalorder %s5800_s3, %s4363_s30  ;;  %s75_s27 = int_to_ptr.vmem [resolvable:$true] %s74_s27 }
  0x26   :  { %p4367_p9 = scmp.lt.u32.totalorder %s4363_s30, %s5800_s3 }
  0x28   :  { %p4369_p10 = pnand %p4367_p9, %p4364_p8 }
  0x2a   :  { %4372 = shalt.err (!%p4369_p10)
}
  0x2b   :  { %s4373_s17 = scalar_lea.vmem %s75_s27, 32  ;;  %p4378_p12 = scmp.lt.s32.totalorder %s75_s27, %s75_s27 }
  0x2c   :  { %p4374_p11 = scmp.ne.s32.totalorder %s75_s27, %s4373_s17  ;;  %p4379_p13 = scmp.lt.s32.totalorder %s4373_s17, %s4373_s17 }
  0x2e   :  { %p4380_p0 = por %p4379_p13, %p4378_p12 }
  0x30   :  { %p4381_p1 = pnand %p4380_p0, %p4374_p11 }
  0x32   :  { %4384 = shalt.err (!%p4381_p1)
}
  0x33   :  { %77 = dma.hbm_to_vmem [thread:$0]  %s5800_s3, 32, %s75_s27, [#allocation10]  }
  0x34   :  { %s4761_s21 = smov [#allocation12]   ;;  %s4762_s24 = smov [#allocation15]  }
  0x35   :  { %s95_s23 = sshll.u32 %s4761_s21, 4  ;;  %s119_s26 = sshll.u32 %s4762_s24, 4  ;;  %s96_s23 = int_to_ptr.vmem [resolvable:$true] %s95_s23  ;;  %s4907_s26 = int_to_ptr.vmem [resolvable:$true] %s119_s26 }
  0x36   :  { %s4385_s30 = scalar_lea.hbm %s5802_s5, 512 }
  0x37   :  { %p4386_p2 = scmp.ne.s32.totalorder %s5802_s5, %s4385_s30  ;;  %p4389_p3 = scmp.lt.u32.totalorder %s4385_s30, %s5802_s5 }
  0x39   :  { %p4391_p4 = pnand %p4389_p3, %p4386_p2 }
  0x3b   :  { %4394 = shalt.err (!%p4391_p4)
}
  0x3c   :  { %s4395_s3 = scalar_lea.vmem %s96_s23, 512  ;;  %p4400_p6 = scmp.lt.s32.totalorder %s96_s23, %s96_s23 }
  0x3d   :  { %p4396_p5 = scmp.ne.s32.totalorder %s96_s23, %s4395_s3  ;;  %p4401_p7 = scmp.lt.s32.totalorder %s4395_s3, %s4395_s3 }
  0x3f   :  { %p4402_p8 = por %p4401_p7, %p4400_p6 }
  0x41   :  { %p4403_p9 = pnand %p4402_p8, %p4396_p5 }
  0x43   :  { %4406 = shalt.err (!%p4403_p9)
}
  0x44   :  { %s4763_s27 = smov 128   ;;  %s4764_s20 = smov 8  }
  0x45   :  { %101 = dma.hbm_to_vmem [thread:$0]  %s5802_s5, 512, %s96_s23, [#allocation13], %s4763_s27, %s4763_s27, %s4764_s20  }
  0x46   :  { %s4407_s29 = scalar_lea.hbm %s5804_s7, 1536 }
  0x47   :  { %p4408_p10 = scmp.ne.s32.totalorder %s5804_s7, %s4407_s29  ;;  %p4411_p11 = scmp.lt.u32.totalorder %s4407_s29, %s5804_s7 }
  0x49   :  { %p4413_p12 = pnand %p4411_p11, %p4408_p10 }
  0x4b   :  { %4416 = shalt.err (!%p4413_p12)
}
  0x4c   :  { %s4417_s19 = scalar_lea.vmem %s4907_s26, 1536  ;;  %p4422_p0 = scmp.lt.s32.totalorder %s4907_s26, %s4907_s26 }
  0x4d   :  { %p4418_p13 = scmp.ne.s32.totalorder %s4907_s26, %s4417_s19  ;;  %p4423_p1 = scmp.lt.s32.totalorder %s4417_s19, %s4417_s19 }
  0x4f   :  { %p4424_p2 = por %p4423_p1, %p4422_p0 }
  0x51   :  { %p4425_p3 = pnand %p4424_p2, %p4418_p13 }
  0x53   :  { %4428 = shalt.err (!%p4425_p3)
}
  0x54   :  { %s4765_s5 = smov 192   ;;  %s4766_s23 = smov 12  }
  0x55   :  { %125 = dma.hbm_to_vmem [thread:$0]  %s5804_s7, 1536, %s4907_s26, [#allocation16], %s4765_s5, %s4765_s5, %s4766_s23  }
  0x56   :  { %s4767_s25 = smov [#allocation18]   ;;  %s4768_s21 = smov [#allocation21]  }
  0x57   :  { %s143_s28 = sshll.u32 %s4767_s25, 4  ;;  %s167_s24 = sshll.u32 %s4768_s21, 4  ;;  %s144_s28 = int_to_ptr.vmem [resolvable:$true] %s143_s28  ;;  %s4941_s24 = int_to_ptr.vmem [resolvable:$true] %s167_s24 }
  0x58   :  { %s4429_s30 = scalar_lea.hbm %s5806_s9, 1024 }
  0x59   :  { %p4430_p4 = scmp.ne.s32.totalorder %s5806_s9, %s4429_s30  ;;  %p4433_p5 = scmp.lt.u32.totalorder %s4429_s30, %s5806_s9 }
  0x5b   :  { %p4435_p6 = pnand %p4433_p5, %p4430_p4 }
  0x5d   :  { %4438 = shalt.err (!%p4435_p6)
}
  0x5e   :  { %s4439_s7 = scalar_lea.vmem %s144_s28, 1024  ;;  %p4444_p8 = scmp.lt.s32.totalorder %s144_s28, %s144_s28 }
  0x5f   :  { %p4440_p7 = scmp.ne.s32.totalorder %s144_s28, %s4439_s7  ;;  %p4445_p9 = scmp.lt.s32.totalorder %s4439_s7, %s4439_s7 }
  0x61   :  { %p4446_p10 = por %p4445_p9, %p4444_p8 }
  0x63   :  { %p4447_p11 = pnand %p4446_p10, %p4440_p7 }
  0x65   :  { %4450 = shalt.err (!%p4447_p11)
}
  0x66   :  { %149 = dma.hbm_to_vmem [thread:$0]  %s5806_s9, 1024, %s144_s28, [#allocation19], %s4763_s27, %s4763_s27, %s4764_s20  }
  0x67   :  { %s4451_s22 = scalar_lea.hbm %s5808_s11, 1024 }
  0x68   :  { %p4452_p12 = scmp.ne.s32.totalorder %s5808_s11, %s4451_s22  ;;  %p4455_p13 = scmp.lt.u32.totalorder %s4451_s22, %s5808_s11 }
  0x6a   :  { %p4457_p0 = pnand %p4455_p13, %p4452_p12 }
  0x6c   :  { %4460 = shalt.err (!%p4457_p0)
}
  0x6d   :  { %s4461_s0 = scalar_lea.vmem %s4941_s24, 1024  ;;  %p4466_p2 = scmp.lt.s32.totalorder %s4941_s24, %s4941_s24 }
  0x6e   :  { %p4462_p1 = scmp.ne.s32.totalorder %s4941_s24, %s4461_s0  ;;  %p4467_p3 = scmp.lt.s32.totalorder %s4461_s0, %s4461_s0 }
  0x70   :  { %p4468_p4 = por %p4467_p3, %p4466_p2 }
  0x72   :  { %p4469_p5 = pnand %p4468_p4, %p4462_p1 }
  0x74   :  { %4472 = shalt.err (!%p4469_p5)
}
  0x75   :  { %173 = dma.hbm_to_vmem [thread:$0]  %s5808_s11, 1024, %s4941_s24, [#allocation22], %s4763_s27, %s4763_s27, %s4764_s20  }
  0x76   :  { %s4769_s30 = smov [#allocation24]   ;;  %s4473_s7 = scalar_lea.hbm %s5810_s13, 2560 }
  0x77   :  { %s191_s18 = sshll.u32 %s4769_s30, 4  ;;  %p4474_p6 = scmp.ne.s32.totalorder %s5810_s13, %s4473_s7  ;;  %s192_s18 = int_to_ptr.vmem [resolvable:$true] %s191_s18 }
  0x78   :  { %p4477_p7 = scmp.lt.u32.totalorder %s4473_s7, %s5810_s13 }
  0x7a   :  { %p4479_p8 = pnand %p4477_p7, %p4474_p6 }
  0x7c   :  { %4482 = shalt.err (!%p4479_p8)
}
  0x7d   :  { %s4483_s22 = scalar_lea.vmem %s192_s18, 2560  ;;  %p4488_p10 = scmp.lt.s32.totalorder %s192_s18, %s192_s18 }
  0x7e   :  { %p4484_p9 = scmp.ne.s32.totalorder %s192_s18, %s4483_s22  ;;  %p4489_p11 = scmp.lt.s32.totalorder %s4483_s22, %s4483_s22 }
  0x80   :  { %p4490_p12 = por %p4489_p11, %p4488_p10 }
  0x82   :  { %p4491_p13 = pnand %p4490_p12, %p4484_p9 }
  0x84   :  { %4494 = shalt.err (!%p4491_p13)
}
  0x85   :  { %s4770_s11 = smov 320   ;;  %s4771_s24 = smov 20  }
  0x86   :  { %197 = dma.hbm_to_vmem [thread:$0]  %s5810_s13, 2560, %s192_s18, [#allocation25], %s4770_s11, %s4770_s11, %s4771_s24  }
  0x87   :  { %s4772_s21 = smov [#allocation27]   ;;  %s4495_s28 = scalar_lea.hbm %s5812_s15, 512 }
  0x88   :  { %s215_s29 = sshll.u32 %s4772_s21, 4  ;;  %p4496_p0 = scmp.ne.s32.totalorder %s5812_s15, %s4495_s28  ;;  %s216_s29 = int_to_ptr.vmem [resolvable:$true] %s215_s29 }
  0x89   :  { %p4499_p1 = scmp.lt.u32.totalorder %s4495_s28, %s5812_s15 }
  0x8b   :  { %p4501_p2 = pnand %p4499_p1, %p4496_p0 }
  0x8d   :  { %4504 = shalt.err (!%p4501_p2)
}
  0x8e   :  { %s4505_s26 = scalar_lea.vmem %s216_s29, 512  ;;  %p4510_p4 = scmp.lt.s32.totalorder %s216_s29, %s216_s29 }
  0x8f   :  { %p4506_p3 = scmp.ne.s32.totalorder %s216_s29, %s4505_s26  ;;  %p4511_p5 = scmp.lt.s32.totalorder %s4505_s26, %s4505_s26 }
  0x91   :  { %p4512_p6 = por %p4511_p5, %p4510_p4 }
  0x93   :  { %p4513_p7 = pnand %p4512_p6, %p4506_p3 }
  0x95   :  { %4516 = shalt.err (!%p4513_p7)
}
  0x96   :  { %s4773_s13 = smov 64   ;;  %s4774_s18 = smov 4  }
  0x97   :  { %221 = dma.hbm_to_vmem [thread:$0]  %s5812_s15, 512, %s216_s29, [#allocation28], %s4773_s13, %s4773_s13, %s4774_s18  }
  0x98   :  { %s4775_s1 = smov [#allocation3]   ;;  %s4776_s11 = smov [#allocation8]  }
  0x99   :  { %s37_s22 = sshll.u32 %s4775_s1, 4  ;;  %s61_s24 = sshll.u32 %s4776_s11, 4  ;;  %s38_s22 = int_to_ptr.vmem [resolvable:$true] %s37_s22  ;;  %s5002_s24 = int_to_ptr.vmem [resolvable:$true] %s61_s24 }
  0x9a   :  { %s5824_s21 = sld [smem:[#allocation41_spill]] }
  0xa0   :  { %s4517_s0 = scalar_lea.hbm %s5824_s21, 512 }
  0xa1   :  { %p4518_p8 = scmp.ne.s32.totalorder %s5824_s21, %s4517_s0  ;;  %p4521_p9 = scmp.lt.u32.totalorder %s4517_s0, %s5824_s21 }
  0xa3   :  { %p4523_p10 = pnand %p4521_p9, %p4518_p8 }
  0xa5   :  { %4526 = shalt.err (!%p4523_p10)
}
  0xa6   :  { %s4527_s15 = scalar_lea.vmem %s38_s22, 512  ;;  %p4532_p12 = scmp.lt.s32.totalorder %s38_s22, %s38_s22 }
  0xa7   :  { %p4528_p11 = scmp.ne.s32.totalorder %s38_s22, %s4527_s15  ;;  %p4533_p13 = scmp.lt.s32.totalorder %s4527_s15, %s4527_s15 }
  0xa9   :  { %p4534_p0 = por %p4533_p13, %p4532_p12 }
  0xab   :  { %p4535_p1 = pnand %p4534_p0, %p4528_p11 }
  0xad   :  { %4538 = shalt.err (!%p4535_p1)
}
  0xae   :  { %43 = dma.hbm_to_vmem [thread:$0]  %s5824_s21, 512, %s38_s22, [#allocation4], %s4763_s27, %s4763_s27, %s4764_s20  }
  0xaf   :  { %s4539_s13 = scalar_lea.hbm %s5799_s2, 2048 }
  0xb0   :  { %p4540_p2 = scmp.ne.s32.totalorder %s5799_s2, %s4539_s13  ;;  %p4543_p3 = scmp.lt.u32.totalorder %s4539_s13, %s5799_s2 }
  0xb2   :  { %p4545_p4 = pnand %p4543_p3, %p4540_p2 }
  0xb4   :  { %4548 = shalt.err (!%p4545_p4)
}
  0xb5   :  { %s4549_s11 = scalar_lea.vmem %s5002_s24, 2048  ;;  %p4554_p6 = scmp.lt.s32.totalorder %s5002_s24, %s5002_s24 }
  0xb6   :  { %p4550_p5 = scmp.ne.s32.totalorder %s5002_s24, %s4549_s11  ;;  %p4555_p7 = scmp.lt.s32.totalorder %s4549_s11, %s4549_s11 }
  0xb8   :  { %p4556_p8 = por %p4555_p7, %p4554_p6 }
  0xba   :  { %p4557_p9 = pnand %p4556_p8, %p4550_p5 }
  0xbc   :  { %4560 = shalt.err (!%p4557_p9)
}
  0xbd   :  { %67 = dma.hbm_to_vmem [thread:$0]  %s5799_s2, 2048, %s5002_s24, [#allocation7], %s4763_s27, %s4763_s27, %s4764_s20  }
  0xbe   :  { %s4777_s25 = smov [#allocation11]   ;;  %s4778_s0 = smov [#allocation14]  }
  0xbf   :  { %s83_s21 = sshll.u32 %s4777_s25, 4  ;;  %s107_s9 = sshll.u32 %s4778_s0, 4  ;;  %s84_s21 = int_to_ptr.vmem [resolvable:$true] %s83_s21  ;;  %s5039_s9 = int_to_ptr.vmem [resolvable:$true] %s107_s9 }
  0xc0   :  { %s4561_s17 = scalar_lea.hbm %s5801_s4, 512 }
  0xc1   :  { %p4562_p10 = scmp.ne.s32.totalorder %s5801_s4, %s4561_s17  ;;  %p4565_p11 = scmp.lt.u32.totalorder %s4561_s17, %s5801_s4 }
  0xc3   :  { %p4567_p12 = pnand %p4565_p11, %p4562_p10 }
  0xc5   :  { %4570 = shalt.err (!%p4567_p12)
}
  0xc6   :  { %s4571_s2 = scalar_lea.vmem %s84_s21, 512  ;;  %p4576_p0 = scmp.lt.s32.totalorder %s84_s21, %s84_s21 }
  0xc7   :  { %p4572_p13 = scmp.ne.s32.totalorder %s84_s21, %s4571_s2  ;;  %p4577_p1 = scmp.lt.s32.totalorder %s4571_s2, %s4571_s2 }
  0xc9   :  { %p4578_p2 = por %p4577_p1, %p4576_p0 }
  0xcb   :  { %p4579_p3 = pnand %p4578_p2, %p4572_p13 }
  0xcd   :  { %4582 = shalt.err (!%p4579_p3)
}
  0xce   :  { %89 = dma.hbm_to_vmem [thread:$0]  %s5801_s4, 512, %s84_s21, [#allocation10], %s4763_s27, %s4763_s27, %s4764_s20  }
  0xcf   :  { %s4583_s5 = scalar_lea.hbm %s5803_s6, 512 }
  0xd0   :  { %p4584_p4 = scmp.ne.s32.totalorder %s5803_s6, %s4583_s5  ;;  %p4587_p5 = scmp.lt.u32.totalorder %s4583_s5, %s5803_s6 }
  0xd2   :  { %p4589_p6 = pnand %p4587_p5, %p4584_p4 }
  0xd4   :  { %4592 = shalt.err (!%p4589_p6)
}
  0xd5   :  { %s4593_s3 = scalar_lea.vmem %s5039_s9, 512  ;;  %p4598_p8 = scmp.lt.s32.totalorder %s5039_s9, %s5039_s9 }
  0xd6   :  { %p4594_p7 = scmp.ne.s32.totalorder %s5039_s9, %s4593_s3  ;;  %p4599_p9 = scmp.lt.s32.totalorder %s4593_s3, %s4593_s3 }
  0xd8   :  { %p4600_p10 = por %p4599_p9, %p4598_p8 }
  0xda   :  { %p4601_p11 = pnand %p4600_p10, %p4594_p7 }
  0xdc   :  { %4604 = shalt.err (!%p4601_p11)
}
  0xdd   :  { %113 = dma.hbm_to_vmem [thread:$0]  %s5803_s6, 512, %s5039_s9, [#allocation13], %s4763_s27, %s4763_s27, %s4764_s20  }
  0xde   :  { %s4779_s21 = smov [#allocation17]   ;;  %s4780_s28 = smov [#allocation20]  }
  0xdf   :  { %s131_s0 = sshll.u32 %s4779_s21, 4  ;;  %s155_s30 = sshll.u32 %s4780_s28, 4  ;;  %s132_s0 = int_to_ptr.vmem [resolvable:$true] %s131_s0  ;;  %s5076_s30 = int_to_ptr.vmem [resolvable:$true] %s155_s30 }
  0xe0   :  { %s4605_s29 = scalar_lea.hbm %s5805_s8, 1024 }
  0xe1   :  { %p4606_p12 = scmp.ne.s32.totalorder %s5805_s8, %s4605_s29  ;;  %p4609_p13 = scmp.lt.u32.totalorder %s4605_s29, %s5805_s8 }
  0xe3   :  { %p4611_p0 = pnand %p4609_p13, %p4606_p12 }
  0xe5   :  { %4614 = shalt.err (!%p4611_p0)
}
  0xe6   :  { %s4615_s6 = scalar_lea.vmem %s132_s0, 1024  ;;  %p4620_p2 = scmp.lt.s32.totalorder %s132_s0, %s132_s0 }
  0xe7   :  { %p4616_p1 = scmp.ne.s32.totalorder %s132_s0, %s4615_s6  ;;  %p4621_p3 = scmp.lt.s32.totalorder %s4615_s6, %s4615_s6 }
  0xe9   :  { %p4622_p4 = por %p4621_p3, %p4620_p2 }
  0xeb   :  { %p4623_p5 = pnand %p4622_p4, %p4616_p1 }
  0xed   :  { %4626 = shalt.err (!%p4623_p5)
}
  0xee   :  { %137 = dma.hbm_to_vmem [thread:$0]  %s5805_s8, 1024, %s132_s0, [#allocation16], %s4763_s27, %s4763_s27, %s4764_s20  }
  0xef   :  { %s4627_s5 = scalar_lea.hbm %s5807_s10, 1024 }
  0xf0   :  { %p4628_p6 = scmp.ne.s32.totalorder %s5807_s10, %s4627_s5  ;;  %p4631_p7 = scmp.lt.u32.totalorder %s4627_s5, %s5807_s10 }
  0xf2   :  { %p4633_p8 = pnand %p4631_p7, %p4628_p6 }
  0xf4   :  { %4636 = shalt.err (!%p4633_p8)
}
  0xf5   :  { %s4637_s3 = scalar_lea.vmem %s5076_s30, 1024  ;;  %p4642_p10 = scmp.lt.s32.totalorder %s5076_s30, %s5076_s30 }
  0xf6   :  { %p4638_p9 = scmp.ne.s32.totalorder %s5076_s30, %s4637_s3  ;;  %p4643_p11 = scmp.lt.s32.totalorder %s4637_s3, %s4637_s3 }
  0xf8   :  { %p4644_p12 = por %p4643_p11, %p4642_p10 }
  0xfa   :  { %p4645_p13 = pnand %p4644_p12, %p4638_p9 }
  0xfc   :  { %4648 = shalt.err (!%p4645_p13)
}
  0xfd   :  { %161 = dma.hbm_to_vmem [thread:$0]  %s5807_s10, 1024, %s5076_s30, [#allocation19], %s4763_s27, %s4763_s27, %s4764_s20  }
  0xfe   :  { %s4781_s25 = smov [#allocation23]   ;;  %s4782_s0 = smov [#allocation26]  }
  0xff   :  { %s179_s21 = sshll.u32 %s4781_s25, 4  ;;  %s203_s28 = sshll.u32 %s4782_s0, 4  ;;  %s180_s21 = int_to_ptr.vmem [resolvable:$true] %s179_s21  ;;  %s5113_s28 = int_to_ptr.vmem [resolvable:$true] %s203_s28 }
 0x100   :  { %s4649_s29 = scalar_lea.hbm %s5809_s12, 1024 }
 0x101   :  { %p4650_p0 = scmp.ne.s32.totalorder %s5809_s12, %s4649_s29  ;;  %p4653_p1 = scmp.lt.u32.totalorder %s4649_s29, %s5809_s12 }
 0x103   :  { %p4655_p2 = pnand %p4653_p1, %p4650_p0 }
 0x105   :  { %4658 = shalt.err (!%p4655_p2)
}
 0x106   :  { %s4659_s10 = scalar_lea.vmem %s180_s21, 1024  ;;  %p4664_p4 = scmp.lt.s32.totalorder %s180_s21, %s180_s21 }
 0x107   :  { %p4660_p3 = scmp.ne.s32.totalorder %s180_s21, %s4659_s10  ;;  %p4665_p5 = scmp.lt.s32.totalorder %s4659_s10, %s4659_s10 }
 0x109   :  { %p4666_p6 = por %p4665_p5, %p4664_p4 }
 0x10b   :  { %p4667_p7 = pnand %p4666_p6, %p4660_p3 }
 0x10d   :  { %4670 = shalt.err (!%p4667_p7)
}
 0x10e   :  { %185 = dma.hbm_to_vmem [thread:$0]  %s5809_s12, 1024, %s180_s21, [#allocation22], %s4763_s27, %s4763_s27, %s4764_s20  }
 0x10f   :  { %s4671_s13 = scalar_lea.hbm %s5811_s14, 1024 }
 0x110   :  { %p4672_p8 = scmp.ne.s32.totalorder %s5811_s14, %s4671_s13  ;;  %p4675_p9 = scmp.lt.u32.totalorder %s4671_s13, %s5811_s14 }
 0x112   :  { %p4677_p10 = pnand %p4675_p9, %p4672_p8 }
 0x114   :  { %4680 = shalt.err (!%p4677_p10)
}
 0x115   :  { %s4681_s11 = scalar_lea.vmem %s5113_s28, 1024  ;;  %p4686_p12 = scmp.lt.s32.totalorder %s5113_s28, %s5113_s28 }
 0x116   :  { %p4682_p11 = scmp.ne.s32.totalorder %s5113_s28, %s4681_s11  ;;  %p4687_p13 = scmp.lt.s32.totalorder %s4681_s11, %s4681_s11 }
 0x118   :  { %p4688_p0 = por %p4687_p13, %p4686_p12 }
 0x11a   :  { %p4689_p1 = pnand %p4688_p0, %p4682_p11 }
 0x11c   :  { %4692 = shalt.err (!%p4689_p1)
}
 0x11d   :  { %209 = dma.hbm_to_vmem [thread:$0]  %s5811_s14, 1024, %s5113_s28, [#allocation25], %s4763_s27, %s4763_s27, %s4764_s20  }
 0x11e   :  { %s4783_s3 = smov [#allocation29]   ;;  %s4693_s21 = scalar_lea.hbm %s5813_s16, 1024 }
 0x11f   :  { %s227_s8 = sshll.u32 %s4783_s3, 4  ;;  %p4694_p2 = scmp.ne.s32.totalorder %s5813_s16, %s4693_s21  ;;  %s228_s8 = int_to_ptr.vmem [resolvable:$true] %s227_s8 }
 0x120   :  { %p4697_p3 = scmp.lt.u32.totalorder %s4693_s21, %s5813_s16 }
 0x122   :  { %p4699_p4 = pnand %p4697_p3, %p4694_p2 }
 0x124   :  { %4702 = shalt.err (!%p4699_p4)
}
 0x125   :  { %s4703_s19 = scalar_lea.vmem %s228_s8, 1024  ;;  %p4708_p6 = scmp.lt.s32.totalorder %s228_s8, %s228_s8 }
 0x126   :  { %p4704_p5 = scmp.ne.s32.totalorder %s228_s8, %s4703_s19  ;;  %p4709_p7 = scmp.lt.s32.totalorder %s4703_s19, %s4703_s19 }
 0x128   :  { %p4710_p8 = por %p4709_p7, %p4708_p6 }
 0x12a   :  { %p4711_p9 = pnand %p4710_p8, %p4704_p5 }
 0x12c   :  { %4714 = shalt.err (!%p4711_p9)
}
 0x12d   :  { %233 = dma.hbm_to_vmem [thread:$0]  %s5813_s16, 1024, %s228_s8, [#allocation28], %s4763_s27, %s4763_s27, %s4764_s20  }
 0x12e   :  { %4737 = dma.done.wait [#allocation4], 512  }
 0x12f   :  { %4738 = vsyncadd [#allocation4], 4294966784 }
 0x130   :  { %4739 = dma.done.wait [#allocation7], 2192  }
 0x131   :  { %4740 = vsyncadd [#allocation7], 4294965104 }
 0x132   :  { %4741 = dma.done.wait [#allocation10], 544  }
 0x133   :  { %4742 = vsyncadd [#allocation10], 4294966752 }
 0x134   :  { %4743 = dma.done.wait [#allocation13], 1024  }
 0x135   :  { %4744 = vsyncadd [#allocation13], 4294966272 }
 0x136   :  { %4745 = dma.done.wait [#allocation16], 2560  }
 0x137   :  { %4746 = vsyncadd [#allocation16], 4294964736 }
 0x138   :  { %4747 = dma.done.wait [#allocation19], 2048  }
 0x139   :  { %4748 = vsyncadd [#allocation19], 4294965248 }
 0x13a   :  { %4749 = dma.done.wait [#allocation22], 2048  }
 0x13b   :  { %4750 = vsyncadd [#allocation22], 4294965248 }
 0x13c   :  { %4751 = dma.done.wait [#allocation25], 3584  }
 0x13d   :  { %4752 = vsyncadd [#allocation25], 4294963712 }
 0x13e   :  { %4753 = dma.done.wait [#allocation28], 1536  }
 0x13f   :  { %4754 = vsyncadd [#allocation28], 4294965760  ;;  %v286_v0 = vld [vmem:[#allocation8] sm:$0xff]  ;;  %v287_v1 = vld [vmem:[#allocation8 + $0x8] sm:$0xff]  ;;  %vm405_vm0 = vcmask 1041408   ;;  %vm392_vm1 = vcmask 15360  }
 0x140   :  { %v288_v2 = vld [vmem:[#allocation8 + $0x10] sm:$0xff]  ;;  %v5165_v3 = vpack.c.bf16 %v287_v1, %v286_v0  ;;  %v289_v4 = vld [vmem:[#allocation8 + $0x18] sm:$0xff]  ;;  %v290_v6 = vld [vmem:[#allocation8 + $0x20] sm:$0xff]  ;;  %v4784_v47 = vmov 0   ;;  %s4785_s16 = smov 9   ;;  %s4786_s7 = smov 127  }
 0x141   :  { %v5167_v5 = vpack.c.bf16 %v289_v4, %v288_v2  ;;  %v291_v7 = vld [vmem:[#allocation8 + $0x28] sm:$0xff]  ;;  %v5174_v9 = vld [vmem:[#allocation3] sm:$0xff]  ;;  %v294_v12 = vld [vmem:[#allocation8 + $0x40] sm:$0xff]  ;;  %4214 = vset.pattern.permute.xlu0 %v4784_v47  ;;  %4215 = vset.pattern.permute.xlu1 %v4784_v47  ;;  %s4787_s2 = smov 121   ;;  %s4788_s24 = smov 7   ;;  %vm1113_vm2 = vcmask 261120  }
 0x142   :  { %3988 = vmatprep.subr.bf16.mxu0 %v5165_v3  ;;  %v5172_v8 = vpack.c.bf16 %v291_v7, %v290_v6  ;;  %v292_v10 = vld [vmem:[#allocation8 + $0x30] sm:$0xff]  ;;  %v293_v11 = vld [vmem:[#allocation8 + $0x38] sm:$0xff]  ;;  %3701 = vmatprep.mubr.f32.mxu0 %v5174_v9  ;;  %v295_v13 = vld [vmem:[#allocation8 + $0x48] sm:$0xff]  ;;  %s4789_s10 = smov 120   ;;  %s5825_s30 = smov 1   ;;  %vm1514_vm3 = vcmask 523264  }
 0x143   :  { %3990 = vmatpush3.bf16.msra.mxu0 %v5165_v3  ;;  %v5179_v14 = vpack.c.bf16 %v293_v11, %v292_v10  ;;  %v296_v15 = vld [vmem:[#allocation8 + $0x50] sm:$0xff]  ;;  %v297_v16 = vld [vmem:[#allocation8 + $0x58] sm:$0xff]  ;;  %v5183_v17 = vpack.c.bf16 %v295_v13, %v294_v12  ;;  %v298_v18 = vld [vmem:[#allocation8 + $0x60] sm:$0xff]  ;;  %s4790_s6 = smov 119   ;;  %s4791_s9 = smov [#allocation30]  }
 0x144   :  { %3992 = vmatprep.subr.bf16.mxu0 %v5167_v5  ;;  %v299_v19 = vld [vmem:[#allocation8 + $0x68] sm:$0xff]  ;;  %v5187_v20 = vpack.c.bf16 %v297_v16, %v296_v15  ;;  %v300_v21 = vld [vmem:[#allocation8 + $0x70] sm:$0xff]  ;;  %v301_v23 = vld [vmem:[#allocation8 + $0x78] sm:$0xff]  ;;  %s3223_s26 = sshll.u32 %s4791_s9, 4  ;;  %s3224_s26 = int_to_ptr.vmem [resolvable:$true] %s3223_s26 }
 0x145   :  { %v5191_v22 = vpack.c.bf16 %v299_v19, %v298_v18  ;;  %v5195_v24 = vpack.c.bf16 %v301_v23, %v300_v21  ;;  %v304_v25 = vld [vmem:[#allocation3 + $0x8] sm:$0xff]  ;;  %v305_v26 = vld [vmem:[#allocation3 + $0x10] sm:$0xff]  ;;  %v306_v27 = vld [vmem:[#allocation3 + $0x18] sm:$0xff]  ;;  %s4715_s13 = scalar_lea.vmem %s3224_s26, 1024  ;;  %p4720_p11 = scmp.lt.s32.totalorder %s3224_s26, %s3224_s26 }
 0x146   :  { %v5200_v28 = vld [vmem:[#allocation9] sm:$0x3]  ;;  %v692_v45 = vld [vmem:[#allocation11] sm:$0xff]  ;;  %v693_v48 = vld [vmem:[#allocation11 + $0x8] sm:$0xff]  ;;  %p4716_p10 = scmp.ne.s32.totalorder %s3224_s26, %s4715_s13  ;;  %p4721_p12 = scmp.lt.s32.totalorder %s4715_s13, %s4715_s13 }
 0x147   :  { %3994 = vmatpush3.bf16.msra.mxu0 %v5167_v5  ;;  %3707 = vmatprep.subr.msk.mxu1 %vm405_vm0, %v5200_v28  ;;  %v720_v46 = vld [vmem:[#allocation12] sm:$0xff]  ;;  %v721_v49 = vld [vmem:[#allocation12 + $0x8] sm:$0xff]  ;;  %v694_v50 = vld [vmem:[#allocation11 + $0x10] sm:$0xff] }
 0x148   :  { %3996 = vmatprep.subr.bf16.mxu0 %v5172_v8  ;;  %3708 = vmatpush3.msk.msra.mxu1 %vm405_vm0, %v5200_v28  ;;  %v695_v51 = vld [vmem:[#allocation11 + $0x18] sm:$0xff]  ;;  %v722_v52 = vld [vmem:[#allocation12 + $0x10] sm:$0xff]  ;;  %p4722_p13 = por %p4721_p12, %p4720_p11 }
 0x149   :  { %4020 = vmatprep.subr.bf16.mxu1 %v5165_v3  ;;  %698 = vperm.xlu0 %4214, %v692_v45   ;;  %v723_v53 = vld [vmem:[#allocation12 + $0x18] sm:$0xff] }
 0x14a   :  { %726 = vperm.xlu1 %4215, %v720_v46   ;;  %p4723_p0 = pnand %p4722_p13, %p4716_p10 }
 0x14b   :  { %3998 = vmatpush3.bf16.msra.mxu0 %v5172_v8 }
 0x14c   :  { %4000 = vmatprep.subr.bf16.mxu0 %v5179_v14 }
 0x14d   :  { %703 = vperm.xlu0 %4214, %v693_v48  }
 0x14e   :  { %731 = vperm.xlu1 %4215, %v721_v49  }
 0x14f   :  { %4002 = vmatpush3.bf16.msra.mxu0 %v5179_v14 }
 0x150   :  { %4004 = vmatprep.subr.bf16.mxu0 %v5183_v17 }
 0x151   :  { %708 = vperm.xlu0 %4214, %v694_v50  }
 0x152   :  { %713 = vperm.xlu1 %4215, %v695_v51  }
 0x153   :  { %4006 = vmatpush3.bf16.msra.mxu0 %v5183_v17 }
 0x154   :  { %4008 = vmatprep.subr.bf16.mxu0 %v5187_v20 }
 0x155   :  { %736 = vperm.xlu0 %4214, %v722_v52  }
 0x156   :  { %741 = vperm.xlu1 %4215, %v723_v53  }
 0x157   :  { %4010 = vmatpush3.bf16.msra.mxu0 %v5187_v20 }
 0x158   :  { %4012 = vmatprep.subr.bf16.mxu0 %v5191_v22 }
 0x15b   :  { %4014 = vmatpush3.bf16.msra.mxu0 %v5191_v22 }
 0x15c   :  { %4016 = vmatprep.subr.bf16.mxu0 %v5195_v24 }
 0x15f   :  { %4018 = vmatpush3.bf16.msra.mxu0 %v5195_v24 }
 0x160   :  { %3753 = vmatprep.subr.msk.mxu0 %vm405_vm0, %v5200_v28 }
 0x162   :  { %3702 = vmatmul.mubr.f32.vlgmr.msra.gmra.mrb[0].mxu0 %v304_v25 }
 0x163   :  { %3704 = vmatprep.mubr.f32.mxu0 %v305_v26  ;;  %3754 = vmatpush3.msk.msra.mxu0 %vm405_vm0, %v5200_v28 }
 0x166   :  { %3705 = vmatmul.mubr.f32.gmra.mrb[2].mxu0 %v306_v27 }
 0x1c8   :  { %v699_v63 = vpop.permute.xlu0 %698 }
 0x1c9   :  { %v727_v62 = vpop.permute.xlu1 %726 }
 0x1cc   :  { %v704_v7 = vpop.permute.xlu0 %703 }
 0x1cd   :  { %v732_v6 = vpop.permute.xlu1 %731 }
 0x1d0   :  { %v709_v16 = vpop.permute.xlu0 %708 }
 0x1d1   :  { %v714_v13 = vpop.permute.xlu1 %713 }
 0x235   :  { %v3703_v29 = vpop.f32.mrb[0].mxu0 }
 0x236   :  { %v373_v30 = vpop.f32.mrb[1].mxu0 }
 0x237   :  { %3709 = vmatprep.mubr.msk.f32.mxu1 %vm392_vm1, %v373_v30 }
 0x238   :  { %3710 = vmatmul.mubr.msk.f32.vlgmr.msra.gmra.mrb[0].mxu1 %vm392_vm1, %v3703_v29 }
 0x239   :  { %v3706_v31 = vpop.f32.mrb[2].mxu0  ;;  %4022 = vmatpush3.bf16.msra.mxu1 %v5165_v3 }
 0x23a   :  { %v383_v32 = vpop.f32.mrb[3].mxu0  ;;  %4024 = vmatprep.subr.bf16.mxu1 %v5167_v5 }
 0x23b   :  { %3712 = vmatprep.mubr.msk.f32.mxu1 %vm392_vm1, %v383_v32 }
 0x23c   :  { %3713 = vmatmul.mubr.msk.f32.gmra.mrb[2].mxu1 %vm392_vm1, %v3706_v31 }
 0x23d   :  { %4026 = vmatpush3.bf16.msra.mxu1 %v5167_v5 }
 0x23e   :  { %4028 = vmatprep.subr.bf16.mxu1 %v5172_v8 }
 0x241   :  { %4030 = vmatpush3.bf16.msra.mxu1 %v5172_v8 }
 0x242   :  { %4032 = vmatprep.subr.bf16.mxu1 %v5179_v14 }
 0x245   :  { %4034 = vmatpush3.bf16.msra.mxu1 %v5179_v14 }
 0x246   :  { %4036 = vmatprep.subr.bf16.mxu1 %v5183_v17 }
 0x249   :  { %4038 = vmatpush3.bf16.msra.mxu1 %v5183_v17 }
 0x24a   :  { %4040 = vmatprep.subr.bf16.mxu1 %v5187_v20 }
 0x24d   :  { %4042 = vmatpush3.bf16.msra.mxu1 %v5187_v20 }
 0x24e   :  { %4044 = vmatprep.subr.bf16.mxu1 %v5191_v22 }
 0x251   :  { %4046 = vmatpush3.bf16.msra.mxu1 %v5191_v22 }
 0x252   :  { %4048 = vmatprep.subr.bf16.mxu1 %v5195_v24 }
 0x255   :  { %4050 = vmatpush3.bf16.msra.mxu1 %v5195_v24 }
 0x30b   :  { %v3711_v33 = vpop.f32.mrb[0].mxu1 }
 0x30c   :  { %v495_v34 = vsub.f32 %v304_v25, %v3711_v33  ;;  %v475_v35 = vpop.f32.mrb[1].mxu1  ;;  %v742_v33 = vpop.permute.xlu1 %741 }
 0x30d   :  { %v494_v36 = vsub.f32 %v5174_v9, %v475_v35 }
 0x30e   :  { %v499_v39 = vmul.f32 %v495_v34, %v495_v34 }
 0x30f   :  { %v498_v37 = vmul.f32 %v494_v36, %v494_v36  ;;  %v3714_v38 = vpop.f32.mrb[2].mxu1 }
 0x310   :  { %v5231_v40 = vsub.f32 %v306_v27, %v3714_v38  ;;  %v485_v41 = vpop.f32.mrb[3].mxu1 }
 0x311   :  { %v5233_v42 = vsub.f32 %v305_v26, %v485_v41  ;;  %3747 = vmatprep.mubr.f32.mxu1 %v498_v37 }
 0x312   :  { %v501_v43 = vmul.f32 %v5231_v40, %v5231_v40  ;;  %3748 = vmatmul.mubr.f32.vlgmr.msra.gmra.mrb[4].mxu1 %v499_v39 }
 0x313   :  { %v500_v44 = vmul.f32 %v5233_v42, %v5233_v42 }
 0x315   :  { %3750 = vmatprep.mubr.f32.mxu1 %v500_v44 }
 0x316   :  { %3751 = vmatmul.mubr.f32.gmra.mrb[6].mxu1 %v501_v43 }
 0x3e5   :  { %v3749_v54 = vpop.f32.mrb[4].mxu1 }
 0x3e6   :  { %v568_v55 = vpop.f32.mrb[5].mxu1 }
 0x3e7   :  { %3755 = vmatprep.mubr.msk.f32.mxu0 %vm392_vm1, %v568_v55 }
 0x3e8   :  { %3756 = vmatmul.mubr.msk.f32.vlgmr.msra.gmra.mrb[4].mxu0 %vm392_vm1, %v3749_v54 }
 0x3e9   :  { %v3752_v56 = vpop.f32.mrb[6].mxu1 }
 0x3ea   :  { %v578_v57 = vpop.f32.mrb[7].mxu1 }
 0x3eb   :  { %3758 = vmatprep.mubr.msk.f32.mxu0 %vm392_vm1, %v578_v57  ;;  %v4218_v57 = vld [vmem:[#allocation15 + $0x4] ss:$12 sps:$4 sm:$0xff]  }
 0x3ec   :  { %3759 = vmatmul.mubr.msk.f32.gmra.mrb[6].mxu0 %vm392_vm1, %v3752_v56  ;;  %1158 = vmatprep.mubr.bf16.mxu1 %v4218_v57 }
 0x4bb   :  { %v3757_v58 = vpop.f32.mrb[4].mxu0 }
 0x4bc   :  { %v671_v59 = vadd.f32 1e-05, %v3757_v58  ;;  %v665_v60 = vpop.f32.mrb[5].mxu0  ;;  %v4219_v58 = vld [vmem:[#allocation15 + $0x8] ss:$12 sps:$4 sm:$0xff]  }
 0x4bd   :  { %v666_v61 = vadd.f32 1e-05, %v665_v60  ;;  %3765 = vmatprep.mubr.msk.bf16.mxu0 %vm1113_vm2, %v4219_v58  ;;  %v1005_v60 = vld [vmem:[#allocation17] sm:$0xff] }
 0x4be   :  { %4264 = vrsqrt.f32 %v671_v59  ;;  %v1006_v59 = vld [vmem:[#allocation17 + $0x8] sm:$0xff] }
 0x4bf   :  { %4266 = vrsqrt.f32 %v666_v61  ;;  %v3760_v0 = vpop.f32.mrb[6].mxu0  ;;  %v1008_v61 = vld [vmem:[#allocation17 + $0x18] sm:$0xff] }
 0x4c0   :  { %v681_v1 = vadd.f32 1e-05, %v3760_v0  ;;  %v675_v2 = vpop.f32.mrb[7].mxu0  ;;  %v1009_v0 = vld [vmem:[#allocation17 + $0x20] sm:$0xff] }
 0x4c1   :  { %v676_v4 = vadd.f32 1e-05, %v675_v2  ;;  %v1011_v2 = vld [vmem:[#allocation17 + $0x30] sm:$0xff] }
 0x4c2   :  { %4268 = vrsqrt.f32 %v681_v1  ;;  %v1012_v1 = vld [vmem:[#allocation17 + $0x38] sm:$0xff] }
 0x4c3   :  { %4270 = vrsqrt.f32 %v676_v4  ;;  %v2145_v4 = vld [vmem:[#allocation20 + $0x8] sm:$0xff] }
 0x4c8   :  { %v4265_v9 = vpop.eup %4264 }
 0x4c9   :  { %v4267_v10 = vpop.eup %4266  ;;  %v689_v11 = vmul.f32 %v4265_v9, %v495_v34  ;;  %v737_v34 = vpop.permute.xlu0 %736  ;;  %v2200_v9 = vld [vmem:[#allocation21] sm:$0xff] }
 0x4ca   :  { %v688_v12 = vmul.f32 %v4267_v10, %v494_v36  ;;  %v2147_v10 = vld [vmem:[#allocation20 + $0x18] sm:$0xff] }
 0x4cb   :  { %v717_v15 = vmul.f32 %v704_v7, %v689_v11  ;;  %v2201_v7 = vld [vmem:[#allocation21 + $0x8] sm:$0xff]  ;;  %v2146_v11 = vld [vmem:[#allocation20 + $0x10] sm:$0xff] }
 0x4cc   :  { %v4269_v18 = vpop.eup %4268  ;;  %v716_v19 = vmul.f32 %v699_v63, %v688_v12  ;;  %v1010_v63 = vld [vmem:[#allocation17 + $0x28] sm:$0xff]  ;;  %v2203_v12 = vld [vmem:[#allocation21 + $0x18] sm:$0xff] }
 0x4cd   :  { %v4271_v21 = vpop.eup %4270  ;;  %v745_v23 = vadd.f32 %v732_v6, %v717_v15  ;;  %v691_v25 = vmul.f32 %v4269_v18, %v5231_v40  ;;  %v2144_v6 = vld [vmem:[#allocation20] sm:$0xff]  ;;  %v2149_v15 = vld [vmem:[#allocation20 + $0x28] sm:$0xff] }
 0x4ce   :  { %v744_v26 = vadd.f32 %v727_v62, %v716_v19  ;;  %v690_v27 = vmul.f32 %v4271_v21, %v5233_v42  ;;  %v1007_v62 = vld [vmem:[#allocation17 + $0x10] sm:$0xff]  ;;  %v2205_v18 = vld [vmem:[#allocation21 + $0x28] sm:$0xff]  ;;  %v2204_v19 = vld [vmem:[#allocation21 + $0x20] sm:$0xff] }
 0x4cf   :  { %v3254_v29 = vmul.f32 -1.442695, %v745_v23  ;;  %v719_v30 = vmul.f32 %v714_v13, %v691_v25  ;;  %v2202_v13 = vld [vmem:[#allocation21 + $0x10] sm:$0xff]  ;;  %v2151_v21 = vld [vmem:[#allocation20 + $0x38] sm:$0xff] }
 0x4d0   :  { %v3253_v31 = vmul.f32 -1.442695, %v744_v26  ;;  %v718_v32 = vmul.f32 %v709_v16, %v690_v27  ;;  %v2148_v16 = vld [vmem:[#allocation20 + $0x20] sm:$0xff]  ;;  %v2207_v25 = vld [vmem:[#allocation21 + $0x38] sm:$0xff]  ;;  %v3257_v27 = vld [vmem:[#allocation6] ss:$0 sm:$0xff] }
 0x4d1   :  { %4272 = vpow2.f32 %v3254_v29  ;;  %v747_v35 = vadd.f32 %v742_v33, %v719_v30 }
 0x4d2   :  { %4274 = vpow2.f32 %v3253_v31  ;;  %v746_v36 = vadd.f32 %v737_v34, %v718_v32 }
 0x4d3   :  { %v3256_v37 = vmul.f32 -1.442695, %v747_v35 }
 0x4d4   :  { %v3255_v38 = vmul.f32 -1.442695, %v746_v36 }
 0x4d5   :  { %4276 = vpow2.f32 %v3256_v37 }
 0x4d6   :  { %4278 = vpow2.f32 %v3255_v38 }
 0x4db   :  { %v4273_v39 = vpop.eup %4272 }
 0x4dc   :  { %v4275_v41 = vpop.eup %4274  ;;  %v761_v40 = vadd.f32 1.0, %v4273_v39 }
 0x4dd   :  { %v760_v43 = vadd.f32 1.0, %v4275_v41 }
 0x4de   :  { %4280 = vrcp.f32 %v761_v40 }
 0x4df   :  { %v4277_v42 = vpop.eup %4276  ;;  %4282 = vrcp.f32 %v760_v43 }
 0x4e0   :  { %v4279_v44 = vpop.eup %4278  ;;  %v763_v45 = vadd.f32 1.0, %v4277_v42 }
 0x4e1   :  { %v762_v46 = vadd.f32 1.0, %v4279_v44 }
 0x4e2   :  { %4284 = vrcp.f32 %v763_v45 }
 0x4e3   :  { %4286 = vrcp.f32 %v762_v46  ;;  %v5303_v46 = vld [vmem:[#allocation6 + $0x8] ss:$0 sm:$0xff] }
 0x4e8   :  { %v4281_v47 = vpop.eup %4280 }
 0x4e9   :  { %v4283_v48 = vpop.eup %4282  ;;  %v773_v49 = vmul.f32 %v4281_v47, %v745_v23  ;;  %v2150_v23 = vld [vmem:[#allocation20 + $0x30] sm:$0xff] }
 0x4ea   :  { %v772_v50 = vmul.f32 %v4283_v48, %v744_v26  ;;  %v2206_v26 = vld [vmem:[#allocation21 + $0x30] sm:$0xff] }
 0x4eb   :  { %778 = vrot.lane.b32.xlu1 %v773_v49, %s4785_s16 }
 0x4ec   :  { %v4285_v51 = vpop.eup %4284  ;;  %776 = vrot.lane.b32.xlu0 %v772_v50, %s4785_s16  ;;  %v871_v52 = vpack.c.bf16 %v773_v49, %v772_v50 }
 0x4ed   :  { %v4287_v53 = vpop.eup %4286  ;;  %v5247_v54 = vmul.f32 %v4285_v51, %v747_v35 }
 0x4ee   :  { %v5249_v55 = vmul.f32 %v4287_v53, %v746_v36  ;;  %3422 = vmatprep.subr.bf16.mxu1 %v871_v52 }
 0x4ef   :  { %877 = vrot.lane.b32.xlu1 %v773_v49, %s4786_s7 }
 0x4f0   :  { %875 = vrot.lane.b32.xlu0 %v772_v50, %s4786_s7  ;;  %v872_v56 = vpack.c.bf16 %v5247_v54, %v5249_v55 }
 0x4f3   :  { %801 = vrot.lane.b32.xlu1 %v773_v49, %s4764_s20 }
 0x4f4   :  { %799 = vrot.lane.b32.xlu0 %v772_v50, %s4764_s20 }
 0x4f7   :  { %901 = vrot.lane.b32.xlu1 %v773_v49, %s4787_s2 }
 0x4f8   :  { %899 = vrot.lane.b32.xlu0 %v772_v50, %s4787_s2 }
 0x4fb   :  { %825 = vrot.lane.b32.xlu1 %v773_v49, %s4788_s24 }
 0x4fc   :  { %823 = vrot.lane.b32.xlu0 %v772_v50, %s4788_s24 }
 0x4ff   :  { %925 = vrot.lane.b32.xlu1 %v773_v49, %s4789_s10 }
 0x500   :  { %923 = vrot.lane.b32.xlu0 %v772_v50, %s4789_s10 }
 0x503   :  { %849 = vrot.lane.b32.xlu1 %v773_v49, %s5825_s30 }
 0x504   :  { %847 = vrot.lane.b32.xlu0 %v772_v50, %s5825_s30 }
 0x507   :  { %949 = vrot.lane.b32.xlu1 %v773_v49, %s4790_s6 }
 0x508   :  { %947 = vrot.lane.b32.xlu0 %v772_v50, %s4790_s6  ;;  %v3261_v50 = vld [vmem:[#allocation6 + $0x5] ss:$0 sm:$0xff] }
 0x50b   :  { %782 = vrot.lane.b32.xlu1 %v5247_v54, %s4785_s16 }
 0x50c   :  { %780 = vrot.lane.b32.xlu0 %v5249_v55, %s4785_s16 }
 0x50f   :  { %881 = vrot.lane.b32.xlu1 %v5247_v54, %s4786_s7 }
 0x510   :  { %879 = vrot.lane.b32.xlu0 %v5249_v55, %s4786_s7 }
 0x513   :  { %805 = vrot.lane.b32.xlu1 %v5247_v54, %s4764_s20 }
 0x514   :  { %803 = vrot.lane.b32.xlu0 %v5249_v55, %s4764_s20 }
 0x517   :  { %905 = vrot.lane.b32.xlu1 %v5247_v54, %s4787_s2 }
 0x518   :  { %903 = vrot.lane.b32.xlu0 %v5249_v55, %s4787_s2 }
 0x51b   :  { %829 = vrot.lane.b32.xlu1 %v5247_v54, %s4788_s24 }
 0x51c   :  { %827 = vrot.lane.b32.xlu0 %v5249_v55, %s4788_s24 }
 0x51f   :  { %929 = vrot.lane.b32.xlu1 %v5247_v54, %s4789_s10 }
 0x520   :  { %927 = vrot.lane.b32.xlu0 %v5249_v55, %s4789_s10 }
 0x523   :  { %853 = vrot.lane.b32.xlu1 %v5247_v54, %s5825_s30 }
 0x524   :  { %851 = vrot.lane.b32.xlu0 %v5249_v55, %s5825_s30 }
 0x527   :  { %953 = vrot.lane.b32.xlu1 %v5247_v54, %s4790_s6 }
 0x528   :  { %951 = vrot.lane.b32.xlu0 %v5249_v55, %s4790_s6 }
 0x52b   :  { %1020 = vperm.xlu1 %4215, %v1006_v59  }
 0x52c   :  { %1015 = vperm.xlu0 %4214, %v1005_v60  }
 0x52f   :  { %1030 = vperm.xlu1 %4215, %v1008_v61  }
 0x530   :  { %1025 = vperm.xlu0 %4214, %v1007_v62  }
 0x533   :  { %1040 = vperm.xlu1 %4215, %v1010_v63  }
 0x534   :  { %1035 = vperm.xlu0 %4214, %v1009_v0  }
 0x537   :  { %1050 = vperm.xlu1 %4215, %v1012_v1  }
 0x538   :  { %1045 = vperm.xlu0 %4214, %v1011_v2  }
 0x53b   :  { %2159 = vperm.xlu1 %4215, %v2145_v4   ;;  %v3262_v4 = vld [vmem:[#allocation6 + $0x6] ss:$0 sm:$0xff] }
 0x53c   :  { %2154 = vperm.xlu0 %4214, %v2144_v6  }
 0x53f   :  { %2215 = vperm.xlu1 %4215, %v2201_v7  }
 0x540   :  { %2210 = vperm.xlu0 %4214, %v2200_v9  }
 0x543   :  { %2169 = vperm.xlu1 %4215, %v2147_v10  }
 0x544   :  { %2164 = vperm.xlu0 %4214, %v2146_v11  }
 0x547   :  { %2225 = vperm.xlu1 %4215, %v2203_v12  }
 0x548   :  { %2220 = vperm.xlu0 %4214, %v2202_v13   ;;  %v3259_v13 = vld [vmem:[#allocation6 + $0x2] ss:$0 sm:$0xff] }
 0x54b   :  { %2179 = vperm.xlu1 %4215, %v2149_v15  }
 0x54c   :  { %2174 = vperm.xlu0 %4214, %v2148_v16  }
 0x54f   :  { %2235 = vperm.xlu1 %4215, %v2205_v18  }
 0x550   :  { %2230 = vperm.xlu0 %4214, %v2204_v19  }
 0x553   :  { %2189 = vperm.xlu1 %4215, %v2151_v21  }
 0x554   :  { %2184 = vperm.xlu0 %4214, %v2150_v23  }
 0x557   :  { %2245 = vperm.xlu1 %4215, %v2207_v25  }
 0x558   :  { %2240 = vperm.xlu0 %4214, %v2206_v26  }
 0x55d   :  { %v779_v29 = vpop.permute.xlu1 %778 }
 0x55e   :  { %v792_v30 = vmul.f32 %v3257_v27, %v779_v29  ;;  %v777_v31 = vpop.permute.xlu0 %776 }
 0x55f   :  { %v791_v32 = vmul.f32 %v3257_v27, %v777_v31 }
 0x561   :  { %v795_v33 = vpack.c.bf16 %v792_v30, %v791_v32  ;;  %v878_v34 = vpop.permute.xlu1 %877  ;;  %v3263_v30 = vld [vmem:[#allocation6 + $0x7] ss:$0 sm:$0xff] }
 0x562   :  { %v876_v35 = vpop.permute.xlu0 %875  ;;  %v892_v54 = vmul.f32 %v3261_v50, %v878_v34 }
 0x563   :  { %3423 = vmatpush3.bf16.msra.mxu1 %v795_v33  ;;  %v891_v55 = vmul.f32 %v3261_v50, %v876_v35 }
 0x564   :  { %3424 = vmatprep.subr.bf16.mxu1 %v872_v56  ;;  %v3258_v56 = vld [vmem:[#allocation6 + $0x1] ss:$0 sm:$0xff] }
 0x565   :  { %v802_v36 = vpop.permute.xlu1 %801  ;;  %v895_v0 = vpack.c.bf16 %v892_v54, %v891_v55 }
 0x566   :  { %v800_v37 = vpop.permute.xlu0 %799  ;;  %v816_v60 = vmul.f32 %v3258_v56, %v802_v36 }
 0x567   :  { %v815_v61 = vmul.f32 %v3258_v56, %v800_v37  ;;  %v3260_v37 = vld [vmem:[#allocation6 + $0x3] ss:$0 sm:$0xff] }
 0x569   :  { %v902_v38 = vpop.permute.xlu1 %901  ;;  %v819_v7 = vpack.c.bf16 %v816_v60, %v815_v61  ;;  %v4216_v60 = vld [vmem:[#allocation15] ss:$12 sps:$4 sm:$0xff]  }
 0x56a   :  { %v900_v39 = vpop.permute.xlu0 %899  ;;  %v916_v11 = vmul.f32 %v3262_v4, %v902_v38 }
 0x56b   :  { %v915_v12 = vmul.f32 %v3262_v4, %v900_v39 }
 0x56d   :  { %v826_v41 = vpop.permute.xlu1 %825  ;;  %v919_v26 = vpack.c.bf16 %v916_v11, %v915_v12  ;;  %v1258_v11 = vld [vmem:[#allocation18 + $0x10] sm:$0xff] }
 0x56e   :  { %v824_v40 = vpop.permute.xlu0 %823  ;;  %v840_v19 = vmul.f32 %v3259_v13, %v826_v41  ;;  %v4231_v12 = vld [vmem:[#allocation15 + $0x48] ss:$12 sps:$4 sm:$0xff]  }
 0x56f   :  { %v839_v21 = vmul.f32 %v3259_v13, %v824_v40 }
 0x571   :  { %v926_v43 = vpop.permute.xlu1 %925  ;;  %v843_v32 = vpack.c.bf16 %v840_v19, %v839_v21  ;;  %v1263_v19 = vld [vmem:[#allocation18 + $0x38] sm:$0xff] }
 0x572   :  { %v924_v42 = vpop.permute.xlu0 %923  ;;  %v940_v35 = vmul.f32 %v3263_v30, %v926_v43 }
 0x573   :  { %v939_v36 = vmul.f32 %v3263_v30, %v924_v42 }
 0x575   :  { %v850_v44 = vpop.permute.xlu1 %849 }
 0x576   :  { %v848_v45 = vpop.permute.xlu0 %847  ;;  %v864_v41 = vmul.f32 %v3260_v37, %v850_v44 }
 0x577   :  { %v863_v40 = vmul.f32 %v3260_v37, %v848_v45 }
 0x579   :  { %v950_v47 = vpop.permute.xlu1 %949  ;;  %v867_v54 = vpack.c.bf16 %v864_v41, %v863_v40 }
 0x57a   :  { %v964_v48 = vmul.f32 %v5303_v46, %v950_v47  ;;  %v948_v49 = vpop.permute.xlu0 %947 }
 0x57b   :  { %v963_v51 = vmul.f32 %v5303_v46, %v948_v49 }
 0x57d   :  { %v967_v52 = vpack.c.bf16 %v964_v48, %v963_v51  ;;  %v783_v53 = vpop.permute.xlu1 %782 }
 0x57e   :  { %v794_v57 = vmul.f32 %v3257_v27, %v783_v53  ;;  %v781_v58 = vpop.permute.xlu0 %780 }
 0x57f   :  { %v793_v59 = vmul.f32 %v3257_v27, %v781_v58  ;;  %3761 = vmatprep.subr.bf16.mxu0 %v967_v52 }
 0x580   :  { %3762 = vmatpush3.bf16.msra.mxu0 %v967_v52 }
 0x581   :  { %v796_v62 = vpack.c.bf16 %v794_v57, %v793_v59  ;;  %v882_v63 = vpop.permute.xlu1 %881 }
 0x582   :  { %v894_v1 = vmul.f32 %v3261_v50, %v882_v63  ;;  %v880_v2 = vpop.permute.xlu0 %879 }
 0x583   :  { %v893_v6 = vmul.f32 %v3261_v50, %v880_v2  ;;  %3425 = vmatpush3.bf16.msra.mxu1 %v796_v62  ;;  %v943_v50 = vpack.c.bf16 %v940_v35, %v939_v36  ;;  %v4221_v62 = vld [vmem:[#allocation15 + $0x1c] ss:$12 sps:$4 sm:$0xff]   ;;  %v4223_v2 = vld [vmem:[#allocation15 + $0x18] ss:$12 sps:$4 sm:$0xff]  }
 0x584   :  { %3426 = vmatprep.subr.bf16.mxu1 %v895_v0  ;;  %v4220_v0 = vld [vmem:[#allocation15 + $0x20] ss:$12 sps:$4 sm:$0xff]  }
 0x585   :  { %v896_v9 = vpack.c.bf16 %v894_v1, %v893_v6  ;;  %v806_v10 = vpop.permute.xlu1 %805  ;;  %v4224_v1 = vld [vmem:[#allocation15 + $0x38] ss:$12 sps:$4 sm:$0xff]  }
 0x586   :  { %v818_v15 = vmul.f32 %v3258_v56, %v806_v10  ;;  %v804_v16 = vpop.permute.xlu0 %803  ;;  %v1256_v6 = vld [vmem:[#allocation18] sm:$0xff]  ;;  %v1257_v10 = vld [vmem:[#allocation18 + $0x8] sm:$0xff] }
 0x587   :  { %v817_v18 = vmul.f32 %v3258_v56, %v804_v16  ;;  %3427 = vmatpush3.bf16.msra.mxu1 %v819_v7  ;;  %v4228_v7 = vld [vmem:[#allocation15 + $0x30] ss:$12 sps:$4 sm:$0xff]   ;;  %v1261_v16 = vld [vmem:[#allocation18 + $0x28] sm:$0xff] }
 0x588   :  { %3428 = vmatprep.subr.bf16.mxu1 %v896_v9  ;;  %v4229_v9 = vld [vmem:[#allocation15 + $0x4c] ss:$12 sps:$4 sm:$0xff]  }
 0x589   :  { %v820_v23 = vpack.c.bf16 %v818_v15, %v817_v18  ;;  %v906_v25 = vpop.permute.xlu1 %905  ;;  %v1260_v15 = vld [vmem:[#allocation18 + $0x20] sm:$0xff]  ;;  %v1262_v18 = vld [vmem:[#allocation18 + $0x30] sm:$0xff] }
 0x58a   :  { %v918_v27 = vmul.f32 %v3262_v4, %v906_v25  ;;  %v904_v29 = vpop.permute.xlu0 %903 }
 0x58b   :  { %v917_v31 = vmul.f32 %v3262_v4, %v904_v29  ;;  %3429 = vmatpush3.bf16.msra.mxu1 %v820_v23  ;;  %v4226_v4 = vld [vmem:[#allocation15 + $0x34] ss:$12 sps:$4 sm:$0xff]  }
 0x58c   :  { %3430 = vmatprep.subr.bf16.mxu1 %v919_v26 }
 0x58d   :  { %v920_v33 = vpack.c.bf16 %v918_v27, %v917_v31  ;;  %v830_v34 = vpop.permute.xlu1 %829 }
 0x58e   :  { %v842_v38 = vmul.f32 %v3259_v13, %v830_v34  ;;  %v828_v39 = vpop.permute.xlu0 %827 }
 0x58f   :  { %v841_v47 = vmul.f32 %v3259_v13, %v828_v39  ;;  %3431 = vmatpush3.bf16.msra.mxu1 %v843_v32  ;;  %v1259_v13 = vld [vmem:[#allocation18 + $0x18] sm:$0xff] }
 0x590   :  { %3432 = vmatprep.subr.bf16.mxu1 %v920_v33 }
 0x591   :  { %v844_v48 = vpack.c.bf16 %v842_v38, %v841_v47  ;;  %v930_v49 = vpop.permute.xlu1 %929 }
 0x592   :  { %v942_v51 = vmul.f32 %v3263_v30, %v930_v49  ;;  %v928_v52 = vpop.permute.xlu0 %927 }
 0x593   :  { %v941_v53 = vmul.f32 %v3263_v30, %v928_v52  ;;  %3433 = vmatpush3.bf16.msra.mxu1 %v844_v48 }
 0x594   :  { %3434 = vmatprep.subr.bf16.mxu1 %v943_v50 }
 0x595   :  { %v944_v55 = vpack.c.bf16 %v942_v51, %v941_v53  ;;  %v854_v43 = vpop.permute.xlu1 %853 }
 0x596   :  { %v866_v42 = vmul.f32 %v3260_v37, %v854_v43  ;;  %v852_v56 = vpop.permute.xlu0 %851 }
 0x597   :  { %v865_v57 = vmul.f32 %v3260_v37, %v852_v56  ;;  %3435 = vmatpush3.bf16.msra.mxu1 %v867_v54 }
 0x598   :  { %3436 = vmatprep.subr.bf16.mxu1 %v944_v55 }
 0x599   :  { %v868_v58 = vpack.c.bf16 %v866_v42, %v865_v57  ;;  %v954_v59 = vpop.permute.xlu1 %953 }
 0x59a   :  { %v966_v44 = vmul.f32 %v5303_v46, %v954_v59  ;;  %v952_v45 = vpop.permute.xlu0 %951 }
 0x59b   :  { %v965_v61 = vmul.f32 %v5303_v46, %v952_v45  ;;  %3437 = vmatpush3.bf16.msra.mxu1 %v868_v58  ;;  %v4225_v46 = vld [vmem:[#allocation15 + $0x50] ss:$12 sps:$4 sm:$0xff]  }
 0x59d   :  { %v968_v63 = vpack.c.bf16 %v966_v44, %v965_v61 }
 0x59e   :  { %1159 = vmatmul.mubr.bf16.vlgmr.msra.gmra.mrb[8].mxu1 %v4216_v60 }
 0x59f   :  { %3763 = vmatprep.subr.bf16.mxu0 %v968_v63  ;;  %1166 = vmatprep.mubr.bf16.mxu1 %v4221_v62 }
 0x5a0   :  { %3764 = vmatpush3.bf16.msra.mxu0 %v968_v63 }
 0x5a1   :  { %3773 = vmatprep.subr.msk.mxu0 %vm405_vm0, %v5200_v28 }
 0x5a3   :  { %3766 = vmatmul.mubr.msk.bf16.vlgmr.msra.gmra.mrb[8].mxu0 %vm1113_vm2, %v4220_v0 }
 0x5a4   :  { %3769 = vmatprep.mubr.msk.bf16.mxu0 %vm1113_vm2, %v4224_v1  ;;  %3774 = vmatpush3.msk.msra.mxu0 %vm405_vm0, %v5200_v28 }
 0x5a5   :  { %4052 = vmatprep.subr.bf16.mxu0 %v5165_v3 }
 0x5a6   :  { %1167 = vmatmul.mubr.bf16.gmra.mrb[12].mxu1 %v4223_v2 }
 0x5a7   :  { %1174 = vmatprep.mubr.bf16.mxu1 %v4226_v4 }
 0x5aa   :  { %v1021_v32 = vpop.permute.xlu1 %1020 }
 0x5ab   :  { %3770 = vmatmul.mubr.msk.bf16.gmra.mrb[12].mxu0 %vm1113_vm2, %v4225_v46  ;;  %v1016_v27 = vpop.permute.xlu0 %1015 }
 0x5ac   :  { %3775 = vmatprep.mubr.msk.f32.mxu0 %vm392_vm1, %v1256_v6 }
 0x5ae   :  { %1175 = vmatmul.mubr.bf16.gmra.mrb[16].mxu1 %v4228_v7  ;;  %v1031_v53 = vpop.permute.xlu1 %1030 }
 0x5af   :  { %1182 = vmatprep.mubr.bf16.mxu1 %v4229_v9  ;;  %v1026_v49 = vpop.permute.xlu0 %1025 }
 0x5b2   :  { %v1041_v1 = vpop.permute.xlu1 %1040 }
 0x5b3   :  { %3776 = vmatmul.mubr.msk.f32.vlgmr.msra.gmra.mrb[16].mxu0 %vm392_vm1, %v1257_v10  ;;  %v1036_v61 = vpop.permute.xlu0 %1035 }
 0x5b4   :  { %3778 = vmatprep.mubr.msk.f32.mxu0 %vm392_vm1, %v1258_v11  ;;  %4054 = vmatpush3.bf16.msra.mxu0 %v5165_v3 }
 0x5b5   :  { %4056 = vmatprep.subr.bf16.mxu0 %v5167_v5 }
 0x5b6   :  { %1183 = vmatmul.mubr.bf16.gmra.mrb[20].mxu1 %v4231_v12 }
 0x5b7   :  { %3779 = vmatmul.mubr.msk.f32.gmra.mrb[18].mxu0 %vm392_vm1, %v1259_v13 }
 0x5b8   :  { %3781 = vmatprep.mubr.msk.f32.mxu0 %vm392_vm1, %v1260_v15  ;;  %4058 = vmatpush3.bf16.msra.mxu0 %v5167_v5 }
 0x5b9   :  { %4060 = vmatprep.subr.bf16.mxu0 %v5172_v8 }
 0x5bb   :  { %3782 = vmatmul.mubr.msk.f32.gmra.mrb[20].mxu0 %vm392_vm1, %v1261_v16 }
 0x5bc   :  { %3784 = vmatprep.mubr.msk.f32.mxu0 %vm392_vm1, %v1262_v18  ;;  %4062 = vmatpush3.bf16.msra.mxu0 %v5172_v8 }
 0x5bd   :  { %4064 = vmatprep.subr.bf16.mxu0 %v5179_v14 }
 0x5bf   :  { %3785 = vmatmul.mubr.msk.f32.gmra.mrb[22].mxu0 %vm392_vm1, %v1263_v19 }
 0x5c0   :  { %4066 = vmatpush3.bf16.msra.mxu0 %v5179_v14 }
 0x5c1   :  { %4068 = vmatprep.subr.bf16.mxu0 %v5183_v17 }
 0x5c4   :  { %4070 = vmatpush3.bf16.msra.mxu0 %v5183_v17 }
 0x5c5   :  { %4072 = vmatprep.subr.bf16.mxu0 %v5187_v20 }
 0x5c8   :  { %4074 = vmatpush3.bf16.msra.mxu0 %v5187_v20 }
 0x5c9   :  { %4076 = vmatprep.subr.bf16.mxu0 %v5191_v22 }
 0x5cc   :  { %4078 = vmatpush3.bf16.msra.mxu0 %v5191_v22 }
 0x5cd   :  { %4080 = vmatprep.subr.bf16.mxu0 %v5195_v24 }
 0x5d0   :  { %4082 = vmatpush3.bf16.msra.mxu0 %v5195_v24 }
 0x5d1   :  { %3859 = vmatprep.subr.msk.mxu0 %vm405_vm0, %v5200_v28 }
 0x671   :  { %v3438_v21 = vpop.f32.mrb[8].mxu1 }
 0x672   :  { %v3439_v23 = vpop.f32.mrb[9].mxu1 }
 0x673   :  { %v3440_v25 = vadd.f32 %v3439_v23, %v3438_v21  ;;  %v3441_v26 = vpop.f32.mrb[10].mxu1  ;;  %v1046_v21 = vpop.permute.xlu0 %1045 }
 0x674   :  { %v3442_v29 = vpop.f32.mrb[11].mxu1 }
 0x675   :  { %v3443_v30 = vadd.f32 %v3442_v29, %v3441_v26  ;;  %v1161_v31 = vadd.f32 %v3440_v25, %v1016_v27  ;;  %v1051_v29 = vpop.permute.xlu1 %1050 }
 0x676   :  { %v3767_v33 = vpop.f32.mrb[8].mxu0 }
 0x677   :  { %v1225_v34 = vpop.f32.mrb[9].mxu0  ;;  %v1164_v35 = vadd.f32 %v3443_v30, %v1021_v32 }
 0x678   :  { %v1226_v36 = vadd.f32 %v1225_v34, %v1161_v31  ;;  %v3768_v37 = vpop.f32.mrb[10].mxu0 }
 0x679   :  { %v3444_v38 = vpop.f32.mrb[12].mxu1  ;;  %v1228_v39 = vpop.f32.mrb[11].mxu0 }
 0x67a   :  { %v1229_v47 = vadd.f32 %v1228_v39, %v1164_v35  ;;  %v3445_v41 = vpop.f32.mrb[13].mxu1 }
 0x67b   :  { %v3446_v40 = vadd.f32 %v3445_v41, %v3444_v38  ;;  %v3447_v48 = vpop.f32.mrb[14].mxu1 }
 0x67c   :  { %v3448_v50 = vpop.f32.mrb[15].mxu1 }
 0x67d   :  { %v1169_v51 = vadd.f32 %v3446_v40, %v1026_v49  ;;  %v3449_v52 = vadd.f32 %v3448_v50, %v3447_v48 }
 0x67e   :  { %v3771_v54 = vpop.f32.mrb[12].mxu0 }
 0x67f   :  { %v1172_v55 = vadd.f32 %v3449_v52, %v1031_v53  ;;  %v1241_v43 = vpop.f32.mrb[13].mxu0  ;;  %v1234_v42 = vadd.f32 %v3767_v33, %v1169_v51 }
 0x680   :  { %v3772_v56 = vpop.f32.mrb[14].mxu0 }
 0x681   :  { %v3450_v57 = vpop.f32.mrb[16].mxu1  ;;  %v1244_v58 = vpop.f32.mrb[15].mxu0  ;;  %v1237_v59 = vadd.f32 %v3768_v37, %v1172_v55 }
 0x682   :  { %v3451_v44 = vpop.f32.mrb[17].mxu1 }
 0x683   :  { %v3452_v45 = vadd.f32 %v3451_v44, %v3450_v57  ;;  %v3453_v60 = vpop.f32.mrb[18].mxu1  ;;  %v5374_v57 = vld [vmem:[#allocation23 + $0x10] sm:$0xff]  ;;  %v5391_v44 = vld [vmem:[#allocation23 + $0x28] sm:$0xff] }
 0x684   :  { %v3454_v62 = vpop.f32.mrb[19].mxu1 }
 0x685   :  { %v1177_v63 = vadd.f32 %v3452_v45, %v1036_v61  ;;  %v3455_v0 = vadd.f32 %v3454_v62, %v3453_v60  ;;  %v5394_v45 = vld [vmem:[#allocation23 + $0x30] sm:$0xff] }
 0x686   :  { %v3777_v2 = vpop.f32.mrb[16].mxu0 }
 0x687   :  { %v1180_v4 = vadd.f32 %v3455_v0, %v1041_v1  ;;  %v5342_v46 = vadd.f32 %v3777_v2, %v1229_v47  ;;  %v1354_v6 = vpop.f32.mrb[17].mxu0  ;;  %v1242_v7 = vadd.f32 %v1241_v43, %v1177_v63  ;;  %v5368_v47 = vld [vmem:[#allocation23] sm:$0xff] }
 0x688   :  { %v5344_v9 = vadd.f32 %v1354_v6, %v1226_v36  ;;  %3847 = vmatprep.mubr.msk.f32.mxu1 %vm1514_vm3, %v5368_v47 }
 0x689   :  { %v3456_v10 = vpop.f32.mrb[20].mxu1  ;;  %v1245_v11 = vadd.f32 %v1244_v58, %v1180_v4  ;;  %v5381_v58 = vld [vmem:[#allocation23 + $0x18] sm:$0xff] }
 0x68a   :  { %v3457_v12 = vpop.f32.mrb[21].mxu1  ;;  %v3780_v13 = vpop.f32.mrb[18].mxu0  ;;  %3819 = vmatprep.mubr.f32.mxu0 %v5344_v9 }
 0x68b   :  { %v3458_v15 = vadd.f32 %v3457_v12, %v3456_v10  ;;  %v5347_v16 = vadd.f32 %v3780_v13, %v1237_v59  ;;  %v3459_v18 = vpop.f32.mrb[22].mxu1  ;;  %v1364_v19 = vpop.f32.mrb[19].mxu0  ;;  %3820 = vmatmul.mubr.f32.vlgmr.msra.gmra.mrb[24].mxu0 %v5342_v46  ;;  %v5384_v59 = vld [vmem:[#allocation23 + $0x20] sm:$0xff] }
 0x68c   :  { %v5350_v23 = vadd.f32 %v1364_v19, %v1234_v42  ;;  %v3460_v25 = vpop.f32.mrb[23].mxu1  ;;  %3860 = vmatpush3.msk.msra.mxu0 %vm405_vm0, %v5200_v28 }
 0x68d   :  { %v1185_v26 = vadd.f32 %v3458_v15, %v1046_v21  ;;  %v3461_v27 = vadd.f32 %v3460_v25, %v3459_v18 }
 0x68e   :  { %v3783_v30 = vpop.f32.mrb[20].mxu0  ;;  %3822 = vmatprep.mubr.f32.mxu0 %v5350_v23 }
 0x68f   :  { %v1188_v31 = vadd.f32 %v3461_v27, %v1051_v29  ;;  %v5355_v32 = vadd.f32 %v3783_v30, %v1245_v11  ;;  %v1374_v33 = vpop.f32.mrb[21].mxu0  ;;  %3823 = vmatmul.mubr.f32.gmra.mrb[26].mxu0 %v5347_v16  ;;  %v1250_v34 = vadd.f32 %v3771_v54, %v1185_v26 }
 0x690   :  { %v5358_v35 = vadd.f32 %v1374_v33, %v1242_v7 }
 0x691   :  { %v1253_v36 = vadd.f32 %v3772_v56, %v1188_v31  ;;  %v5372_v56 = vld [vmem:[#allocation23 + $0x8] sm:$0xff] }
 0x692   :  { %v3786_v37 = vpop.f32.mrb[22].mxu0  ;;  %3825 = vmatprep.mubr.f32.mxu0 %v5358_v35 }
 0x693   :  { %v5361_v28 = vadd.f32 %v3786_v37, %v1253_v36  ;;  %v1384_v38 = vpop.f32.mrb[23].mxu0  ;;  %3826 = vmatmul.mubr.f32.gmra.mrb[28].mxu0 %v5355_v32 }
 0x694   :  { %v5364_v39 = vadd.f32 %v1384_v38, %v1250_v34 }
 0x696   :  { %3828 = vmatprep.mubr.f32.mxu0 %v5364_v39 }
 0x697   :  { %3829 = vmatmul.mubr.f32.gmra.mrb[30].mxu0 %v5361_v28 }
 0x75e   :  { %v3821_v41 = vpop.f32.mrb[24].mxu0 }
 0x75f   :  { %v1467_v40 = vpop.f32.mrb[25].mxu0 }
 0x760   :  { %v4083_v48 = vpack.c.bf16 %v3821_v41, %v1467_v40 }
 0x762   :  { %v3824_v49 = vpop.f32.mrb[26].mxu0  ;;  %4084 = vmatprep.subr.bf16.mxu1 %v4083_v48 }
 0x763   :  { %v1477_v50 = vpop.f32.mrb[27].mxu0  ;;  %4086 = vmatpush3.bf16.msra.mxu1 %v4083_v48 }
 0x764   :  { %v4087_v51 = vpack.c.bf16 %v3824_v49, %v1477_v50 }
 0x766   :  { %v3827_v52 = vpop.f32.mrb[28].mxu0  ;;  %4088 = vmatprep.subr.bf16.mxu1 %v4087_v51 }
 0x767   :  { %v1487_v53 = vpop.f32.mrb[29].mxu0  ;;  %4090 = vmatpush3.bf16.msra.mxu1 %v4087_v51 }
 0x768   :  { %v4091_v54 = vpack.c.bf16 %v3827_v52, %v1487_v53 }
 0x76a   :  { %v3830_v55 = vpop.f32.mrb[30].mxu0  ;;  %4092 = vmatprep.subr.bf16.mxu1 %v4091_v54 }
 0x76b   :  { %v1497_v43 = vpop.f32.mrb[31].mxu0  ;;  %4094 = vmatpush3.bf16.msra.mxu1 %v4091_v54 }
 0x76c   :  { %v4095_v42 = vpack.c.bf16 %v3830_v55, %v1497_v43 }
 0x76e   :  { %4096 = vmatprep.subr.bf16.mxu1 %v4095_v42 }
 0x76f   :  { %4098 = vmatpush3.bf16.msra.mxu1 %v4095_v42 }
 0x770   :  { %4100 = vmatprep.subr.bf16.mxu1 %v5165_v3 }
 0x772   :  { %3848 = vmatmul.mubr.msk.f32.vlgmr.msra.gmra.mrb[24].mxu1 %vm1514_vm3, %v5372_v56 }
 0x773   :  { %3850 = vmatprep.mubr.msk.f32.mxu1 %vm1514_vm3, %v5374_v57  ;;  %4102 = vmatpush3.bf16.msra.mxu1 %v5165_v3  ;;  %v5401_v3 = vld [vmem:[#allocation23 + $0x38] sm:$0xff] }
 0x774   :  { %4104 = vmatprep.subr.bf16.mxu1 %v5167_v5 }
 0x776   :  { %3851 = vmatmul.mubr.msk.f32.gmra.mrb[26].mxu1 %vm1514_vm3, %v5381_v58 }
 0x777   :  { %3853 = vmatprep.mubr.msk.f32.mxu1 %vm1514_vm3, %v5384_v59  ;;  %4106 = vmatpush3.bf16.msra.mxu1 %v5167_v5 }
 0x778   :  { %4108 = vmatprep.subr.bf16.mxu1 %v5172_v8 }
 0x77a   :  { %3854 = vmatmul.mubr.msk.f32.gmra.mrb[28].mxu1 %vm1514_vm3, %v5391_v44 }
 0x77b   :  { %3856 = vmatprep.mubr.msk.f32.mxu1 %vm1514_vm3, %v5394_v45  ;;  %4110 = vmatpush3.bf16.msra.mxu1 %v5172_v8 }
 0x77c   :  { %4112 = vmatprep.subr.bf16.mxu1 %v5179_v14 }
 0x77e   :  { %3857 = vmatmul.mubr.msk.f32.gmra.mrb[30].mxu1 %vm1514_vm3, %v5401_v3 }
 0x77f   :  { %4114 = vmatpush3.bf16.msra.mxu1 %v5179_v14 }
 0x780   :  { %4116 = vmatprep.subr.bf16.mxu1 %v5183_v17 }
 0x783   :  { %4118 = vmatpush3.bf16.msra.mxu1 %v5183_v17 }
 0x784   :  { %4120 = vmatprep.subr.bf16.mxu1 %v5187_v20 }
 0x787   :  { %4122 = vmatpush3.bf16.msra.mxu1 %v5187_v20 }
 0x788   :  { %4124 = vmatprep.subr.bf16.mxu1 %v5191_v22 }
 0x78b   :  { %4126 = vmatpush3.bf16.msra.mxu1 %v5191_v22 }
 0x78c   :  { %4128 = vmatprep.subr.bf16.mxu1 %v5195_v24 }
 0x78f   :  { %4130 = vmatpush3.bf16.msra.mxu1 %v5195_v24 }
 0x845   :  { %v3849_v5 = vpop.f32.mrb[24].mxu1 }
 0x846   :  { %v1605_v8 = vpop.f32.mrb[25].mxu1 }
 0x847   :  { %3861 = vmatprep.mubr.msk.f32.mxu0 %vm392_vm1, %v1605_v8 }
 0x848   :  { %3862 = vmatmul.mubr.msk.f32.vlgmr.msra.gmra.mrb[32].mxu0 %vm392_vm1, %v3849_v5 }
 0x849   :  { %v3852_v14 = vpop.f32.mrb[26].mxu1 }
 0x84a   :  { %v1615_v17 = vpop.f32.mrb[27].mxu1 }
 0x84b   :  { %3864 = vmatprep.mubr.msk.f32.mxu0 %vm392_vm1, %v1615_v17 }
 0x84c   :  { %3865 = vmatmul.mubr.msk.f32.gmra.mrb[34].mxu0 %vm392_vm1, %v3852_v14 }
 0x84d   :  { %v3855_v20 = vpop.f32.mrb[28].mxu1 }
 0x84e   :  { %v1625_v60 = vpop.f32.mrb[29].mxu1 }
 0x84f   :  { %3867 = vmatprep.mubr.msk.f32.mxu0 %vm392_vm1, %v1625_v60 }
 0x850   :  { %3868 = vmatmul.mubr.msk.f32.gmra.mrb[36].mxu0 %vm392_vm1, %v3855_v20 }
 0x851   :  { %v3858_v22 = vpop.f32.mrb[30].mxu1 }
 0x852   :  { %v1635_v24 = vpop.f32.mrb[31].mxu1 }
 0x853   :  { %3870 = vmatprep.mubr.msk.f32.mxu0 %vm392_vm1, %v1635_v24 }
 0x854   :  { %3871 = vmatmul.mubr.msk.f32.gmra.mrb[38].mxu0 %vm392_vm1, %v3858_v22 }
 0x855   :  { %3933 = vmatprep.mubr.msk.f32.mxu0 %vm1514_vm3, %v5368_v47  ;;  %v4336_v47 = vld [vmem:[#allocation9] sm:$0x3] }
 0x91b   :  { %v3863_v61 = vpop.f32.mrb[32].mxu0 }
 0x91c   :  { %v5427_v62 = vsub.f32 %v5342_v46, %v3863_v61  ;;  %v1734_v63 = vpop.f32.mrb[33].mxu0 }
 0x91d   :  { %v5430_v0 = vsub.f32 %v5344_v9, %v1734_v63 }
 0x91e   :  { %v1782_v4 = vmul.f32 %v5427_v62, %v5427_v62 }
 0x91f   :  { %v1781_v1 = vmul.f32 %v5430_v0, %v5430_v0  ;;  %v3866_v2 = vpop.f32.mrb[34].mxu0 }
 0x920   :  { %v5437_v6 = vsub.f32 %v5347_v16, %v3866_v2  ;;  %v1744_v7 = vpop.f32.mrb[35].mxu0 }
 0x921   :  { %v5440_v10 = vsub.f32 %v5350_v23, %v1744_v7  ;;  %3905 = vmatprep.mubr.f32.mxu1 %v1781_v1 }
 0x922   :  { %3906 = vmatmul.mubr.f32.vlgmr.msra.gmra.mrb[32].mxu1 %v1782_v4  ;;  %v1784_v11 = vmul.f32 %v5437_v6, %v5437_v6 }
 0x923   :  { %v1783_v46 = vmul.f32 %v5440_v10, %v5440_v10  ;;  %v3869_v9 = vpop.f32.mrb[36].mxu0 }
 0x924   :  { %v5447_v12 = vsub.f32 %v5355_v32, %v3869_v9  ;;  %v1754_v13 = vpop.f32.mrb[37].mxu0 }
 0x925   :  { %v5450_v15 = vsub.f32 %v5358_v35, %v1754_v13  ;;  %3908 = vmatprep.mubr.f32.mxu1 %v1783_v46 }
 0x926   :  { %3909 = vmatmul.mubr.f32.gmra.mrb[34].mxu1 %v1784_v11  ;;  %v1786_v19 = vmul.f32 %v5447_v12, %v5447_v12 }
 0x927   :  { %v1785_v16 = vmul.f32 %v5450_v15, %v5450_v15  ;;  %v3872_v18 = vpop.f32.mrb[38].mxu0 }
 0x928   :  { %v5457_v21 = vsub.f32 %v5361_v28, %v3872_v18  ;;  %v1764_v23 = vpop.f32.mrb[39].mxu0 }
 0x929   :  { %v5460_v25 = vsub.f32 %v5364_v39, %v1764_v23  ;;  %3911 = vmatprep.mubr.f32.mxu1 %v1785_v16 }
 0x92a   :  { %3912 = vmatmul.mubr.f32.gmra.mrb[36].mxu1 %v1786_v19  ;;  %v1788_v27 = vmul.f32 %v5457_v21, %v5457_v21 }
 0x92b   :  { %v1787_v26 = vmul.f32 %v5460_v25, %v5460_v25 }
 0x92d   :  { %3914 = vmatprep.mubr.f32.mxu1 %v1787_v26 }
 0x92e   :  { %3915 = vmatmul.mubr.f32.gmra.mrb[38].mxu1 %v1788_v27 }
 0x9f5   :  { %v3907_v29 = vpop.f32.mrb[32].mxu1 }
 0x9f6   :  { %v1855_v30 = vpop.f32.mrb[33].mxu1 }
 0x9f7   :  { %v4131_v31 = vpack.c.bf16 %v3907_v29, %v1855_v30 }
 0x9f9   :  { %v3910_v32 = vpop.f32.mrb[34].mxu1  ;;  %4132 = vmatprep.subr.bf16.mxu0 %v4131_v31 }
 0x9fa   :  { %v1865_v33 = vpop.f32.mrb[35].mxu1  ;;  %4134 = vmatpush3.bf16.msra.mxu0 %v4131_v31 }
 0x9fb   :  { %v4135_v34 = vpack.c.bf16 %v3910_v32, %v1865_v33 }
 0x9fd   :  { %v3913_v35 = vpop.f32.mrb[36].mxu1  ;;  %4136 = vmatprep.subr.bf16.mxu0 %v4135_v34 }
 0x9fe   :  { %v1875_v36 = vpop.f32.mrb[37].mxu1  ;;  %4138 = vmatpush3.bf16.msra.mxu0 %v4135_v34 }
 0x9ff   :  { %v4139_v37 = vpack.c.bf16 %v3913_v35, %v1875_v36 }
 0xa01   :  { %v3916_v28 = vpop.f32.mrb[38].mxu1  ;;  %4140 = vmatprep.subr.bf16.mxu0 %v4139_v37 }
 0xa02   :  { %v1885_v38 = vpop.f32.mrb[39].mxu1  ;;  %4142 = vmatpush3.bf16.msra.mxu0 %v4139_v37 }
 0xa03   :  { %v4143_v39 = vpack.c.bf16 %v3916_v28, %v1885_v38 }
 0xa05   :  { %4144 = vmatprep.subr.bf16.mxu0 %v4143_v39 }
 0xa06   :  { %4146 = vmatpush3.bf16.msra.mxu0 %v4143_v39 }
 0xa07   :  { %3945 = vmatprep.subr.msk.mxu0 %vm405_vm0, %v4336_v47 }
 0xa09   :  { %3934 = vmatmul.mubr.msk.f32.vlgmr.msra.gmra.mrb[40].mxu0 %vm1514_vm3, %v5372_v56 }
 0xa0a   :  { %3936 = vmatprep.mubr.msk.f32.mxu0 %vm1514_vm3, %v5374_v57  ;;  %3946 = vmatpush3.msk.msra.mxu0 %vm405_vm0, %v4336_v47 }
 0xa0d   :  { %3937 = vmatmul.mubr.msk.f32.gmra.mrb[42].mxu0 %vm1514_vm3, %v5381_v58 }
 0xa0e   :  { %3939 = vmatprep.mubr.msk.f32.mxu0 %vm1514_vm3, %v5384_v59 }
 0xa11   :  { %3940 = vmatmul.mubr.msk.f32.gmra.mrb[44].mxu0 %vm1514_vm3, %v5391_v44  ;;  %v2160_v44 = vpop.permute.xlu1 %2159 }
 0xa12   :  { %3942 = vmatprep.mubr.msk.f32.mxu0 %vm1514_vm3, %v5394_v45 }
 0xa15   :  { %3943 = vmatmul.mubr.msk.f32.gmra.mrb[46].mxu0 %vm1514_vm3, %v5401_v3  ;;  %v2155_v3 = vpop.permute.xlu0 %2154  ;;  %v2216_v61 = vpop.permute.xlu1 %2215 }
 0xa19   :  { %v2211_v1 = vpop.permute.xlu0 %2210  ;;  %v2170_v16 = vpop.permute.xlu1 %2169 }
 0xa1d   :  { %v2226_v30 = vpop.permute.xlu1 %2225 }
 0xadc   :  { %v3935_v41 = vpop.f32.mrb[40].mxu0 }
 0xadd   :  { %v1960_v40 = vpop.f32.mrb[41].mxu0 }
 0xade   :  { %3947 = vmatprep.mubr.msk.f32.mxu0 %vm392_vm1, %v1960_v40 }
 0xadf   :  { %3948 = vmatmul.mubr.msk.f32.vlgmr.msra.gmra.mrb[48].mxu0 %vm392_vm1, %v3935_v41 }
 0xae0   :  { %v3938_v48 = vpop.f32.mrb[42].mxu0 }
 0xae1   :  { %v1970_v49 = vpop.f32.mrb[43].mxu0 }
 0xae2   :  { %3950 = vmatprep.mubr.msk.f32.mxu0 %vm392_vm1, %v1970_v49  ;;  %v2180_v49 = vpop.permute.xlu1 %2179 }
 0xae3   :  { %3951 = vmatmul.mubr.msk.f32.gmra.mrb[50].mxu0 %vm392_vm1, %v3938_v48 }
 0xae4   :  { %v3941_v50 = vpop.f32.mrb[44].mxu0 }
 0xae5   :  { %v1980_v51 = vpop.f32.mrb[45].mxu0 }
 0xae6   :  { %3953 = vmatprep.mubr.msk.f32.mxu0 %vm392_vm1, %v1980_v51 }
 0xae7   :  { %3954 = vmatmul.mubr.msk.f32.gmra.mrb[52].mxu0 %vm392_vm1, %v3941_v50 }
 0xae8   :  { %v3944_v52 = vpop.f32.mrb[46].mxu0 }
 0xae9   :  { %v1990_v53 = vpop.f32.mrb[47].mxu0 }
 0xaea   :  { %3956 = vmatprep.mubr.msk.f32.mxu0 %vm392_vm1, %v1990_v53 }
 0xaeb   :  { %3957 = vmatmul.mubr.msk.f32.gmra.mrb[54].mxu0 %vm392_vm1, %v3944_v52 }
 0xbb2   :  { %v3949_v54 = vpop.f32.mrb[48].mxu0 }
 0xbb3   :  { %v2095_v55 = vadd.f32 1e-05, %v3949_v54  ;;  %v2089_v43 = vpop.f32.mrb[49].mxu0 }
 0xbb4   :  { %v2090_v42 = vadd.f32 1e-05, %v2089_v43 }
 0xbb5   :  { %4288 = vrsqrt.f32 %v2095_v55 }
 0xbb6   :  { %4290 = vrsqrt.f32 %v2090_v42  ;;  %v3952_v56 = vpop.f32.mrb[50].mxu0 }
 0xbb7   :  { %v2099_v57 = vpop.f32.mrb[51].mxu0  ;;  %v2105_v45 = vadd.f32 1e-05, %v3952_v56 }
 0xbb8   :  { %v2100_v5 = vadd.f32 1e-05, %v2099_v57 }
 0xbb9   :  { %4292 = vrsqrt.f32 %v2105_v45 }
 0xbba   :  { %v3955_v58 = vpop.f32.mrb[52].mxu0  ;;  %4294 = vrsqrt.f32 %v2100_v5 }
 0xbbb   :  { %v2109_v59 = vpop.f32.mrb[53].mxu0  ;;  %v2115_v34 = vadd.f32 1e-05, %v3955_v58 }
 0xbbc   :  { %v2110_v35 = vadd.f32 1e-05, %v2109_v59 }
 0xbbe   :  { %v5490_v8 = vpop.f32.mrb[54].mxu0 }
 0xbbf   :  { %v4289_v14 = vpop.eup %4288  ;;  %v5492_v17 = vpop.f32.mrb[55].mxu0  ;;  %v2125_v54 = vadd.f32 1e-05, %v5490_v8 }
 0xbc0   :  { %v4291_v20 = vpop.eup %4290  ;;  %v2137_v60 = vmul.f32 %v4289_v14, %v5427_v62  ;;  %v2120_v43 = vadd.f32 1e-05, %v5492_v17 }
 0xbc1   :  { %v2136_v22 = vmul.f32 %v4291_v20, %v5430_v0  ;;  %v2165_v0 = vpop.permute.xlu0 %2164 }
 0xbc2   :  { %v2193_v24 = vmul.f32 %v2160_v44, %v2137_v60 }
 0xbc3   :  { %v2192_v63 = vmul.f32 %v2155_v3, %v2136_v22  ;;  %v4293_v9 = vpop.eup %4292 }
 0xbc4   :  { %v2249_v2 = vadd.f32 %v2216_v61, %v2193_v24  ;;  %v4295_v11 = vpop.eup %4294  ;;  %v2139_v13 = vmul.f32 %v4293_v9, %v5437_v6 }
 0xbc5   :  { %v2248_v4 = vadd.f32 %v2211_v1, %v2192_v63  ;;  %v2138_v62 = vmul.f32 %v4295_v11, %v5440_v10  ;;  %v2221_v31 = vpop.permute.xlu0 %2220 }
 0xbc6   :  { %v3325_v7 = vmul.f32 -1.442695, %v2249_v2  ;;  %v2195_v19 = vmul.f32 %v2170_v16, %v2139_v13 }
 0xbc7   :  { %v3324_v46 = vmul.f32 -1.442695, %v2248_v4  ;;  %v2194_v27 = vmul.f32 %v2165_v0, %v2138_v62 }
 0xbc8   :  { %4296 = vpow2.f32 %v3325_v7  ;;  %v2251_v32 = vadd.f32 %v2226_v30, %v2195_v19 }
 0xbc9   :  { %4298 = vpow2.f32 %v3324_v46  ;;  %v2250_v33 = vadd.f32 %v2221_v31, %v2194_v27  ;;  %v2175_v52 = vpop.permute.xlu0 %2174 }
 0xbca   :  { %v3327_v36 = vmul.f32 -1.442695, %v2251_v32 }
 0xbcb   :  { %v3326_v6 = vmul.f32 -1.442695, %v2250_v33 }
 0xbcd   :  { %v2231_v42 = vpop.permute.xlu0 %2230 }
 0xbd1   :  { %v2185_v22 = vpop.permute.xlu0 %2184 }
 0xbd2   :  { %v4297_v18 = vpop.eup %4296 }
 0xbd3   :  { %v4299_v23 = vpop.eup %4298  ;;  %v2281_v26 = vadd.f32 1.0, %v4297_v18 }
 0xbd4   :  { %v2280_v29 = vadd.f32 1.0, %v4299_v23 }
 0xbd5   :  { %4300 = vrcp.f32 %v2281_v26 }
 0xbd6   :  { %4302 = vrcp.f32 %v2280_v29 }
 0xbd7   :  { %4304 = vrsqrt.f32 %v2115_v34  ;;  %v5634_v34 = vld [vmem:[#allocation6 + $0x2] ss:$0 sm:$0xff] }
 0xbd8   :  { %4306 = vrsqrt.f32 %v2110_v35 }
 0xbd9   :  { %4308 = vpow2.f32 %v3327_v36 }
 0xbda   :  { %4310 = vpow2.f32 %v3326_v6 }
 0xbdf   :  { %v4301_v10 = vpop.eup %4300 }
 0xbe0   :  { %v4303_v37 = vpop.eup %4302  ;;  %v5498_v28 = vmul.f32 %v4301_v10, %v2249_v2  ;;  %v2241_v2 = vpop.permute.xlu0 %2240 }
 0xbe1   :  { %v5500_v38 = vmul.f32 %v4303_v37, %v2248_v4  ;;  %v4305_v39 = vpop.eup %4304  ;;  %v5642_v37 = vld [vmem:[#allocation6] ss:$0 sm:$0xff] }
 0xbe2   :  { %2392 = vrot.lane.b32.xlu1 %v5498_v28, %s4788_s24  ;;  %v4307_v47 = vpop.eup %4306  ;;  %v2141_v48 = vmul.f32 %v4305_v39, %v5447_v12 }
 0xbe3   :  { %2390 = vrot.lane.b32.xlu0 %v5500_v38, %s4788_s24  ;;  %v4309_v41 = vpop.eup %4308  ;;  %v2140_v51 = vmul.f32 %v4307_v47, %v5450_v15  ;;  %v2236_v15 = vpop.permute.xlu1 %2235 }
 0xbe4   :  { %v4311_v40 = vpop.eup %4310  ;;  %v2283_v50 = vadd.f32 1.0, %v4309_v41  ;;  %v2197_v55 = vmul.f32 %v2180_v49, %v2141_v48  ;;  %v5650_v49 = vld [vmem:[#allocation6 + $0x6] ss:$0 sm:$0xff] }
 0xbe5   :  { %v2282_v53 = vadd.f32 1.0, %v4311_v40  ;;  %v2196_v12 = vmul.f32 %v2175_v52, %v2140_v51 }
 0xbe6   :  { %2314 = vrot.lane.b32.xlu1 %v5498_v28, %s4785_s16  ;;  %4312 = vrcp.f32 %v2283_v50  ;;  %v2253_v56 = vadd.f32 %v2236_v15, %v2197_v55  ;;  %v5658_v55 = vld [vmem:[#allocation6 + $0x3] ss:$0 sm:$0xff] }
 0xbe7   :  { %2312 = vrot.lane.b32.xlu0 %v5500_v38, %s4785_s16  ;;  %4314 = vrcp.f32 %v2282_v53  ;;  %v2252_v57 = vadd.f32 %v2231_v42, %v2196_v12  ;;  %v2190_v20 = vpop.permute.xlu1 %2189  ;;  %v2692_v42 = vld [vmem:[#allocation26] sm:$0xff] }
 0xbe8   :  { %4316 = vrsqrt.f32 %v2125_v54  ;;  %v3329_v58 = vmul.f32 -1.442695, %v2253_v56 }
 0xbe9   :  { %4318 = vrsqrt.f32 %v2120_v43  ;;  %v3328_v59 = vmul.f32 -1.442695, %v2252_v57  ;;  %v2693_v43 = vld [vmem:[#allocation26 + $0x8] sm:$0xff] }
 0xbea   :  { %2517 = vrot.lane.b32.xlu1 %v5498_v28, %s4787_s2  ;;  %4320 = vpow2.f32 %v3329_v58  ;;  %v2468_v58 = vpack.c.bf16 %v5498_v28, %v5500_v38 }
 0xbeb   :  { %2515 = vrot.lane.b32.xlu0 %v5500_v38, %s4787_s2  ;;  %4322 = vpow2.f32 %v3328_v59  ;;  %v2246_v1 = vpop.permute.xlu1 %2245 }
 0xbee   :  { %2431 = vrot.lane.b32.xlu1 %v5498_v28, %s5825_s30 }
 0xbef   :  { %2429 = vrot.lane.b32.xlu0 %v5500_v38, %s5825_s30 }
 0xbf0   :  { %v4313_v44 = vpop.eup %4312 }
 0xbf1   :  { %v4315_v45 = vpop.eup %4314  ;;  %v5534_v8 = vmul.f32 %v4313_v44, %v2251_v32  ;;  %v4234_v32 = vld [vmem:[#allocation24 + $0x4] ss:$20 sps:$4 sm:$0xff]   ;;  %v5670_v44 = vld [vmem:[#allocation6 + $0x1] ss:$0 sm:$0xff] }
 0xbf2   :  { %2353 = vrot.lane.b32.xlu1 %v5498_v28, %s4764_s20  ;;  %v4317_v3 = vpop.eup %4316  ;;  %v5536_v14 = vmul.f32 %v4315_v45, %v2250_v33  ;;  %2884 = vmatprep.mubr.bf16.mxu1 %v4234_v32  ;;  %v4240_v33 = vld [vmem:[#allocation24 + $0xc] ss:$20 sps:$4 sm:$0xff]   ;;  %v2695_v45 = vld [vmem:[#allocation26 + $0x18] sm:$0xff] }
 0xbf3   :  { %2351 = vrot.lane.b32.xlu0 %v5500_v38, %s4764_s20  ;;  %v4319_v5 = vpop.eup %4318  ;;  %v2143_v17 = vmul.f32 %v4317_v3, %v5457_v21  ;;  %2949 = vmatprep.mubr.bf16.mxu0 %v4240_v33  ;;  %v3060_v33 = vld [vmem:[#allocation29 + $0x18] sm:$0xff] }
 0xbf4   :  { %v2142_v60 = vmul.f32 %v4319_v5, %v5460_v25  ;;  %v4321_v63 = vpop.eup %4320 }
 0xbf5   :  { %v2199_v24 = vmul.f32 %v2190_v20, %v2143_v17  ;;  %v4323_v21 = vpop.eup %4322  ;;  %v2285_v25 = vadd.f32 1.0, %v4321_v63  ;;  %v2694_v17 = vld [vmem:[#allocation26 + $0x10] sm:$0xff]  ;;  %v2696_v63 = vld [vmem:[#allocation26 + $0x20] sm:$0xff] }
 0xbf6   :  { %2556 = vrot.lane.b32.xlu1 %v5498_v28, %s4789_s10  ;;  %v2198_v61 = vmul.f32 %v2185_v22, %v2142_v60  ;;  %v2284_v46 = vadd.f32 1.0, %v4323_v21  ;;  %v2697_v22 = vld [vmem:[#allocation26 + $0x28] sm:$0xff] }
 0xbf7   :  { %2554 = vrot.lane.b32.xlu0 %v5500_v38, %s4789_s10  ;;  %v2255_v4 = vadd.f32 %v2246_v1, %v2199_v24  ;;  %4324 = vrcp.f32 %v2285_v25  ;;  %v2699_v25 = vld [vmem:[#allocation26 + $0x38] sm:$0xff] }
 0xbf8   :  { %v2254_v7 = vadd.f32 %v2241_v2, %v2198_v61  ;;  %4326 = vrcp.f32 %v2284_v46 }
 0xbf9   :  { %v3331_v9 = vmul.f32 -1.442695, %v2255_v4 }
 0xbfa   :  { %2478 = vrot.lane.b32.xlu1 %v5498_v28, %s4786_s7  ;;  %v3330_v11 = vmul.f32 -1.442695, %v2254_v7 }
 0xbfb   :  { %2476 = vrot.lane.b32.xlu0 %v5500_v38, %s4786_s7  ;;  %4328 = vpow2.f32 %v3331_v9  ;;  %v2698_v9 = vld [vmem:[#allocation26 + $0x30] sm:$0xff] }
 0xbfc   :  { %4330 = vpow2.f32 %v3330_v11 }
 0xbfe   :  { %2396 = vrot.lane.b32.xlu1 %v5534_v8, %s4788_s24 }
 0xbff   :  { %2394 = vrot.lane.b32.xlu0 %v5536_v14, %s4788_s24 }
 0xc01   :  { %v4325_v13 = vpop.eup %4324 }
 0xc02   :  { %2318 = vrot.lane.b32.xlu1 %v5534_v8, %s4785_s16  ;;  %v4327_v16 = vpop.eup %4326  ;;  %v5568_v0 = vmul.f32 %v4325_v13, %v2253_v56 }
 0xc03   :  { %2316 = vrot.lane.b32.xlu0 %v5536_v14, %s4785_s16  ;;  %v5570_v19 = vmul.f32 %v4327_v16, %v2252_v57 }
 0xc05   :  { %v4329_v62 = vpop.eup %4328 }
 0xc06   :  { %2521 = vrot.lane.b32.xlu1 %v5534_v8, %s4787_s2  ;;  %v4331_v18 = vpop.eup %4330  ;;  %v2287_v23 = vadd.f32 1.0, %v4329_v62  ;;  %v3058_v62 = vld [vmem:[#allocation29 + $0x8] sm:$0xff] }
 0xc07   :  { %2519 = vrot.lane.b32.xlu0 %v5536_v14, %s4787_s2  ;;  %v2286_v26 = vadd.f32 1.0, %v4331_v18 }
 0xc08   :  { %4332 = vrcp.f32 %v2287_v23 }
 0xc09   :  { %4334 = vrcp.f32 %v2286_v26  ;;  %v3057_v26 = vld [vmem:[#allocation29] sm:$0xff] }
 0xc0a   :  { %2435 = vrot.lane.b32.xlu1 %v5534_v8, %s5825_s30 }
 0xc0b   :  { %2433 = vrot.lane.b32.xlu0 %v5536_v14, %s5825_s30 }
 0xc0e   :  { %2357 = vrot.lane.b32.xlu1 %v5534_v8, %s4764_s20 }
 0xc0f   :  { %2355 = vrot.lane.b32.xlu0 %v5536_v14, %s4764_s20 }
 0xc12   :  { %2560 = vrot.lane.b32.xlu1 %v5534_v8, %s4789_s10  ;;  %v4333_v27 = vpop.eup %4332 }
 0xc13   :  { %2558 = vrot.lane.b32.xlu0 %v5536_v14, %s4789_s10  ;;  %v4335_v29 = vpop.eup %4334  ;;  %v5592_v30 = vmul.f32 %v4333_v27, %v2255_v4  ;;  %v5690_v4 = vld [vmem:[#allocation6 + $0x5] ss:$0 sm:$0xff] }
 0xc14   :  { %v5594_v31 = vmul.f32 %v4335_v29, %v2254_v7 }
 0xc16   :  { %2482 = vrot.lane.b32.xlu1 %v5534_v8, %s4786_s7 }
 0xc17   :  { %2480 = vrot.lane.b32.xlu0 %v5536_v14, %s4786_s7 }
 0xc1a   :  { %2400 = vrot.lane.b32.xlu1 %v5568_v0, %s4788_s24 }
 0xc1b   :  { %2398 = vrot.lane.b32.xlu0 %v5570_v19, %s4788_s24 }
 0xc1e   :  { %2322 = vrot.lane.b32.xlu1 %v5568_v0, %s4785_s16 }
 0xc1f   :  { %2320 = vrot.lane.b32.xlu0 %v5570_v19, %s4785_s16 }
 0xc22   :  { %2525 = vrot.lane.b32.xlu1 %v5568_v0, %s4787_s2 }
 0xc23   :  { %2523 = vrot.lane.b32.xlu0 %v5570_v19, %s4787_s2 }
 0xc26   :  { %2439 = vrot.lane.b32.xlu1 %v5568_v0, %s5825_s30 }
 0xc27   :  { %2437 = vrot.lane.b32.xlu0 %v5570_v19, %s5825_s30 }
 0xc2a   :  { %2361 = vrot.lane.b32.xlu1 %v5568_v0, %s4764_s20 }
 0xc2b   :  { %2359 = vrot.lane.b32.xlu0 %v5570_v19, %s4764_s20 }
 0xc2e   :  { %2404 = vrot.lane.b32.xlu1 %v5592_v30, %s4788_s24 }
 0xc2f   :  { %2402 = vrot.lane.b32.xlu0 %v5594_v31, %s4788_s24 }
 0xc32   :  { %2326 = vrot.lane.b32.xlu1 %v5592_v30, %s4785_s16 }
 0xc33   :  { %2324 = vrot.lane.b32.xlu0 %v5594_v31, %s4785_s16 }
 0xc36   :  { %2529 = vrot.lane.b32.xlu1 %v5592_v30, %s4787_s2 }
 0xc37   :  { %2562 = vrot.lane.b32.xlu0 %v5570_v19, %s4789_s10 }
 0xc3a   :  { %2443 = vrot.lane.b32.xlu1 %v5592_v30, %s5825_s30 }
 0xc3b   :  { %2527 = vrot.lane.b32.xlu0 %v5594_v31, %s4787_s2 }
 0xc3e   :  { %2365 = vrot.lane.b32.xlu1 %v5592_v30, %s4764_s20 }
 0xc3f   :  { %2441 = vrot.lane.b32.xlu0 %v5594_v31, %s5825_s30 }
 0xc42   :  { %2564 = vrot.lane.b32.xlu1 %v5568_v0, %s4789_s10 }
 0xc43   :  { %2363 = vrot.lane.b32.xlu0 %v5594_v31, %s4764_s20 }
 0xc46   :  { %2486 = vrot.lane.b32.xlu1 %v5568_v0, %s4786_s7 }
 0xc47   :  { %2484 = vrot.lane.b32.xlu0 %v5570_v19, %s4786_s7 }
 0xc4a   :  { %2568 = vrot.lane.b32.xlu1 %v5592_v30, %s4789_s10 }
 0xc4b   :  { %2566 = vrot.lane.b32.xlu0 %v5594_v31, %s4789_s10 }
 0xc4e   :  { %2490 = vrot.lane.b32.xlu1 %v5592_v30, %s4786_s7 }
 0xc4f   :  { %2488 = vrot.lane.b32.xlu0 %v5594_v31, %s4786_s7 }
 0xc52   :  { %2595 = vrot.lane.b32.xlu1 %v5498_v28, %s4790_s6 }
 0xc53   :  { %2593 = vrot.lane.b32.xlu0 %v5500_v38, %s4790_s6  ;;  %v5680_v38 = vld [vmem:[#allocation6 + $0x7] ss:$0 sm:$0xff] }
 0xc54   :  { %v2393_v35 = vpop.permute.xlu1 %2392 }
 0xc55   :  { %v2414_v36 = vmul.f32 %v5634_v34, %v2393_v35  ;;  %v2391_v6 = vpop.permute.xlu0 %2390 }
 0xc56   :  { %v2413_v10 = vmul.f32 %v5634_v34, %v2391_v6  ;;  %2599 = vrot.lane.b32.xlu1 %v5534_v8, %s4790_s6  ;;  %v3059_v6 = vld [vmem:[#allocation29 + $0x10] sm:$0xff] }
 0xc57   :  { %2597 = vrot.lane.b32.xlu0 %v5536_v14, %s4790_s6 }
 0xc58   :  { %v2421_v39 = vpack.c.bf16 %v2414_v36, %v2413_v10  ;;  %v2315_v47 = vpop.permute.xlu1 %2314 }
 0xc59   :  { %v2336_v41 = vmul.f32 %v5642_v37, %v2315_v47  ;;  %v2313_v40 = vpop.permute.xlu0 %2312 }
 0xc5a   :  { %v2335_v48 = vmul.f32 %v5642_v37, %v2313_v40  ;;  %2603 = vrot.lane.b32.xlu1 %v5568_v0, %s4790_s6  ;;  %3575 = vmatprep.subr.bf16.mxu1 %v2421_v39 }
 0xc5b   :  { %2601 = vrot.lane.b32.xlu0 %v5570_v19, %s4790_s6 }
 0xc5c   :  { %v2343_v50 = vpack.c.bf16 %v2336_v41, %v2335_v48  ;;  %v2518_v51 = vpop.permute.xlu1 %2517  ;;  %v3062_v41 = vld [vmem:[#allocation29 + $0x28] sm:$0xff] }
 0xc5d   :  { %v2539_v52 = vmul.f32 %v5650_v49, %v2518_v51  ;;  %v2516_v53 = vpop.permute.xlu0 %2515 }
 0xc5e   :  { %v2538_v54 = vmul.f32 %v5650_v49, %v2516_v53  ;;  %2607 = vrot.lane.b32.xlu1 %v5592_v30, %s4790_s6  ;;  %3576 = vmatpush3.bf16.msra.mxu1 %v2343_v50  ;;  %v3061_v50 = vld [vmem:[#allocation29 + $0x20] sm:$0xff] }
 0xc5f   :  { %2605 = vrot.lane.b32.xlu0 %v5594_v31, %s4790_s6 }
 0xc60   :  { %v2546_v12 = vpack.c.bf16 %v2539_v52, %v2538_v54  ;;  %v2432_v15 = vpop.permute.xlu1 %2431  ;;  %v3064_v54 = vld [vmem:[#allocation29 + $0x38] sm:$0xff] }
 0xc61   :  { %v5663_v56 = vmul.f32 %v5658_v55, %v2432_v15  ;;  %v2430_v57 = vpop.permute.xlu0 %2429  ;;  %v3063_v15 = vld [vmem:[#allocation29 + $0x30] sm:$0xff] }
 0xc62   :  { %v5668_v59 = vmul.f32 %v5658_v55, %v2430_v57  ;;  %2707 = vperm.xlu1 %4215, %v2693_v43   ;;  %3615 = vmatprep.subr.bf16.mxu0 %v2546_v12  ;;  %v2469_v57 = vpack.c.bf16 %v5534_v8, %v5536_v14 }
 0xc63   :  { %2702 = vperm.xlu0 %4214, %v2692_v42   ;;  %3616 = vmatpush3.bf16.msra.mxu0 %v2468_v58 }
 0xc64   :  { %v2460_v3 = vpack.c.bf16 %v5663_v56, %v5668_v59  ;;  %v2354_v5 = vpop.permute.xlu1 %2353 }
 0xc65   :  { %v5675_v20 = vmul.f32 %v5670_v44, %v2354_v5  ;;  %v2352_v60 = vpop.permute.xlu0 %2351 }
 0xc66   :  { %v5678_v28 = vmul.f32 %v5670_v44, %v2352_v60  ;;  %2717 = vperm.xlu1 %4215, %v2695_v45  }
 0xc67   :  { %2712 = vperm.xlu0 %4214, %v2694_v17  }
 0xc68   :  { %v2382_v24 = vpack.c.bf16 %v5675_v20, %v5678_v28  ;;  %v2557_v61 = vpop.permute.xlu1 %2556 }
 0xc69   :  { %v5685_v21 = vmul.f32 %v5680_v38, %v2557_v61  ;;  %v2555_v1 = vpop.permute.xlu0 %2554 }
 0xc6a   :  { %v5688_v2 = vmul.f32 %v5680_v38, %v2555_v1  ;;  %2727 = vperm.xlu1 %4215, %v2697_v22  }
 0xc6b   :  { %2722 = vperm.xlu0 %4214, %v2696_v63  }
 0xc6c   :  { %v2585_v7 = vpack.c.bf16 %v5685_v21, %v5688_v2  ;;  %v2479_v46 = vpop.permute.xlu1 %2478 }
 0xc6d   :  { %v5695_v11 = vmul.f32 %v5690_v4, %v2479_v46  ;;  %v2477_v13 = vpop.permute.xlu0 %2476 }
 0xc6e   :  { %v5698_v16 = vmul.f32 %v5690_v4, %v2477_v13  ;;  %2737 = vperm.xlu1 %4215, %v2699_v25  }
 0xc6f   :  { %2732 = vperm.xlu0 %4214, %v2698_v9  }
 0xc70   :  { %v2507_v18 = vpack.c.bf16 %v5695_v11, %v5698_v16  ;;  %v2397_v23 = vpop.permute.xlu1 %2396 }
 0xc71   :  { %v2416_v27 = vmul.f32 %v5634_v34, %v2397_v23  ;;  %v2395_v29 = vpop.permute.xlu0 %2394 }
 0xc72   :  { %v2415_v32 = vmul.f32 %v5634_v34, %v2395_v29  ;;  %3072 = vperm.xlu1 %4215, %v3058_v62  }
 0xc73   :  { %3067 = vperm.xlu0 %4214, %v3057_v26  }
 0xc74   :  { %v2422_v35 = vpack.c.bf16 %v2416_v27, %v2415_v32  ;;  %v2319_v36 = vpop.permute.xlu1 %2318 }
 0xc75   :  { %v2338_v10 = vmul.f32 %v5642_v37, %v2319_v36  ;;  %v2317_v39 = vpop.permute.xlu0 %2316  ;;  %v2470_v36 = vpack.c.bf16 %v5568_v0, %v5570_v19 }
 0xc76   :  { %v2337_v47 = vmul.f32 %v5642_v37, %v2317_v39  ;;  %3082 = vperm.xlu1 %4215, %v3060_v33   ;;  %3577 = vmatprep.subr.bf16.mxu1 %v2422_v35 }
 0xc77   :  { %3077 = vperm.xlu0 %4214, %v3059_v6  }
 0xc78   :  { %v2344_v40 = vpack.c.bf16 %v2338_v10, %v2337_v47  ;;  %v2522_v48 = vpop.permute.xlu1 %2521 }
 0xc79   :  { %v2541_v51 = vmul.f32 %v5650_v49, %v2522_v48  ;;  %v2520_v52 = vpop.permute.xlu0 %2519 }
 0xc7a   :  { %v2540_v53 = vmul.f32 %v5650_v49, %v2520_v52  ;;  %3092 = vperm.xlu1 %4215, %v3062_v41   ;;  %3578 = vmatpush3.bf16.msra.mxu1 %v2344_v40 }
 0xc7b   :  { %3087 = vperm.xlu0 %4214, %v3061_v50  }
 0xc7c   :  { %v2547_v43 = vpack.c.bf16 %v2541_v51, %v2540_v53  ;;  %v2436_v12 = vpop.permute.xlu1 %2435 }
 0xc7d   :  { %v2434_v42 = vpop.permute.xlu0 %2433  ;;  %v2455_v19 = vmul.f32 %v5658_v55, %v2436_v12 }
 0xc7e   :  { %3102 = vperm.xlu1 %4215, %v3064_v54   ;;  %3617 = vmatprep.subr.bf16.mxu0 %v2547_v43  ;;  %v2454_v43 = vmul.f32 %v5658_v55, %v2434_v42 }
 0xc7f   :  { %3097 = vperm.xlu0 %4214, %v3063_v15   ;;  %3618 = vmatpush3.bf16.msra.mxu0 %v2469_v57 }
 0xc80   :  { %v2358_v58 = vpop.permute.xlu1 %2357 }
 0xc81   :  { %v2356_v45 = vpop.permute.xlu0 %2355 }
 0xc82   :  { %v2376_v57 = vmul.f32 %v5670_v44, %v2356_v45 }
 0xc84   :  { %v2561_v5 = vpop.permute.xlu1 %2560 }
 0xc85   :  { %v5710_v17 = vpop.permute.xlu0 %2558 }
 0xc88   :  { %v5712_v60 = vpop.permute.xlu1 %2482 }
 0xc89   :  { %v5714_v22 = vpop.permute.xlu0 %2480 }
 0xc8c   :  { %v2401_v61 = vpop.permute.xlu1 %2400 }
 0xc8d   :  { %v2418_v63 = vmul.f32 %v5634_v34, %v2401_v61  ;;  %v2399_v1 = vpop.permute.xlu0 %2398 }
 0xc8e   :  { %v2417_v25 = vmul.f32 %v5634_v34, %v2399_v1 }
 0xc90   :  { %v2423_v8 = vpack.c.bf16 %v2418_v63, %v2417_v25  ;;  %v2323_v14 = vpop.permute.xlu1 %2322  ;;  %v2461_v63 = vpack.c.bf16 %v2455_v19, %v2454_v43 }
 0xc91   :  { %v2340_v46 = vmul.f32 %v5642_v37, %v2323_v14  ;;  %v2321_v9 = vpop.permute.xlu0 %2320 }
 0xc92   :  { %v2339_v13 = vmul.f32 %v5642_v37, %v2321_v9  ;;  %3579 = vmatprep.subr.bf16.mxu1 %v2423_v8  ;;  %v2580_v8 = vmul.f32 %v5680_v38, %v2561_v5  ;;  %v2471_v9 = vpack.c.bf16 %v5592_v30, %v5594_v31  ;;  %v2502_v30 = vmul.f32 %v5690_v4, %v5712_v60 }
 0xc93   :  { %v2501_v31 = vmul.f32 %v5690_v4, %v5714_v22 }
 0xc94   :  { %v2345_v62 = vpack.c.bf16 %v2340_v46, %v2339_v13  ;;  %v2526_v23 = vpop.permute.xlu1 %2525 }
 0xc95   :  { %v2543_v26 = vmul.f32 %v5650_v49, %v2526_v23  ;;  %v2524_v27 = vpop.permute.xlu0 %2523  ;;  %v2508_v60 = vpack.c.bf16 %v2502_v30, %v2501_v31  ;;  %v4254_v30 = vld [vmem:[#allocation24 + $0x88] ss:$20 sps:$4 sm:$0xff]   ;;  %v4258_v31 = vld [vmem:[#allocation27] sm:$0xff]  }
 0xc96   :  { %v2542_v29 = vmul.f32 %v5650_v49, %v2524_v27  ;;  %3580 = vmatpush3.bf16.msra.mxu1 %v2345_v62 }
 0xc98   :  { %v2548_v32 = vpack.c.bf16 %v2543_v26, %v2542_v29  ;;  %v2440_v33 = vpop.permute.xlu1 %2439  ;;  %v4232_v29 = vld [vmem:[#allocation24] ss:$20 sps:$4 sm:$0xff]  }
 0xc99   :  { %v2438_v35 = vpop.permute.xlu0 %2437 }
 0xc9a   :  { %3619 = vmatprep.subr.bf16.mxu0 %v2548_v32  ;;  %v2456_v1 = vmul.f32 %v5658_v55, %v2438_v35 }
 0xc9b   :  { %3620 = vmatpush3.bf16.msra.mxu0 %v2470_v36 }
 0xc9c   :  { %v2362_v6 = vpop.permute.xlu1 %2361 }
 0xc9d   :  { %v2360_v10 = vpop.permute.xlu0 %2359  ;;  %v2379_v59 = vmul.f32 %v5670_v44, %v2362_v6 }
 0xca0   :  { %v2405_v39 = vpop.permute.xlu1 %2404 }
 0xca1   :  { %v2420_v47 = vmul.f32 %v5634_v34, %v2405_v39  ;;  %v2403_v41 = vpop.permute.xlu0 %2402 }
 0xca2   :  { %v2419_v40 = vmul.f32 %v5634_v34, %v2403_v41  ;;  %v2377_v34 = vmul.f32 %v5670_v44, %v2358_v58  ;;  %v4237_v41 = vld [vmem:[#allocation24 + $0x28] ss:$20 sps:$4 sm:$0xff]  }
 0xca4   :  { %v2424_v48 = vpack.c.bf16 %v2420_v47, %v2419_v40  ;;  %v2327_v50 = vpop.permute.xlu1 %2326  ;;  %v2383_v56 = vpack.c.bf16 %v2377_v34, %v2376_v57 }
 0xca5   :  { %v2342_v51 = vmul.f32 %v5642_v37, %v2327_v50  ;;  %v2325_v52 = vpop.permute.xlu0 %2324  ;;  %v4241_v50 = vld [vmem:[#allocation24 + $0x54] ss:$20 sps:$4 sm:$0xff]  }
 0xca6   :  { %v2341_v53 = vmul.f32 %v5642_v37, %v2325_v52  ;;  %3581 = vmatprep.subr.bf16.mxu1 %v2424_v48  ;;  %v2457_v37 = vmul.f32 %v5658_v55, %v2440_v33  ;;  %v3339_v48 = vld [vmem:[#allocation6 + $0x8] ss:$0 sm:$0xff] }
 0xca8   :  { %v2346_v54 = vpack.c.bf16 %v2342_v51, %v2341_v53  ;;  %v2530_v0 = vpop.permute.xlu1 %2529  ;;  %v2462_v14 = vpack.c.bf16 %v2457_v37, %v2456_v1  ;;  %v4247_v1 = vld [vmem:[#allocation24 + $0x7c] ss:$20 sps:$4 sm:$0xff]  }
 0xca9   :  { %v2563_v15 = vpop.permute.xlu0 %2562  ;;  %v2545_v12 = vmul.f32 %v5650_v49, %v2530_v0  ;;  %v4238_v0 = vld [vmem:[#allocation24 + $0x8] ss:$20 sps:$4 sm:$0xff]  }
 0xcaa   :  { %3582 = vmatpush3.bf16.msra.mxu1 %v2346_v54  ;;  %v2581_v21 = vmul.f32 %v5680_v38, %v2563_v15  ;;  %v4244_v15 = vld [vmem:[#allocation24 + $0x34] ss:$20 sps:$4 sm:$0xff]  }
 0xcab   :  { %3583 = vmatprep.subr.bf16.mxu1 %v2460_v3  ;;  %v2378_v3 = vmul.f32 %v5670_v44, %v2360_v10 }
 0xcac   :  { %v2444_v61 = vpop.permute.xlu1 %2443 }
 0xcad   :  { %v2528_v25 = vpop.permute.xlu0 %2527  ;;  %v2459_v20 = vmul.f32 %v5658_v55, %v2444_v61  ;;  %v4243_v61 = vld [vmem:[#allocation24 + $0x50] ss:$20 sps:$4 sm:$0xff]  }
 0xcae   :  { %v2544_v42 = vmul.f32 %v5650_v49, %v2528_v25  ;;  %3584 = vmatpush3.bf16.msra.mxu1 %v2382_v24  ;;  %v2579_v49 = vmul.f32 %v5680_v38, %v5710_v17  ;;  %v2384_v24 = vpack.c.bf16 %v2379_v59, %v2378_v3 }
 0xcaf   :  { %3585 = vmatprep.subr.bf16.mxu1 %v2461_v63 }
 0xcb0   :  { %v2549_v58 = vpack.c.bf16 %v2545_v12, %v2544_v42  ;;  %v2366_v45 = vpop.permute.xlu1 %2365  ;;  %v2586_v17 = vpack.c.bf16 %v2580_v8, %v2579_v49  ;;  %v4246_v42 = vld [vmem:[#allocation24 + $0x30] ss:$20 sps:$4 sm:$0xff]   ;;  %v4253_v49 = vld [vmem:[#allocation24 + $0x60] ss:$20 sps:$4 sm:$0xff]  }
 0xcb1   :  { %v2442_v46 = vpop.permute.xlu0 %2441 }
 0xcb2   :  { %v2458_v28 = vmul.f32 %v5658_v55, %v2442_v46  ;;  %3586 = vmatpush3.bf16.msra.mxu1 %v2383_v56  ;;  %3621 = vmatprep.subr.bf16.mxu0 %v2549_v58  ;;  %v2381_v55 = vmul.f32 %v5670_v44, %v2366_v45  ;;  %v4250_v58 = vld [vmem:[#allocation24 + $0x5c] ss:$20 sps:$4 sm:$0xff]  }
 0xcb3   :  { %3587 = vmatprep.subr.bf16.mxu1 %v2462_v14  ;;  %3622 = vmatpush3.bf16.msra.mxu0 %v2471_v9  ;;  %v4249_v14 = vld [vmem:[#allocation24 + $0x78] ss:$20 sps:$4 sm:$0xff]  }
 0xcb4   :  { %v2463_v13 = vpack.c.bf16 %v2459_v20, %v2458_v28  ;;  %v2565_v62 = vpop.permute.xlu1 %2564  ;;  %3623 = vmatprep.subr.bf16.mxu0 %v2585_v7  ;;  %v4337_v20 = vld [vmem:[#allocation3] sm:$0xff]  ;;  %v4338_v28 = vld [vmem:[#allocation3 + $0x8] sm:$0xff] }
 0xcb5   :  { %v2364_v5 = vpop.permute.xlu0 %2363  ;;  %v2582_v23 = vmul.f32 %v5680_v38, %v2565_v62  ;;  %v4255_v62 = vld [vmem:[#allocation24 + $0x84] ss:$20 sps:$4 sm:$0xff]  }
 0xcb6   :  { %v2380_v26 = vmul.f32 %v5670_v44, %v2364_v5  ;;  %3588 = vmatpush3.bf16.msra.mxu1 %v2384_v24  ;;  %v4235_v44 = vld [vmem:[#allocation24 + $0x2c] ss:$20 sps:$4 sm:$0xff]   ;;  %v3055_v24 = vpack.c.bf16 %v4338_v28, %v4337_v20  ;;  %v4339_v5 = vld [vmem:[#allocation3 + $0x10] sm:$0xff] }
 0xcb7   :  { %3589 = vmatprep.subr.bf16.mxu1 %v2463_v13  ;;  %3624 = vmatpush3.bf16.msra.mxu0 %v2507_v18  ;;  %v2587_v32 = vpack.c.bf16 %v2582_v23, %v2581_v21  ;;  %v4252_v13 = vld [vmem:[#allocation24 + $0x58] ss:$20 sps:$4 sm:$0xff]   ;;  %v4257_v23 = vld [vmem:[#allocation24 + $0x80] ss:$20 sps:$4 sm:$0xff]  }
 0xcb8   :  { %v2385_v2 = vpack.c.bf16 %v2381_v55, %v2380_v26  ;;  %v2487_v7 = vpop.permute.xlu1 %2486  ;;  %3625 = vmatprep.subr.bf16.mxu0 %v2586_v17  ;;  %v4340_v17 = vld [vmem:[#allocation3 + $0x18] sm:$0xff] }
 0xcb9   :  { %v2504_v22 = vmul.f32 %v5690_v4, %v2487_v7  ;;  %v2485_v27 = vpop.permute.xlu0 %2484  ;;  %v3056_v55 = vpack.c.bf16 %v4340_v17, %v4339_v5  ;;  %v4260_v26 = vld [vmem:[#allocation24 + $0x10] ss:$20 sps:$4 sm:$0xff]   ;;  %v4259_v21 = vld [vmem:[#allocation27 + $0x8] sm:$0xff]  }
 0xcba   :  { %v2503_v33 = vmul.f32 %v5690_v4, %v2485_v27  ;;  %3590 = vmatpush3.bf16.msra.mxu1 %v2385_v2  ;;  %v4262_v2 = vld [vmem:[#allocation27 + $0x10] sm:$0xff]   ;;  %v4261_v7 = vld [vmem:[#allocation24 + $0x38] ss:$20 sps:$4 sm:$0xff]  }
 0xcbb   :  { %3626 = vmatpush3.bf16.msra.mxu0 %v2508_v60  ;;  %v4263_v60 = vld [vmem:[#allocation27 + $0x18] sm:$0xff]  }
 0xcbc   :  { %v2509_v35 = vpack.c.bf16 %v2504_v22, %v2503_v33  ;;  %v2569_v36 = vpop.permute.xlu1 %2568  ;;  %3627 = vmatprep.subr.bf16.mxu0 %v2587_v32 }
 0xcbd   :  { %v2584_v11 = vmul.f32 %v5680_v38, %v2569_v36  ;;  %2885 = vmatmul.mubr.bf16.vlgmr.msra.gmra.mrb[40].mxu1 %v4232_v29  ;;  %v2567_v16 = vpop.permute.xlu0 %2566 }
 0xcbe   :  { %v2583_v18 = vmul.f32 %v5680_v38, %v2567_v16  ;;  %2892 = vmatprep.mubr.bf16.mxu1 %v4235_v44 }
 0xcbf   :  { %3628 = vmatpush3.bf16.msra.mxu0 %v2509_v35 }
 0xcc0   :  { %v2588_v6 = vpack.c.bf16 %v2584_v11, %v2583_v18  ;;  %v2491_v10 = vpop.permute.xlu1 %2490 }
 0xcc1   :  { %v2506_v39 = vmul.f32 %v5690_v4, %v2491_v10  ;;  %v2489_v47 = vpop.permute.xlu0 %2488 }
 0xcc2   :  { %v2505_v40 = vmul.f32 %v5690_v4, %v2489_v47  ;;  %3629 = vmatprep.subr.bf16.mxu0 %v2588_v6 }
 0xcc4   :  { %v2510_v51 = vpack.c.bf16 %v2506_v39, %v2505_v40  ;;  %v2596_v52 = vpop.permute.xlu1 %2595 }
 0xcc5   :  { %v2617_v53 = vmul.f32 %v3339_v48, %v2596_v52  ;;  %2893 = vmatmul.mubr.bf16.gmra.mrb[44].mxu1 %v4237_v41  ;;  %v2594_v54 = vpop.permute.xlu0 %2593 }
 0xcc6   :  { %v2616_v38 = vmul.f32 %v3339_v48, %v2594_v54  ;;  %3630 = vmatpush3.bf16.msra.mxu0 %v2510_v51  ;;  %2900 = vmatprep.mubr.bf16.mxu1 %v4241_v50 }
 0xcc8   :  { %v2624_v19 = vpack.c.bf16 %v2617_v53, %v2616_v38  ;;  %v2600_v43 = vpop.permute.xlu1 %2599 }
 0xcc9   :  { %v2619_v34 = vmul.f32 %v3339_v48, %v2600_v43  ;;  %v2598_v57 = vpop.permute.xlu0 %2597  ;;  %2950 = vmatmul.mubr.bf16.vlgmr.msra.gmra.mrb[56].mxu0 %v4238_v0 }
 0xcca   :  { %v2618_v4 = vmul.f32 %v3339_v48, %v2598_v57  ;;  %3959 = vmatprep.subr.bf16.mxu0 %v2624_v19  ;;  %4147 = vmatprep.subr.bf16.mxu1 %v2624_v19 }
 0xccb   :  { %3960 = vmatpush3.bf16.msra.mxu0 %v2624_v19  ;;  %4151 = vmatpush3.bf16.msra.mxu1 %v2624_v19 }
 0xccc   :  { %v2625_v63 = vpack.c.bf16 %v2619_v34, %v2618_v4  ;;  %v2604_v37 = vpop.permute.xlu1 %2603  ;;  %2957 = vmatprep.mubr.bf16.mxu0 %v4244_v15 }
 0xccd   :  { %v2621_v25 = vmul.f32 %v3339_v48, %v2604_v37  ;;  %2901 = vmatmul.mubr.bf16.gmra.mrb[48].mxu1 %v4243_v61  ;;  %v2602_v12 = vpop.permute.xlu0 %2601 }
 0xcce   :  { %v2620_v56 = vmul.f32 %v3339_v48, %v2602_v12  ;;  %3961 = vmatprep.subr.bf16.mxu0 %v2625_v63  ;;  %4148 = vmatprep.subr.bf16.mxu1 %v2625_v63 }
 0xccf   :  { %3962 = vmatpush3.bf16.msra.mxu0 %v2625_v63  ;;  %4152 = vmatpush3.bf16.msra.mxu1 %v2625_v63 }
 0xcd0   :  { %v2626_v59 = vpack.c.bf16 %v2621_v25, %v2620_v56  ;;  %v2608_v3 = vpop.permute.xlu1 %2607  ;;  %2908 = vmatprep.mubr.bf16.mxu1 %v4247_v1 }
 0xcd1   :  { %v2623_v45 = vmul.f32 %v3339_v48, %v2608_v3  ;;  %v2606_v8 = vpop.permute.xlu0 %2605  ;;  %2958 = vmatmul.mubr.bf16.gmra.mrb[60].mxu0 %v4246_v42 }
 0xcd2   :  { %v2622_v46 = vmul.f32 %v3339_v48, %v2606_v8  ;;  %3963 = vmatprep.subr.bf16.mxu0 %v2626_v59  ;;  %4149 = vmatprep.subr.bf16.mxu1 %v2626_v59 }
 0xcd3   :  { %3964 = vmatpush3.bf16.msra.mxu0 %v2626_v59  ;;  %4153 = vmatpush3.bf16.msra.mxu1 %v2626_v59 }
 0xcd4   :  { %v2627_v9 = vpack.c.bf16 %v2623_v45, %v2622_v46  ;;  %2965 = vmatprep.mubr.bf16.mxu0 %v4250_v58 }
 0xcd5   :  { %2909 = vmatmul.mubr.bf16.gmra.mrb[52].mxu1 %v4249_v14 }
 0xcd6   :  { %3965 = vmatprep.subr.bf16.mxu0 %v2627_v9  ;;  %4150 = vmatprep.subr.bf16.mxu1 %v2627_v9 }
 0xcd7   :  { %3966 = vmatpush3.bf16.msra.mxu0 %v2627_v9  ;;  %4154 = vmatpush3.bf16.msra.mxu1 %v2627_v9 }
 0xcd8   :  { %3971 = vmatprep.mubr.msk.bf16.mxu1 %vm1514_vm3, %v4253_v49  ;;  %3975 = vmatprep.subr.bf16.mxu1 %v3055_v24 }
 0xcd9   :  { %2966 = vmatmul.mubr.bf16.gmra.mrb[64].mxu0 %v4252_v13 }
 0xcda   :  { %2973 = vmatprep.mubr.bf16.mxu0 %v4255_v62 }
 0xcdd   :  { %3972 = vmatmul.mubr.msk.bf16.vlgmr.msra.gmra.mrb[56].mxu1 %vm1514_vm3, %v4254_v30 }
 0xcde   :  { %3976 = vmatpush3.bf16.msra.mxu1 %v3055_v24  ;;  %3979 = vmatprep.mubr.msk.bf16.mxu1 %vm1113_vm2, %v4258_v31 }
 0xcdf   :  { %3977 = vmatprep.subr.bf16.mxu1 %v3056_v55 }
 0xce1   :  { %2974 = vmatmul.mubr.bf16.gmra.mrb[68].mxu0 %v4257_v23  ;;  %v2708_v36 = vpop.permute.xlu1 %2707 }
 0xce2   :  { %3978 = vmatpush3.bf16.msra.mxu1 %v3056_v55  ;;  %3967 = vmatprep.mubr.msk.bf16.mxu0 %vm1514_vm3, %v4260_v26  ;;  %v2703_v44 = vpop.permute.xlu0 %2702 }
 0xce5   :  { %3980 = vmatmul.mubr.msk.bf16.vlgmr.msra.gmra.mrb[60].mxu1 %vm1113_vm2, %v4259_v21  ;;  %v2718_v47 = vpop.permute.xlu1 %2717 }
 0xce6   :  { %3983 = vmatprep.mubr.msk.bf16.mxu1 %vm1113_vm2, %v4262_v2  ;;  %v2713_v18 = vpop.permute.xlu0 %2712 }
 0xce9   :  { %3968 = vmatmul.mubr.msk.bf16.vlgmr.msra.gmra.mrb[72].mxu0 %vm1514_vm3, %v4261_v7  ;;  %v2728_v34 = vpop.permute.xlu1 %2727 }
 0xcea   :  { %v2723_v54 = vpop.permute.xlu0 %2722 }
 0xced   :  { %3984 = vmatmul.mubr.msk.bf16.gmra.mrb[56].mxu1 %vm1113_vm2, %v4263_v60  ;;  %v2738_v58 = vpop.permute.xlu1 %2737 }
 0xcee   :  { %v2733_v12 = vpop.permute.xlu0 %2732 }
 0xcf1   :  { %v3073_v5 = vpop.permute.xlu1 %3072 }
 0xcf2   :  { %v3068_v13 = vpop.permute.xlu0 %3067 }
 0xcf6   :  { %v3078_v60 = vpop.permute.xlu0 %3077 }
 0xd90   :  { %v3591_v22 = vpop.f32.mrb[40].mxu1 }
 0xd91   :  { %v3592_v27 = vpop.f32.mrb[41].mxu1 }
 0xd92   :  { %v3593_v29 = vadd.f32 %v3592_v27, %v3591_v22  ;;  %v3594_v32 = vpop.f32.mrb[42].mxu1  ;;  %v3083_v27 = vpop.permute.xlu1 %3082 }
 0xd93   :  { %v3595_v33 = vpop.f32.mrb[43].mxu1 }
 0xd94   :  { %v3596_v35 = vadd.f32 %v3595_v33, %v3594_v32  ;;  %v2887_v50 = vadd.f32 %v3593_v29, %v2703_v44 }
 0xd96   :  { %v2890_v0 = vadd.f32 %v3596_v35, %v2708_v36 }
 0xd98   :  { %v3597_v11 = vpop.f32.mrb[44].mxu1 }
 0xd99   :  { %v3598_v16 = vpop.f32.mrb[45].mxu1 }
 0xd9a   :  { %v3599_v6 = vadd.f32 %v3598_v16, %v3597_v11  ;;  %v3600_v10 = vpop.f32.mrb[46].mxu1  ;;  %v3088_v11 = vpop.permute.xlu0 %3087 }
 0xd9b   :  { %v3601_v39 = vpop.f32.mrb[47].mxu1 }
 0xd9c   :  { %v3602_v41 = vadd.f32 %v3601_v39, %v3600_v10  ;;  %v3631_v40 = vpop.f32.mrb[56].mxu0  ;;  %v2895_v42 = vadd.f32 %v3599_v6, %v2713_v18 }
 0xd9d   :  { %v3632_v48 = vpop.f32.mrb[57].mxu0 }
 0xd9e   :  { %v3633_v51 = vadd.f32 %v3632_v48, %v3631_v40  ;;  %v3634_v52 = vpop.f32.mrb[58].mxu0  ;;  %v2898_v45 = vadd.f32 %v3602_v41, %v2718_v47  ;;  %v3093_v47 = vpop.permute.xlu1 %3092 }
 0xd9f   :  { %v3635_v53 = vpop.f32.mrb[59].mxu0 }
 0xda0   :  { %v3636_v38 = vadd.f32 %v3635_v53, %v3634_v52  ;;  %v3603_v19 = vpop.f32.mrb[48].mxu1  ;;  %v2952_v43 = vadd.f32 %v3633_v51, %v2887_v50  ;;  %v3098_v53 = vpop.permute.xlu0 %3097 }
 0xda1   :  { %v3604_v15 = vpop.f32.mrb[49].mxu1 }
 0xda2   :  { %v3605_v57 = vadd.f32 %v3604_v15, %v3603_v19  ;;  %v3606_v61 = vpop.f32.mrb[50].mxu1  ;;  %v5779_v4 = vadd.f32 %v3636_v38, %v2890_v0 }
 0xda3   :  { %v3607_v63 = vpop.f32.mrb[51].mxu1 }
 0xda4   :  { %v3608_v37 = vadd.f32 %v3607_v63, %v3606_v61  ;;  %v3637_v1 = vpop.f32.mrb[60].mxu0  ;;  %v2903_v17 = vadd.f32 %v3605_v57, %v2723_v54  ;;  %v3103_v57 = vpop.permute.xlu1 %3102 }
 0xda5   :  { %v3638_v25 = vpop.f32.mrb[61].mxu0 }
 0xda6   :  { %v3639_v56 = vadd.f32 %v3638_v25, %v3637_v1  ;;  %v3640_v59 = vpop.f32.mrb[62].mxu0  ;;  %v2906_v21 = vadd.f32 %v3608_v37, %v2728_v34 }
 0xda7   :  { %v3641_v3 = vpop.f32.mrb[63].mxu0 }
 0xda8   :  { %v3642_v8 = vadd.f32 %v3641_v3, %v3640_v59  ;;  %v3609_v14 = vpop.f32.mrb[52].mxu1  ;;  %v2960_v46 = vadd.f32 %v3639_v56, %v2895_v42 }
 0xda9   :  { %v3610_v9 = vpop.f32.mrb[53].mxu1 }
 0xdaa   :  { %v3611_v49 = vadd.f32 %v3610_v9, %v3609_v14  ;;  %v3612_v20 = vpop.f32.mrb[54].mxu1  ;;  %v2963_v28 = vadd.f32 %v3642_v8, %v2898_v45 }
 0xdab   :  { %v3613_v24 = vpop.f32.mrb[55].mxu1 }
 0xdac   :  { %v3614_v62 = vadd.f32 %v3613_v24, %v3612_v20  ;;  %v3643_v30 = vpop.f32.mrb[64].mxu0  ;;  %v2911_v33 = vadd.f32 %v3611_v49, %v2733_v12 }
 0xdad   :  { %v3644_v31 = vpop.f32.mrb[65].mxu0 }
 0xdae   :  { %v3645_v55 = vadd.f32 %v3644_v31, %v3643_v30  ;;  %v3646_v23 = vpop.f32.mrb[66].mxu0  ;;  %v2914_v16 = vadd.f32 %v3614_v62, %v2738_v58 }
 0xdaf   :  { %v3647_v26 = vpop.f32.mrb[67].mxu0 }
 0xdb0   :  { %v2968_v2 = vadd.f32 %v3645_v55, %v2903_v17  ;;  %v3648_v7 = vadd.f32 %v3647_v26, %v3646_v23 }
 0xdb2   :  { %v2971_v22 = vadd.f32 %v3648_v7, %v2906_v21  ;;  %v4169_v1 = vadd.f32 %v3088_v11, %v2968_v2 }
 0xdb4   :  { %v3649_v29 = vpop.f32.mrb[68].mxu0  ;;  %v4173_v8 = vadd.f32 %v3093_v47, %v2971_v22 }
 0xdb5   :  { %v3650_v32 = vpop.f32.mrb[69].mxu0 }
 0xdb6   :  { %v3651_v44 = vadd.f32 %v3650_v32, %v3649_v29  ;;  %v3652_v35 = vpop.f32.mrb[70].mxu0 }
 0xdb7   :  { %v3653_v36 = vpop.f32.mrb[71].mxu0 }
 0xdb8   :  { %v2976_v18 = vadd.f32 %v3651_v44, %v2911_v33  ;;  %v3654_v6 = vadd.f32 %v3653_v36, %v3652_v35  ;;  %v3981_v10 = vpop.f32.mrb[60].mxu1 }
 0xdb9   :  { %v3171_v39 = vpop.f32.mrb[61].mxu1 }
 0xdba   :  { %v2979_v41 = vadd.f32 %v3654_v6, %v2914_v16  ;;  %v3982_v40 = vpop.f32.mrb[62].mxu1  ;;  %v4167_v34 = vadd.f32 %v3098_v53, %v2976_v18 }
 0xdbb   :  { %v3174_v48 = vpop.f32.mrb[63].mxu1 }
 0xdbc   :  { %v3969_v50 = vpop.f32.mrb[72].mxu0  ;;  %v4171_v59 = vadd.f32 %v3103_v57, %v2979_v41 }
 0xdbd   :  { %v3025_v51 = vadd.f32 %v3969_v50, %v2960_v46  ;;  %v3016_v52 = vpop.f32.mrb[73].mxu0 }
 0xdbe   :  { %v3017_v54 = vadd.f32 %v3016_v52, %v2952_v43  ;;  %v3970_v0 = vpop.f32.mrb[74].mxu0 }
 0xdbf   :  { %v4156_v38 = vadd.f32 %v3078_v60, %v3025_v51  ;;  %v3028_v19 = vadd.f32 %v3970_v0, %v2963_v28  ;;  %v3019_v15 = vpop.f32.mrb[75].mxu0 }
 0xdc0   :  { %v4159_v61 = vadd.f32 %v3068_v13, %v3017_v54  ;;  %v3020_v63 = vadd.f32 %v3019_v15, %v5779_v4  ;;  %v3985_v37 = vpop.f32.mrb[56].mxu1 }
 0xdc1   :  { %v4157_v25 = vadd.f32 %v4156_v38, %v3981_v10  ;;  %v4162_v12 = vadd.f32 %v3083_v27, %v3028_v19  ;;  %v4168_v42 = vadd.f32 %v4167_v34, %v3985_v37  ;;  %v3187_v56 = vpop.f32.mrb[57].mxu1 }
 0xdc2   :  { %v4160_v3 = vadd.f32 %v4159_v61, %v3171_v39  ;;  %v4165_v43 = vadd.f32 %v3073_v5, %v3020_v63  ;;  %v4170_v58 = vadd.f32 %v4169_v1, %v3187_v56  ;;  %v3986_v45 = vpop.f32.mrb[58].mxu1 }
 0xdc3   :  { %3212 = vst [vmem:[#allocation30 + $0x10] sm:$0xff] %v4157_v25  ;;  %v4163_v14 = vadd.f32 %v4162_v12, %v3982_v40  ;;  %3216 = vst [vmem:[#allocation30 + $0x30] sm:$0xff] %v4168_v42  ;;  %v4172_v46 = vadd.f32 %v4171_v59, %v3986_v45  ;;  %v3190_v9 = vpop.f32.mrb[59].mxu1 }
 0xdc4   :  { %3210 = vst [vmem:[#allocation30] sm:$0xff] %v4160_v3  ;;  %v4166_v4 = vadd.f32 %v4165_v43, %v3174_v48  ;;  %3214 = vst [vmem:[#allocation30 + $0x20] sm:$0xff] %v4170_v58  ;;  %v4174_v49 = vadd.f32 %v4173_v8, %v3190_v9 }
 0xdc5   :  { %3213 = vst [vmem:[#allocation30 + $0x18] sm:$0xff] %v4163_v14  ;;  %3217 = vst [vmem:[#allocation30 + $0x38] sm:$0xff] %v4172_v46 }
 0xdc6   :  { %3211 = vst [vmem:[#allocation30 + $0x8] sm:$0xff] %v4166_v4  ;;  %3215 = vst [vmem:[#allocation30 + $0x28] sm:$0xff] %v4174_v49 }
 0xdc7   :  { %4726 = shalt.err (!%p4723_p0)
}
 0xdc8   :  { %s5826_s23 = sld [smem:[#allocation43_spill]] }
 0xdce   :  { %s4727_s1 = scalar_lea.hbm %s5826_s23, 1024 }
 0xdcf   :  { %p4728_p1 = scmp.ne.s32.totalorder %s5826_s23, %s4727_s1  ;;  %p4731_p2 = scmp.lt.u32.totalorder %s4727_s1, %s5826_s23 }
 0xdd1   :  { %p4733_p3 = pnand %p4731_p2, %p4728_p1 }
 0xdd3   :  { %4736 = shalt.err (!%p4733_p3)
}
 0xdd4   :  { %3229 = dma.vmem_to_hbm [thread:$0]  %s3224_s26, 1024, %s5826_s23, [#allocation5], %s4763_s27, %s4763_s27, %s4764_s20  }
 0xdd5   :  { %4755 = dma.done.wait [#allocation5], 1024  }
 0xdd6   :  { %4756 = vsyncadd [#allocation5], 4294966272 }
 0xdd7   :  { %3233 = vsyncpa [#allocation4], 1 }
 0xdd8   :  { %3234 = vsyncpa [#allocation7], 1 }
 0xdd9   :  { %3235 = vsyncpa [#allocation10], 1 }
 0xdda   :  { %3236 = vsyncpa [#allocation13], 1 }
 0xddb   :  { %3237 = vsyncpa [#allocation16], 1 }
 0xddc   :  { %3238 = vsyncpa [#allocation19], 1 }
 0xddd   :  { %3239 = vsyncpa [#allocation22], 1 }
 0xdde   :  { %3240 = vsyncpa [#allocation25], 1 }
 0xddf   :  { %3241 = vsyncpa [#allocation28], 1 }
 0xde0   :  { %3242 = vsyncpa [#allocation5], 1 }

</bundles_post_ra>
